<compile_context>
chip_gen: v6e
topology: v6e:2x2x1
jax: 0.10.0
libtpu: 0.0.40
codegen_flags: <defaults>
</compile_context>

<pallas_src>
import numpy as np
import jax
import jax.numpy as jnp
from jax.experimental import pallas as pl
from jax.experimental.pallas import tpu as pltpu


# ---------------------------------------------------------------------------
# Host-side construction of the matmul operands (pure numpy on concrete params)
# ---------------------------------------------------------------------------

def _band_stack(w, scale, W):
    """Stack the three kernel-row banded matrices along K -> (3*W*Cin, W*Cout).

    concat([x[r-1], x[r], x[r+1]], lanes) @ result  ==  padded 3x3 conv (BN scale folded)
    for every row r of the lane-dense (rows, W*Cin) activation.
    """
    _, _, Cin, Cout = w.shape
    ws = w * scale[None, None, None, :]
    B = np.zeros((3, W * Cin, W * Cout), np.float32)
    for kh in range(3):
        for kw in range(3):
            dw = kw - 1
            for wo in range(W):
                wi = wo + dw
                if 0 <= wi < W:
                    B[kh, wi * Cin:(wi + 1) * Cin, wo * Cout:(wo + 1) * Cout] = ws[kh, kw]
    return B.reshape(3 * W * Cin, W * Cout)


def _row_pool_matrix(Hb, nb):
    """Block-diagonal (nb*Hb/2, nb*Hb): averages row pairs within each stacked image."""
    A = np.zeros((nb * Hb // 2, nb * Hb), np.float32)
    for b in range(nb):
        for i in range(Hb // 2):
            A[b * Hb // 2 + i, b * Hb + 2 * i] = 0.5
            A[b * Hb // 2 + i, b * Hb + 2 * i + 1] = 0.5
    return A


def _col_pool_matrix(W, C):
    P = np.zeros((W * C, (W // 2) * C), np.float32)
    for wo in range(W // 2):
        for c in range(C):
            P[(2 * wo) * C + c, wo * C + c] = 0.5
            P[(2 * wo + 1) * C + c, wo * C + c] = 0.5
    return P


def _mean_w_matrix(Wf, C):
    """(rows, Wf*C) @ M -> (rows, C): mean over W positions for every channel."""
    M = np.zeros((Wf * C, C), np.float32)
    for w in range(Wf):
        for c in range(C):
            M[w * C + c, c] = 1.0 / Wf
    return M


def _const_index_map(ndim):
    return lambda g: (0,) * ndim


# ---------------------------------------------------------------------------
# Fused Pallas kernel: nb images per grid step, whole network in one body
# ---------------------------------------------------------------------------

def _halo_shifts(x, Hb):
    """x_prev[r] = x[r-1], x_next[r] = x[r+1] within each Hb-row image (zero at halos)."""
    R = x.shape[0]
    rolled_prev = pltpu.roll(x, 1, 0)          # out[r] = x[r-1]  (wraps; masked below)
    rolled_next = pltpu.roll(x, R - 1, 0)      # out[r] = x[r+1]
    rim = jax.lax.broadcasted_iota(jnp.int32, x.shape, 0) % Hb
    x_prev = jnp.where(rim == 0, 0.0, rolled_prev)
    x_next = jnp.where(rim == Hb - 1, 0.0, rolled_next)
    return x_prev, x_next


def _make_fused_kernel(block_hs, Hf, use_sel):
    def kernel(*refs):
        idx = 0
        x = refs[idx][0]; idx += 1             # (nb*H, W*Cin) f32, nb images stacked on rows

        for Hb in block_hs:
            band1, bias1, band2, bias2, a_ref, p_ref = refs[idx:idx + 6]; idx += 6
            for band_ref, bias_ref in ((band1, bias1), (band2, bias2)):
                x_prev, x_next = _halo_shifts(x, Hb)
                xs = jnp.concatenate([x_prev, x, x_next], axis=-1).astype(jnp.bfloat16)
                acc = jnp.dot(xs, band_ref[...], preferred_element_type=jnp.float32)
                x = jnp.maximum(acc + bias_ref[...], 0.0)        # folded BN bias + ReLU
            # 2x2 average pool: per-image row pairing (block-diag A) then column pooling.
            rows = jnp.dot(a_ref[...], x.astype(jnp.bfloat16),
                           preferred_element_type=jnp.float32)
            x = jnp.dot(rows.astype(jnp.bfloat16), p_ref[...],
                        preferred_element_type=jnp.float32)

        mw_ref = refs[idx]; idx += 1
        xm = jnp.dot(x, mw_ref[...], preferred_element_type=jnp.float32)   # (nb*Hf, C8)
        if use_sel:
            sel_ref = refs[idx]; idx += 1
            Rf = xm.shape[0]
            m = xm
            for s in range(1, Hf):              # running max over the Hf rows of each image
                m = jnp.maximum(m, pltpu.roll(xm, (Rf - s) % Rf, 0))
            feat = jnp.dot(sel_ref[...], m, preferred_element_type=jnp.float32)  # (nb, C8)
        else:
            feat = xm                           # Hf == 1: max over H is the identity

        w1, b1, alpha, bns, bnb, w2p, b2p = refs[idx:idx + 7]
        o_ref = refs[-1]
        # Dropout is identity in eval mode; FC head is tiny -> keep it in f32.
        h = jnp.dot(feat, w1[...], preferred_element_type=jnp.float32) + b1[...]
        h = jnp.where(h >= 0.0, h, alpha[...] * h)               # PReLU
        h = h * bns[...] + bnb[...]                              # BatchNorm1d (eval)
        o_ref[0] = jnp.dot(h, w2p[...], preferred_element_type=jnp.float32) + b2p[...]

    return kernel


# ---------------------------------------------------------------------------
# Wrapper: builds all constant operands once and returns a jittable forward fn
# ---------------------------------------------------------------------------

def make_forward(params, *, N, H, W, in_channels, num_classes, nb=None):
    assert H % 16 == 0 and W % 16 == 0, "spatial dims must survive four 2x2 avg-pools"
    blocks, fc = params["blocks"], params["fc"]

    if nb is None:
        nb = max(1, min(N, max(1, 256 // H)))   # aim for >=256 activation rows per step
        if N > 1:
            nb = min(nb, (N + 1) // 2)          # keep >= 2 grid steps (v7x dual-TC)
    grid_n = -(-N // nb)
    n_pad = grid_n * nb

    consts = []

    def add(a, dt):
        consts.append(jnp.asarray(np.asarray(a, np.float32), dt))

    block_hs = []
    Hb, Wb, cin = H, W, in_channels
    for block in blocks:
        cout = int(block[0]["w"].shape[-1])
        block_hs.append(Hb)
        for layer in block:
            w_np = np.asarray(layer["w"], np.float32)
            s_np = np.asarray(layer["scale"], np.float32)
            b_np = np.asarray(layer["bias"], np.float32)
            add(_band_stack(w_np, s_np, Wb), jnp.bfloat16)       # bf16 MXU operand
            add(np.tile(b_np, Wb)[None, :], jnp.float32)         # bias stays f32
        add(_row_pool_matrix(Hb, nb), jnp.bfloat16)
        add(_col_pool_matrix(Wb, cout), jnp.bfloat16)
        Hb, Wb, cin = Hb // 2, Wb // 2, cout

    Hf, Wf, c8 = Hb, Wb, cin
    h1 = int(np.asarray(fc["w1"]).shape[1])
    add(_mean_w_matrix(Wf, c8), jnp.float32)
    use_sel = Hf > 1
    if use_sel:
        sel = np.zeros((nb, nb * Hf), np.float32)
        sel[np.arange(nb), np.arange(nb) * Hf] = 1.0
        add(sel, jnp.float32)

    out_pad = max(128, ((num_classes + 127) // 128) * 128)       # lane-dense output block
    w2p = np.zeros((h1, out_pad), np.float32)
    w2p[:, :num_classes] = np.asarray(fc["w2"], np.float32)
    b2p = np.zeros((1, out_pad), np.float32)
    b2p[0, :num_classes] = np.asarray(fc["b2"], np.float32).reshape(-1)
    for a in (fc["w1"], fc["b1"], fc["alpha"], fc["bn_scale"], fc["bn_bias"], w2p, b2p):
        add(a, jnp.float32)

    kernel = _make_fused_kernel(block_hs, Hf, use_sel)

    in_specs = [pl.BlockSpec((1, nb * H, W * in_channels), lambda g: (g, 0, 0))]
    in_specs += [pl.BlockSpec(tuple(c.shape), _const_index_map(c.ndim)) for c in consts]
    # TODO(synk): mark constant specs pipeline_mode=pl.Buffered(1) when VMEM gets tight at
    #             larger base_size / nb (their index_map never changes across the grid).

    call = pl.pallas_call(
        kernel,
        out_shape=jax.ShapeDtypeStruct((grid_n, nb, out_pad), jnp.float32),
        grid=(grid_n,),
        in_specs=in_specs,
        out_specs=pl.BlockSpec((1, nb, out_pad), lambda g: (g, 0, 0)),
        compiler_params=pltpu.CompilerParams(
            dimension_semantics=("parallel",),
            vmem_limit_bytes=32 * 1024 * 1024),
    )

    consts = tuple(consts)

    def forward(x_nchw):
        # NCHW -> NHWC -> lane-dense (N, H, W*Cin) -> (grid_n, nb*H, W*Cin).
        # TODO(synk): accept NHWC directly from the data pipeline to drop this transpose.
        x = jnp.transpose(x_nchw, (0, 2, 3, 1)).astype(jnp.float32)
        x = x.reshape(N, H, W * in_channels)
        if n_pad != N:
            x = jnp.concatenate(
                [x, jnp.zeros((n_pad - N, H, W * in_channels), jnp.float32)], axis=0)
        x = x.reshape(grid_n, nb * H, W * in_channels)
        out = call(x, *consts)                                   # (grid_n, nb, out_pad)
        return out.reshape(n_pad, out_pad)[:N, :num_classes]

    return forward


# ---------------------------------------------------------------------------
# Deterministic parameter init (mirrors the PyTorch module's init) + reference
# ---------------------------------------------------------------------------

def _fold_bn(conv_bias, gamma, beta, running_mean, running_var, eps=1e-5):
    scale = gamma / jnp.sqrt(running_var + eps)
    bias = (conv_bias - running_mean) * scale + beta
    return scale, bias


def init_params(key, num_classes, in_channels, base_size):
    blocks = []
    chans = [(in_channels, base_size),
             (base_size, base_size * 2),
             (base_size * 2, base_size * 4),
             (base_size * 4, base_size * 8)]
    for cin, cout in chans:
        block = []
        for ci, co in ((cin, cout), (cout, cout)):
            key, k = jax.random.split(key)
            fan_in = ci * 9
            w = jax.random.normal(k, (3, 3, ci, co), jnp.float32) * jnp.sqrt(2.0 / fan_in)
            conv_b = jnp.zeros((co,), jnp.float32)
            gamma, beta = jnp.ones((co,), jnp.float32), jnp.zeros((co,), jnp.float32)
            rmean, rvar = jnp.zeros((co,), jnp.float32), jnp.ones((co,), jnp.float32)
            scale, bias = _fold_bn(conv_b, gamma, beta, rmean, rvar)
            block.append({"w": w, "scale": scale, "bias": bias})
        blocks.append(block)

    c8, h1 = base_size * 8, base_size * 2
    key, k1, k2, k3, k4 = jax.random.split(key, 5)
    lim1 = 1.0 / float(np.sqrt(c8))
    lim2 = 1.0 / float(np.sqrt(h1))
    fc = {
        "w1": jax.random.uniform(k1, (c8, h1), jnp.float32, -lim1, lim1),
        "b1": jax.random.uniform(k2, (1, h1), jnp.float32, -lim1, lim1),
        "alpha": jnp.full((1, h1), 0.25, jnp.float32),   # PReLU default scalar, broadcast
        "bn_scale": jnp.full((1, h1), 1.0 / np.sqrt(1.0 + 1e-5), jnp.float32),
        "bn_bias": jnp.zeros((1, h1), jnp.float32),
        "w2": jax.random.uniform(k3, (h1, num_classes), jnp.float32, -lim2, lim2),
        "b2": jax.random.uniform(k4, (1, num_classes), jnp.float32, -lim2, lim2),
    }
    return {"blocks": blocks, "fc": fc}


def reference_forward(x_nchw, params):
    """Pure-JAX (XLA) reference with identical eval-mode semantics."""
    x = jnp.transpose(x_nchw, (0, 2, 3, 1)).astype(jnp.float32)          # NHWC
    for block in params["blocks"]:
        for layer in block:
            y = jax.lax.conv_general_dilated(
                x, layer["w"], (1, 1), "SAME",
                dimension_numbers=("NHWC", "HWIO", "NHWC"),
                precision=jax.lax.Precision.HIGHEST)
            x = jnp.maximum(y * layer["scale"] + layer["bias"], 0.0)
        n, h, w, c = x.shape
        x = x.reshape(n, h // 2, 2, w // 2, 2, c).mean(axis=(2, 4))
    feat = jnp.max(jnp.mean(x, axis=2), axis=1)                          # mean W, max H
    fc = params["fc"]
    h = jnp.dot(feat, fc["w1"], precision=jax.lax.Precision.HIGHEST) + fc["b1"]
    h = jnp.where(h >= 0.0, h, fc["alpha"] * h)
    h = h * fc["bn_scale"] + fc["bn_bias"]
    return jnp.dot(h, fc["w2"], precision=jax.lax.Precision.HIGHEST) + fc["b2"]


# ---------------------------------------------------------------------------

if __name__ == "__main__":
    num_classes, in_channels, base_size = 10, 4, 8
    N, H, W = 4, 16, 16                      # 16x16 -> 1x1 after four 2x2 avg-pools

    key = jax.random.PRNGKey(0)
    kparams, kx = jax.random.split(key)
    params = init_params(kparams, num_classes, in_channels, base_size)
    x = jax.random.normal(kx, (N, in_channels, H, W), jnp.float32)       # NCHW like PyTorch

    fwd = jax.jit(make_forward(params, N=N, H=H, W=W,
                               in_channels=in_channels, num_classes=num_classes))
    out = jax.block_until_ready(fwd(x))

    assert out.shape == (N, num_classes), out.shape
    assert bool(jnp.all(jnp.isfinite(out)))

    ref = reference_forward(x, params)
    max_err = float(jnp.max(jnp.abs(out - ref)))
    scale = float(jnp.max(jnp.abs(ref)))
    tol = 5e-2 + 5e-2 * scale                # bf16 MXU operands, f32 accumulation
    assert max_err < tol, f"mismatch vs pure-JAX reference: max|diff|={max_err}, tol={tol}"

    print("KERNEL_OK")
</pallas_src>

<mosaic_0001>
module attributes {stable_mosaic.version = 11 : i64} {
  func.func @kernel(%arg0: i32, %arg1: memref<1x32x64xf32, #tpu.memory_space<vmem>>, %arg2: memref<192x128xbf16, #tpu.memory_space<vmem>>, %arg3: memref<1x128xf32, #tpu.memory_space<vmem>>, %arg4: memref<384x128xbf16, #tpu.memory_space<vmem>>, %arg5: memref<1x128xf32, #tpu.memory_space<vmem>>, %arg6: memref<16x32xbf16, #tpu.memory_space<vmem>>, %arg7: memref<128x64xbf16, #tpu.memory_space<vmem>>, %arg8: memref<192x128xbf16, #tpu.memory_space<vmem>>, %arg9: memref<1x128xf32, #tpu.memory_space<vmem>>, %arg10: memref<384x128xbf16, #tpu.memory_space<vmem>>, %arg11: memref<1x128xf32, #tpu.memory_space<vmem>>, %arg12: memref<8x16xbf16, #tpu.memory_space<vmem>>, %arg13: memref<128x64xbf16, #tpu.memory_space<vmem>>, %arg14: memref<192x128xbf16, #tpu.memory_space<vmem>>, %arg15: memref<1x128xf32, #tpu.memory_space<vmem>>, %arg16: memref<384x128xbf16, #tpu.memory_space<vmem>>, %arg17: memref<1x128xf32, #tpu.memory_space<vmem>>, %arg18: memref<4x8xbf16, #tpu.memory_space<vmem>>, %arg19: memref<128x64xbf16, #tpu.memory_space<vmem>>, %arg20: memref<192x128xbf16, #tpu.memory_space<vmem>>, %arg21: memref<1x128xf32, #tpu.memory_space<vmem>>, %arg22: memref<384x128xbf16, #tpu.memory_space<vmem>>, %arg23: memref<1x128xf32, #tpu.memory_space<vmem>>, %arg24: memref<2x4xbf16, #tpu.memory_space<vmem>>, %arg25: memref<128x64xbf16, #tpu.memory_space<vmem>>, %arg26: memref<64x64xf32, #tpu.memory_space<vmem>>, %arg27: memref<64x16xf32, #tpu.memory_space<vmem>>, %arg28: memref<1x16xf32, #tpu.memory_space<vmem>>, %arg29: memref<1x16xf32, #tpu.memory_space<vmem>>, %arg30: memref<1x16xf32, #tpu.memory_space<vmem>>, %arg31: memref<1x16xf32, #tpu.memory_space<vmem>>, %arg32: memref<16x128xf32, #tpu.memory_space<vmem>>, %arg33: memref<1x128xf32, #tpu.memory_space<vmem>>, %arg34: memref<1x2x128xf32, #tpu.memory_space<vmem>>) attributes {dimension_semantics = [#tpu.dimension_semantics<parallel>], iteration_bounds = array<i64: 2>, scalar_prefetch = 0 : i64, scratch_operands = 0 : i64, tpu.core_type = #tpu.core_type<tc>, window_params = [{transform_indices = @transform_0, window_bounds = array<i64: 1, 32, 64>}, {pipeline_mode = #tpu.pipeline_mode<synchronous>, transform_indices = @transform_1, window_bounds = array<i64: 192, 128>}, {pipeline_mode = #tpu.pipeline_mode<synchronous>, transform_indices = @transform_2, window_bounds = array<i64: 1, 128>}, {pipeline_mode = #tpu.pipeline_mode<synchronous>, transform_indices = @transform_3, window_bounds = array<i64: 384, 128>}, {pipeline_mode = #tpu.pipeline_mode<synchronous>, transform_indices = @transform_4, window_bounds = array<i64: 1, 128>}, {pipeline_mode = #tpu.pipeline_mode<synchronous>, transform_indices = @transform_5, window_bounds = array<i64: 16, 32>}, {pipeline_mode = #tpu.pipeline_mode<synchronous>, transform_indices = @transform_6, window_bounds = array<i64: 128, 64>}, {pipeline_mode = #tpu.pipeline_mode<synchronous>, transform_indices = @transform_7, window_bounds = array<i64: 192, 128>}, {pipeline_mode = #tpu.pipeline_mode<synchronous>, transform_indices = @transform_8, window_bounds = array<i64: 1, 128>}, {pipeline_mode = #tpu.pipeline_mode<synchronous>, transform_indices = @transform_9, window_bounds = array<i64: 384, 128>}, {pipeline_mode = #tpu.pipeline_mode<synchronous>, transform_indices = @transform_10, window_bounds = array<i64: 1, 128>}, {pipeline_mode = #tpu.pipeline_mode<synchronous>, transform_indices = @transform_11, window_bounds = array<i64: 8, 16>}, {pipeline_mode = #tpu.pipeline_mode<synchronous>, transform_indices = @transform_12, window_bounds = array<i64: 128, 64>}, {pipeline_mode = #tpu.pipeline_mode<synchronous>, transform_indices = @transform_13, window_bounds = array<i64: 192, 128>}, {pipeline_mode = #tpu.pipeline_mode<synchronous>, transform_indices = @transform_14, window_bounds = array<i64: 1, 128>}, {pipeline_mode = #tpu.pipeline_mode<synchronous>, transform_indices = @transform_15, window_bounds = array<i64: 384, 128>}, {pipeline_mode = #tpu.pipeline_mode<synchronous>, transform_indices = @transform_16, window_bounds = array<i64: 1, 128>}, {pipeline_mode = #tpu.pipeline_mode<synchronous>, transform_indices = @transform_17, window_bounds = array<i64: 4, 8>}, {pipeline_mode = #tpu.pipeline_mode<synchronous>, transform_indices = @transform_18, window_bounds = array<i64: 128, 64>}, {pipeline_mode = #tpu.pipeline_mode<synchronous>, transform_indices = @transform_19, window_bounds = array<i64: 192, 128>}, {pipeline_mode = #tpu.pipeline_mode<synchronous>, transform_indices = @transform_20, window_bounds = array<i64: 1, 128>}, {pipeline_mode = #tpu.pipeline_mode<synchronous>, transform_indices = @transform_21, window_bounds = array<i64: 384, 128>}, {pipeline_mode = #tpu.pipeline_mode<synchronous>, transform_indices = @transform_22, window_bounds = array<i64: 1, 128>}, {pipeline_mode = #tpu.pipeline_mode<synchronous>, transform_indices = @transform_23, window_bounds = array<i64: 2, 4>}, {pipeline_mode = #tpu.pipeline_mode<synchronous>, transform_indices = @transform_24, window_bounds = array<i64: 128, 64>}, {pipeline_mode = #tpu.pipeline_mode<synchronous>, transform_indices = @transform_25, window_bounds = array<i64: 64, 64>}, {pipeline_mode = #tpu.pipeline_mode<synchronous>, transform_indices = @transform_26, window_bounds = array<i64: 64, 16>}, {pipeline_mode = #tpu.pipeline_mode<synchronous>, transform_indices = @transform_27, window_bounds = array<i64: 1, 16>}, {pipeline_mode = #tpu.pipeline_mode<synchronous>, transform_indices = @transform_28, window_bounds = array<i64: 1, 16>}, {pipeline_mode = #tpu.pipeline_mode<synchronous>, transform_indices = @transform_29, window_bounds = array<i64: 1, 16>}, {pipeline_mode = #tpu.pipeline_mode<synchronous>, transform_indices = @transform_30, window_bounds = array<i64: 1, 16>}, {pipeline_mode = #tpu.pipeline_mode<synchronous>, transform_indices = @transform_31, window_bounds = array<i64: 16, 128>}, {pipeline_mode = #tpu.pipeline_mode<synchronous>, transform_indices = @transform_32, window_bounds = array<i64: 1, 128>}, {transform_indices = @transform_33, window_bounds = array<i64: 1, 2, 128>}]} {
    %c0 = arith.constant 0 : index
    %c0_0 = arith.constant 0 : index
    %c0_1 = arith.constant 0 : index
    %0 = vector.load %arg1[%c0, %c0_0, %c0_1] : memref<1x32x64xf32, #tpu.memory_space<vmem>>, vector<1x32x64xf32>
    %1 = vector.shape_cast %0 : vector<1x32x64xf32> to vector<32x64xf32>
    %c1_i32 = arith.constant 1 : i32
    %2 = tpu.dynamic_rotate %1 by %c1_i32 dim 0 : vector<32x64xf32>, i32 -> vector<32x64xf32>
    %c31_i32 = arith.constant 31 : i32
    %3 = tpu.dynamic_rotate %1 by %c31_i32 dim 0 : vector<32x64xf32>, i32 -> vector<32x64xf32>
    %4 = tpu.iota {dimensions = array<i32: 0>} : vector<32x64xi32>
    %c16_i32 = arith.constant 16 : i32
    %c0_i32 = arith.constant 0 : i32
    %5 = arith.cmpi eq, %c16_i32, %c0_i32 : i32
    %c1_i32_2 = arith.constant 1 : i32
    %6 = arith.select %5, %c1_i32_2, %c16_i32 : i32
    %7 = vector.broadcast %6 : i32 to vector<32x64xi32>
    %8 = arith.remsi %4, %7 : vector<32x64xi32>
    %c0_i32_3 = arith.constant 0 : i32
    %9 = vector.broadcast %c0_i32_3 : i32 to vector<32x64xi32>
    %10 = arith.cmpi ne, %8, %9 : vector<32x64xi32>
    %c0_i32_4 = arith.constant 0 : i32
    %11 = vector.broadcast %c0_i32_4 : i32 to vector<32x64xi32>
    %12 = arith.cmpi slt, %8, %11 : vector<32x64xi32>
    %c0_i32_5 = arith.constant 0 : i32
    %13 = arith.cmpi slt, %6, %c0_i32_5 : i32
    %14 = vector.broadcast %13 : i1 to vector<32x64xi1>
    %15 = vector.broadcast %14 : vector<32x64xi1> to vector<32x64xi1>
    %16 = arith.xori %12, %15 : vector<32x64xi1>
    %17 = arith.andi %16, %10 : vector<32x64xi1>
    %18 = vector.broadcast %6 : i32 to vector<32x64xi32>
    %19 = arith.addi %8, %18 : vector<32x64xi32>
    %20 = arith.select %17, %19, %8 : vector<32x64xi1>, vector<32x64xi32>
    %c0_i32_6 = arith.constant 0 : i32
    %21 = vector.broadcast %c0_i32_6 : i32 to vector<32x64xi32>
    %22 = arith.cmpi eq, %20, %21 : vector<32x64xi32>
    %cst = arith.constant 0.000000e+00 : f32
    %23 = vector.broadcast %cst : f32 to vector<32x64xf32>
    %24 = arith.select %22, %23, %2 : vector<32x64xi1>, vector<32x64xf32>
    %c15_i32 = arith.constant 15 : i32
    %25 = vector.broadcast %c15_i32 : i32 to vector<32x64xi32>
    %26 = arith.cmpi eq, %20, %25 : vector<32x64xi32>
    %cst_7 = arith.constant 0.000000e+00 : f32
    %27 = vector.broadcast %cst_7 : f32 to vector<32x64xf32>
    %28 = arith.select %26, %27, %3 : vector<32x64xi1>, vector<32x64xf32>
    %29 = tpu.concatenate %24, %1, %28 in 1 : vector<32x64xf32>, vector<32x64xf32>, vector<32x64xf32> -> vector<32x192xf32>
    %30 = arith.truncf %29 : vector<32x192xf32> to vector<32x192xbf16>
    %c0_8 = arith.constant 0 : index
    %c0_9 = arith.constant 0 : index
    %31 = vector.load %arg2[%c0_8, %c0_9] : memref<192x128xbf16, #tpu.memory_space<vmem>>, vector<192x128xbf16>
    %cst_10 = arith.constant dense<0.000000e+00> : vector<32x128xf32>
    %32 = tpu.matmul %30, %31, %cst_10 {dimension_numbers = #tpu.dot_dimension_numbers<[1], [0], [0], [1], [0, 0, 1, 1], [], []>} : vector<32x192xbf16>, vector<192x128xbf16>, vector<32x128xf32> -> vector<32x128xf32>
    %c0_11 = arith.constant 0 : index
    %c0_12 = arith.constant 0 : index
    %33 = vector.load %arg3[%c0_11, %c0_12] : memref<1x128xf32, #tpu.memory_space<vmem>>, vector<1x128xf32>
    %34 = vector.broadcast %33 : vector<1x128xf32> to vector<32x128xf32>
    %35 = arith.addf %32, %34 : vector<32x128xf32>
    %cst_13 = arith.constant 0.000000e+00 : f32
    %36 = vector.broadcast %cst_13 : f32 to vector<32x128xf32>
    %37 = arith.maximumf %35, %36 : vector<32x128xf32>
    %c1_i32_14 = arith.constant 1 : i32
    %38 = tpu.dynamic_rotate %37 by %c1_i32_14 dim 0 : vector<32x128xf32>, i32 -> vector<32x128xf32>
    %c31_i32_15 = arith.constant 31 : i32
    %39 = tpu.dynamic_rotate %37 by %c31_i32_15 dim 0 : vector<32x128xf32>, i32 -> vector<32x128xf32>
    %40 = tpu.iota {dimensions = array<i32: 0>} : vector<32x128xi32>
    %c16_i32_16 = arith.constant 16 : i32
    %c0_i32_17 = arith.constant 0 : i32
    %41 = arith.cmpi eq, %c16_i32_16, %c0_i32_17 : i32
    %c1_i32_18 = arith.constant 1 : i32
    %42 = arith.select %41, %c1_i32_18, %c16_i32_16 : i32
    %43 = vector.broadcast %42 : i32 to vector<32x128xi32>
    %44 = arith.remsi %40, %43 : vector<32x128xi32>
    %c0_i32_19 = arith.constant 0 : i32
    %45 = vector.broadcast %c0_i32_19 : i32 to vector<32x128xi32>
    %46 = arith.cmpi ne, %44, %45 : vector<32x128xi32>
    %c0_i32_20 = arith.constant 0 : i32
    %47 = vector.broadcast %c0_i32_20 : i32 to vector<32x128xi32>
    %48 = arith.cmpi slt, %44, %47 : vector<32x128xi32>
    %c0_i32_21 = arith.constant 0 : i32
    %49 = arith.cmpi slt, %42, %c0_i32_21 : i32
    %50 = vector.broadcast %49 : i1 to vector<32x128xi1>
    %51 = vector.broadcast %50 : vector<32x128xi1> to vector<32x128xi1>
    %52 = arith.xori %48, %51 : vector<32x128xi1>
    %53 = arith.andi %52, %46 : vector<32x128xi1>
    %54 = vector.broadcast %42 : i32 to vector<32x128xi32>
    %55 = arith.addi %44, %54 : vector<32x128xi32>
    %56 = arith.select %53, %55, %44 : vector<32x128xi1>, vector<32x128xi32>
    %c0_i32_22 = arith.constant 0 : i32
    %57 = vector.broadcast %c0_i32_22 : i32 to vector<32x128xi32>
    %58 = arith.cmpi eq, %56, %57 : vector<32x128xi32>
    %cst_23 = arith.constant 0.000000e+00 : f32
    %59 = vector.broadcast %cst_23 : f32 to vector<32x128xf32>
    %60 = arith.select %58, %59, %38 : vector<32x128xi1>, vector<32x128xf32>
    %c15_i32_24 = arith.constant 15 : i32
    %61 = vector.broadcast %c15_i32_24 : i32 to vector<32x128xi32>
    %62 = arith.cmpi eq, %56, %61 : vector<32x128xi32>
    %cst_25 = arith.constant 0.000000e+00 : f32
    %63 = vector.broadcast %cst_25 : f32 to vector<32x128xf32>
    %64 = arith.select %62, %63, %39 : vector<32x128xi1>, vector<32x128xf32>
    %65 = tpu.concatenate %60, %37, %64 in 1 : vector<32x128xf32>, vector<32x128xf32>, vector<32x128xf32> -> vector<32x384xf32>
    %66 = arith.truncf %65 : vector<32x384xf32> to vector<32x384xbf16>
    %c0_26 = arith.constant 0 : index
    %c0_27 = arith.constant 0 : index
    %67 = vector.load %arg4[%c0_26, %c0_27] : memref<384x128xbf16, #tpu.memory_space<vmem>>, vector<384x128xbf16>
    %cst_28 = arith.constant dense<0.000000e+00> : vector<32x128xf32>
    %68 = tpu.matmul %66, %67, %cst_28 {dimension_numbers = #tpu.dot_dimension_numbers<[1], [0], [0], [1], [0, 0, 1, 1], [], []>} : vector<32x384xbf16>, vector<384x128xbf16>, vector<32x128xf32> -> vector<32x128xf32>
    %c0_29 = arith.constant 0 : index
    %c0_30 = arith.constant 0 : index
    %69 = vector.load %arg5[%c0_29, %c0_30] : memref<1x128xf32, #tpu.memory_space<vmem>>, vector<1x128xf32>
    %70 = vector.broadcast %69 : vector<1x128xf32> to vector<32x128xf32>
    %71 = arith.addf %68, %70 : vector<32x128xf32>
    %cst_31 = arith.constant 0.000000e+00 : f32
    %72 = vector.broadcast %cst_31 : f32 to vector<32x128xf32>
    %73 = arith.maximumf %71, %72 : vector<32x128xf32>
    %c0_32 = arith.constant 0 : index
    %c0_33 = arith.constant 0 : index
    %74 = vector.load %arg6[%c0_32, %c0_33] : memref<16x32xbf16, #tpu.memory_space<vmem>>, vector<16x32xbf16>
    %75 = arith.truncf %73 : vector<32x128xf32> to vector<32x128xbf16>
    %cst_34 = arith.constant dense<0.000000e+00> : vector<16x128xf32>
    %76 = tpu.matmul %74, %75, %cst_34 {dimension_numbers = #tpu.dot_dimension_numbers<[1], [0], [0], [1], [0, 0, 1, 1], [], []>} : vector<16x32xbf16>, vector<32x128xbf16>, vector<16x128xf32> -> vector<16x128xf32>
    %77 = arith.truncf %76 : vector<16x128xf32> to vector<16x128xbf16>
    %c0_35 = arith.constant 0 : index
    %c0_36 = arith.constant 0 : index
    %78 = vector.load %arg7[%c0_35, %c0_36] : memref<128x64xbf16, #tpu.memory_space<vmem>>, vector<128x64xbf16>
    %cst_37 = arith.constant dense<0.000000e+00> : vector<16x64xf32>
    %79 = tpu.matmul %77, %78, %cst_37 {dimension_numbers = #tpu.dot_dimension_numbers<[1], [0], [0], [1], [0, 0, 1, 1], [], []>} : vector<16x128xbf16>, vector<128x64xbf16>, vector<16x64xf32> -> vector<16x64xf32>
    %c1_i32_38 = arith.constant 1 : i32
    %80 = tpu.dynamic_rotate %79 by %c1_i32_38 dim 0 : vector<16x64xf32>, i32 -> vector<16x64xf32>
    %c15_i32_39 = arith.constant 15 : i32
    %81 = tpu.dynamic_rotate %79 by %c15_i32_39 dim 0 : vector<16x64xf32>, i32 -> vector<16x64xf32>
    %82 = tpu.iota {dimensions = array<i32: 0>} : vector<16x64xi32>
    %c8_i32 = arith.constant 8 : i32
    %c0_i32_40 = arith.constant 0 : i32
    %83 = arith.cmpi eq, %c8_i32, %c0_i32_40 : i32
    %c1_i32_41 = arith.constant 1 : i32
    %84 = arith.select %83, %c1_i32_41, %c8_i32 : i32
    %85 = vector.broadcast %84 : i32 to vector<16x64xi32>
    %86 = arith.remsi %82, %85 : vector<16x64xi32>
    %c0_i32_42 = arith.constant 0 : i32
    %87 = vector.broadcast %c0_i32_42 : i32 to vector<16x64xi32>
    %88 = arith.cmpi ne, %86, %87 : vector<16x64xi32>
    %c0_i32_43 = arith.constant 0 : i32
    %89 = vector.broadcast %c0_i32_43 : i32 to vector<16x64xi32>
    %90 = arith.cmpi slt, %86, %89 : vector<16x64xi32>
    %c0_i32_44 = arith.constant 0 : i32
    %91 = arith.cmpi slt, %84, %c0_i32_44 : i32
    %92 = vector.broadcast %91 : i1 to vector<16x64xi1>
    %93 = vector.broadcast %92 : vector<16x64xi1> to vector<16x64xi1>
    %94 = arith.xori %90, %93 : vector<16x64xi1>
    %95 = arith.andi %94, %88 : vector<16x64xi1>
    %96 = vector.broadcast %84 : i32 to vector<16x64xi32>
    %97 = arith.addi %86, %96 : vector<16x64xi32>
    %98 = arith.select %95, %97, %86 : vector<16x64xi1>, vector<16x64xi32>
    %c0_i32_45 = arith.constant 0 : i32
    %99 = vector.broadcast %c0_i32_45 : i32 to vector<16x64xi32>
    %100 = arith.cmpi eq, %98, %99 : vector<16x64xi32>
    %cst_46 = arith.constant 0.000000e+00 : f32
    %101 = vector.broadcast %cst_46 : f32 to vector<16x64xf32>
    %102 = arith.select %100, %101, %80 : vector<16x64xi1>, vector<16x64xf32>
    %c7_i32 = arith.constant 7 : i32
    %103 = vector.broadcast %c7_i32 : i32 to vector<16x64xi32>
    %104 = arith.cmpi eq, %98, %103 : vector<16x64xi32>
    %cst_47 = arith.constant 0.000000e+00 : f32
    %105 = vector.broadcast %cst_47 : f32 to vector<16x64xf32>
    %106 = arith.select %104, %105, %81 : vector<16x64xi1>, vector<16x64xf32>
    %107 = tpu.concatenate %102, %79, %106 in 1 : vector<16x64xf32>, vector<16x64xf32>, vector<16x64xf32> -> vector<16x192xf32>
    %108 = arith.truncf %107 : vector<16x192xf32> to vector<16x192xbf16>
    %c0_48 = arith.constant 0 : index
    %c0_49 = arith.constant 0 : index
    %109 = vector.load %arg8[%c0_48, %c0_49] : memref<192x128xbf16, #tpu.memory_space<vmem>>, vector<192x128xbf16>
    %cst_50 = arith.constant dense<0.000000e+00> : vector<16x128xf32>
    %110 = tpu.matmul %108, %109, %cst_50 {dimension_numbers = #tpu.dot_dimension_numbers<[1], [0], [0], [1], [0, 0, 1, 1], [], []>} : vector<16x192xbf16>, vector<192x128xbf16>, vector<16x128xf32> -> vector<16x128xf32>
    %c0_51 = arith.constant 0 : index
    %c0_52 = arith.constant 0 : index
    %111 = vector.load %arg9[%c0_51, %c0_52] : memref<1x128xf32, #tpu.memory_space<vmem>>, vector<1x128xf32>
    %112 = vector.broadcast %111 : vector<1x128xf32> to vector<16x128xf32>
    %113 = arith.addf %110, %112 : vector<16x128xf32>
    %cst_53 = arith.constant 0.000000e+00 : f32
    %114 = vector.broadcast %cst_53 : f32 to vector<16x128xf32>
    %115 = arith.maximumf %113, %114 : vector<16x128xf32>
    %c1_i32_54 = arith.constant 1 : i32
    %116 = tpu.dynamic_rotate %115 by %c1_i32_54 dim 0 : vector<16x128xf32>, i32 -> vector<16x128xf32>
    %c15_i32_55 = arith.constant 15 : i32
    %117 = tpu.dynamic_rotate %115 by %c15_i32_55 dim 0 : vector<16x128xf32>, i32 -> vector<16x128xf32>
    %118 = tpu.iota {dimensions = array<i32: 0>} : vector<16x128xi32>
    %c8_i32_56 = arith.constant 8 : i32
    %c0_i32_57 = arith.constant 0 : i32
    %119 = arith.cmpi eq, %c8_i32_56, %c0_i32_57 : i32
    %c1_i32_58 = arith.constant 1 : i32
    %120 = arith.select %119, %c1_i32_58, %c8_i32_56 : i32
    %121 = vector.broadcast %120 : i32 to vector<16x128xi32>
    %122 = arith.remsi %118, %121 : vector<16x128xi32>
    %c0_i32_59 = arith.constant 0 : i32
    %123 = vector.broadcast %c0_i32_59 : i32 to vector<16x128xi32>
    %124 = arith.cmpi ne, %122, %123 : vector<16x128xi32>
    %c0_i32_60 = arith.constant 0 : i32
    %125 = vector.broadcast %c0_i32_60 : i32 to vector<16x128xi32>
    %126 = arith.cmpi slt, %122, %125 : vector<16x128xi32>
    %c0_i32_61 = arith.constant 0 : i32
    %127 = arith.cmpi slt, %120, %c0_i32_61 : i32
    %128 = vector.broadcast %127 : i1 to vector<16x128xi1>
    %129 = vector.broadcast %128 : vector<16x128xi1> to vector<16x128xi1>
    %130 = arith.xori %126, %129 : vector<16x128xi1>
    %131 = arith.andi %130, %124 : vector<16x128xi1>
    %132 = vector.broadcast %120 : i32 to vector<16x128xi32>
    %133 = arith.addi %122, %132 : vector<16x128xi32>
    %134 = arith.select %131, %133, %122 : vector<16x128xi1>, vector<16x128xi32>
    %c0_i32_62 = arith.constant 0 : i32
    %135 = vector.broadcast %c0_i32_62 : i32 to vector<16x128xi32>
    %136 = arith.cmpi eq, %134, %135 : vector<16x128xi32>
    %cst_63 = arith.constant 0.000000e+00 : f32
    %137 = vector.broadcast %cst_63 : f32 to vector<16x128xf32>
    %138 = arith.select %136, %137, %116 : vector<16x128xi1>, vector<16x128xf32>
    %c7_i32_64 = arith.constant 7 : i32
    %139 = vector.broadcast %c7_i32_64 : i32 to vector<16x128xi32>
    %140 = arith.cmpi eq, %134, %139 : vector<16x128xi32>
    %cst_65 = arith.constant 0.000000e+00 : f32
    %141 = vector.broadcast %cst_65 : f32 to vector<16x128xf32>
    %142 = arith.select %140, %141, %117 : vector<16x128xi1>, vector<16x128xf32>
    %143 = tpu.concatenate %138, %115, %142 in 1 : vector<16x128xf32>, vector<16x128xf32>, vector<16x128xf32> -> vector<16x384xf32>
    %144 = arith.truncf %143 : vector<16x384xf32> to vector<16x384xbf16>
    %c0_66 = arith.constant 0 : index
    %c0_67 = arith.constant 0 : index
    %145 = vector.load %arg10[%c0_66, %c0_67] : memref<384x128xbf16, #tpu.memory_space<vmem>>, vector<384x128xbf16>
    %cst_68 = arith.constant dense<0.000000e+00> : vector<16x128xf32>
    %146 = tpu.matmul %144, %145, %cst_68 {dimension_numbers = #tpu.dot_dimension_numbers<[1], [0], [0], [1], [0, 0, 1, 1], [], []>} : vector<16x384xbf16>, vector<384x128xbf16>, vector<16x128xf32> -> vector<16x128xf32>
    %c0_69 = arith.constant 0 : index
    %c0_70 = arith.constant 0 : index
    %147 = vector.load %arg11[%c0_69, %c0_70] : memref<1x128xf32, #tpu.memory_space<vmem>>, vector<1x128xf32>
    %148 = vector.broadcast %147 : vector<1x128xf32> to vector<16x128xf32>
    %149 = arith.addf %146, %148 : vector<16x128xf32>
    %cst_71 = arith.constant 0.000000e+00 : f32
    %150 = vector.broadcast %cst_71 : f32 to vector<16x128xf32>
    %151 = arith.maximumf %149, %150 : vector<16x128xf32>
    %c0_72 = arith.constant 0 : index
    %c0_73 = arith.constant 0 : index
    %152 = vector.load %arg12[%c0_72, %c0_73] : memref<8x16xbf16, #tpu.memory_space<vmem>>, vector<8x16xbf16>
    %153 = arith.truncf %151 : vector<16x128xf32> to vector<16x128xbf16>
    %cst_74 = arith.constant dense<0.000000e+00> : vector<8x128xf32>
    %154 = tpu.matmul %152, %153, %cst_74 {dimension_numbers = #tpu.dot_dimension_numbers<[1], [0], [0], [1], [0, 0, 1, 1], [], []>} : vector<8x16xbf16>, vector<16x128xbf16>, vector<8x128xf32> -> vector<8x128xf32>
    %155 = arith.truncf %154 : vector<8x128xf32> to vector<8x128xbf16>
    %c0_75 = arith.constant 0 : index
    %c0_76 = arith.constant 0 : index
    %156 = vector.load %arg13[%c0_75, %c0_76] : memref<128x64xbf16, #tpu.memory_space<vmem>>, vector<128x64xbf16>
    %cst_77 = arith.constant dense<0.000000e+00> : vector<8x64xf32>
    %157 = tpu.matmul %155, %156, %cst_77 {dimension_numbers = #tpu.dot_dimension_numbers<[1], [0], [0], [1], [0, 0, 1, 1], [], []>} : vector<8x128xbf16>, vector<128x64xbf16>, vector<8x64xf32> -> vector<8x64xf32>
    %c1_i32_78 = arith.constant 1 : i32
    %158 = tpu.dynamic_rotate %157 by %c1_i32_78 dim 0 : vector<8x64xf32>, i32 -> vector<8x64xf32>
    %c7_i32_79 = arith.constant 7 : i32
    %159 = tpu.dynamic_rotate %157 by %c7_i32_79 dim 0 : vector<8x64xf32>, i32 -> vector<8x64xf32>
    %160 = tpu.iota {dimensions = array<i32: 0>} : vector<8x64xi32>
    %c4_i32 = arith.constant 4 : i32
    %c0_i32_80 = arith.constant 0 : i32
    %161 = arith.cmpi eq, %c4_i32, %c0_i32_80 : i32
    %c1_i32_81 = arith.constant 1 : i32
    %162 = arith.select %161, %c1_i32_81, %c4_i32 : i32
    %163 = vector.broadcast %162 : i32 to vector<8x64xi32>
    %164 = arith.remsi %160, %163 : vector<8x64xi32>
    %c0_i32_82 = arith.constant 0 : i32
    %165 = vector.broadcast %c0_i32_82 : i32 to vector<8x64xi32>
    %166 = arith.cmpi ne, %164, %165 : vector<8x64xi32>
    %c0_i32_83 = arith.constant 0 : i32
    %167 = vector.broadcast %c0_i32_83 : i32 to vector<8x64xi32>
    %168 = arith.cmpi slt, %164, %167 : vector<8x64xi32>
    %c0_i32_84 = arith.constant 0 : i32
    %169 = arith.cmpi slt, %162, %c0_i32_84 : i32
    %170 = vector.broadcast %169 : i1 to vector<8x64xi1>
    %171 = vector.broadcast %170 : vector<8x64xi1> to vector<8x64xi1>
    %172 = arith.xori %168, %171 : vector<8x64xi1>
    %173 = arith.andi %172, %166 : vector<8x64xi1>
    %174 = vector.broadcast %162 : i32 to vector<8x64xi32>
    %175 = arith.addi %164, %174 : vector<8x64xi32>
    %176 = arith.select %173, %175, %164 : vector<8x64xi1>, vector<8x64xi32>
    %c0_i32_85 = arith.constant 0 : i32
    %177 = vector.broadcast %c0_i32_85 : i32 to vector<8x64xi32>
    %178 = arith.cmpi eq, %176, %177 : vector<8x64xi32>
    %cst_86 = arith.constant 0.000000e+00 : f32
    %179 = vector.broadcast %cst_86 : f32 to vector<8x64xf32>
    %180 = arith.select %178, %179, %158 : vector<8x64xi1>, vector<8x64xf32>
    %c3_i32 = arith.constant 3 : i32
    %181 = vector.broadcast %c3_i32 : i32 to vector<8x64xi32>
    %182 = arith.cmpi eq, %176, %181 : vector<8x64xi32>
    %cst_87 = arith.constant 0.000000e+00 : f32
    %183 = vector.broadcast %cst_87 : f32 to vector<8x64xf32>
    %184 = arith.select %182, %183, %159 : vector<8x64xi1>, vector<8x64xf32>
    %185 = tpu.concatenate %180, %157, %184 in 1 : vector<8x64xf32>, vector<8x64xf32>, vector<8x64xf32> -> vector<8x192xf32>
    %186 = arith.truncf %185 : vector<8x192xf32> to vector<8x192xbf16>
    %c0_88 = arith.constant 0 : index
    %c0_89 = arith.constant 0 : index
    %187 = vector.load %arg14[%c0_88, %c0_89] : memref<192x128xbf16, #tpu.memory_space<vmem>>, vector<192x128xbf16>
    %cst_90 = arith.constant dense<0.000000e+00> : vector<8x128xf32>
    %188 = tpu.matmul %186, %187, %cst_90 {dimension_numbers = #tpu.dot_dimension_numbers<[1], [0], [0], [1], [0, 0, 1, 1], [], []>} : vector<8x192xbf16>, vector<192x128xbf16>, vector<8x128xf32> -> vector<8x128xf32>
    %c0_91 = arith.constant 0 : index
    %c0_92 = arith.constant 0 : index
    %189 = vector.load %arg15[%c0_91, %c0_92] : memref<1x128xf32, #tpu.memory_space<vmem>>, vector<1x128xf32>
    %190 = vector.broadcast %189 : vector<1x128xf32> to vector<8x128xf32>
    %191 = arith.addf %188, %190 : vector<8x128xf32>
    %cst_93 = arith.constant 0.000000e+00 : f32
    %192 = vector.broadcast %cst_93 : f32 to vector<8x128xf32>
    %193 = arith.maximumf %191, %192 : vector<8x128xf32>
    %c1_i32_94 = arith.constant 1 : i32
    %194 = tpu.dynamic_rotate %193 by %c1_i32_94 dim 0 : vector<8x128xf32>, i32 -> vector<8x128xf32>
    %c7_i32_95 = arith.constant 7 : i32
    %195 = tpu.dynamic_rotate %193 by %c7_i32_95 dim 0 : vector<8x128xf32>, i32 -> vector<8x128xf32>
    %196 = tpu.iota {dimensions = array<i32: 0>} : vector<8x128xi32>
    %c4_i32_96 = arith.constant 4 : i32
    %c0_i32_97 = arith.constant 0 : i32
    %197 = arith.cmpi eq, %c4_i32_96, %c0_i32_97 : i32
    %c1_i32_98 = arith.constant 1 : i32
    %198 = arith.select %197, %c1_i32_98, %c4_i32_96 : i32
    %199 = vector.broadcast %198 : i32 to vector<8x128xi32>
    %200 = arith.remsi %196, %199 : vector<8x128xi32>
    %c0_i32_99 = arith.constant 0 : i32
    %201 = vector.broadcast %c0_i32_99 : i32 to vector<8x128xi32>
    %202 = arith.cmpi ne, %200, %201 : vector<8x128xi32>
    %c0_i32_100 = arith.constant 0 : i32
    %203 = vector.broadcast %c0_i32_100 : i32 to vector<8x128xi32>
    %204 = arith.cmpi slt, %200, %203 : vector<8x128xi32>
    %c0_i32_101 = arith.constant 0 : i32
    %205 = arith.cmpi slt, %198, %c0_i32_101 : i32
    %206 = vector.broadcast %205 : i1 to vector<8x128xi1>
    %207 = vector.broadcast %206 : vector<8x128xi1> to vector<8x128xi1>
    %208 = arith.xori %204, %207 : vector<8x128xi1>
    %209 = arith.andi %208, %202 : vector<8x128xi1>
    %210 = vector.broadcast %198 : i32 to vector<8x128xi32>
    %211 = arith.addi %200, %210 : vector<8x128xi32>
    %212 = arith.select %209, %211, %200 : vector<8x128xi1>, vector<8x128xi32>
    %c0_i32_102 = arith.constant 0 : i32
    %213 = vector.broadcast %c0_i32_102 : i32 to vector<8x128xi32>
    %214 = arith.cmpi eq, %212, %213 : vector<8x128xi32>
    %cst_103 = arith.constant 0.000000e+00 : f32
    %215 = vector.broadcast %cst_103 : f32 to vector<8x128xf32>
    %216 = arith.select %214, %215, %194 : vector<8x128xi1>, vector<8x128xf32>
    %c3_i32_104 = arith.constant 3 : i32
    %217 = vector.broadcast %c3_i32_104 : i32 to vector<8x128xi32>
    %218 = arith.cmpi eq, %212, %217 : vector<8x128xi32>
    %cst_105 = arith.constant 0.000000e+00 : f32
    %219 = vector.broadcast %cst_105 : f32 to vector<8x128xf32>
    %220 = arith.select %218, %219, %195 : vector<8x128xi1>, vector<8x128xf32>
    %221 = tpu.concatenate %216, %193, %220 in 1 : vector<8x128xf32>, vector<8x128xf32>, vector<8x128xf32> -> vector<8x384xf32>
    %222 = arith.truncf %221 : vector<8x384xf32> to vector<8x384xbf16>
    %c0_106 = arith.constant 0 : index
    %c0_107 = arith.constant 0 : index
    %223 = vector.load %arg16[%c0_106, %c0_107] : memref<384x128xbf16, #tpu.memory_space<vmem>>, vector<384x128xbf16>
    %cst_108 = arith.constant dense<0.000000e+00> : vector<8x128xf32>
    %224 = tpu.matmul %222, %223, %cst_108 {dimension_numbers = #tpu.dot_dimension_numbers<[1], [0], [0], [1], [0, 0, 1, 1], [], []>} : vector<8x384xbf16>, vector<384x128xbf16>, vector<8x128xf32> -> vector<8x128xf32>
    %c0_109 = arith.constant 0 : index
    %c0_110 = arith.constant 0 : index
    %225 = vector.load %arg17[%c0_109, %c0_110] : memref<1x128xf32, #tpu.memory_space<vmem>>, vector<1x128xf32>
    %226 = vector.broadcast %225 : vector<1x128xf32> to vector<8x128xf32>
    %227 = arith.addf %224, %226 : vector<8x128xf32>
    %cst_111 = arith.constant 0.000000e+00 : f32
    %228 = vector.broadcast %cst_111 : f32 to vector<8x128xf32>
    %229 = arith.maximumf %227, %228 : vector<8x128xf32>
    %c0_112 = arith.constant 0 : index
    %c0_113 = arith.constant 0 : index
    %230 = vector.load %arg18[%c0_112, %c0_113] : memref<4x8xbf16, #tpu.memory_space<vmem>>, vector<4x8xbf16>
    %231 = arith.truncf %229 : vector<8x128xf32> to vector<8x128xbf16>
    %cst_114 = arith.constant dense<0.000000e+00> : vector<4x128xf32>
    %232 = tpu.matmul %230, %231, %cst_114 {dimension_numbers = #tpu.dot_dimension_numbers<[1], [0], [0], [1], [0, 0, 1, 1], [], []>} : vector<4x8xbf16>, vector<8x128xbf16>, vector<4x128xf32> -> vector<4x128xf32>
    %233 = arith.truncf %232 : vector<4x128xf32> to vector<4x128xbf16>
    %c0_115 = arith.constant 0 : index
    %c0_116 = arith.constant 0 : index
    %234 = vector.load %arg19[%c0_115, %c0_116] : memref<128x64xbf16, #tpu.memory_space<vmem>>, vector<128x64xbf16>
    %cst_117 = arith.constant dense<0.000000e+00> : vector<4x64xf32>
    %235 = tpu.matmul %233, %234, %cst_117 {dimension_numbers = #tpu.dot_dimension_numbers<[1], [0], [0], [1], [0, 0, 1, 1], [], []>} : vector<4x128xbf16>, vector<128x64xbf16>, vector<4x64xf32> -> vector<4x64xf32>
    %c1_i32_118 = arith.constant 1 : i32
    %236 = tpu.dynamic_rotate %235 by %c1_i32_118 dim 0 : vector<4x64xf32>, i32 -> vector<4x64xf32>
    %c3_i32_119 = arith.constant 3 : i32
    %237 = tpu.dynamic_rotate %235 by %c3_i32_119 dim 0 : vector<4x64xf32>, i32 -> vector<4x64xf32>
    %238 = tpu.iota {dimensions = array<i32: 0>} : vector<4x64xi32>
    %c2_i32 = arith.constant 2 : i32
    %c0_i32_120 = arith.constant 0 : i32
    %239 = arith.cmpi eq, %c2_i32, %c0_i32_120 : i32
    %c1_i32_121 = arith.constant 1 : i32
    %240 = arith.select %239, %c1_i32_121, %c2_i32 : i32
    %241 = vector.broadcast %240 : i32 to vector<4x64xi32>
    %242 = arith.remsi %238, %241 : vector<4x64xi32>
    %c0_i32_122 = arith.constant 0 : i32
    %243 = vector.broadcast %c0_i32_122 : i32 to vector<4x64xi32>
    %244 = arith.cmpi ne, %242, %243 : vector<4x64xi32>
    %c0_i32_123 = arith.constant 0 : i32
    %245 = vector.broadcast %c0_i32_123 : i32 to vector<4x64xi32>
    %246 = arith.cmpi slt, %242, %245 : vector<4x64xi32>
    %c0_i32_124 = arith.constant 0 : i32
    %247 = arith.cmpi slt, %240, %c0_i32_124 : i32
    %248 = vector.broadcast %247 : i1 to vector<4x64xi1>
    %249 = vector.broadcast %248 : vector<4x64xi1> to vector<4x64xi1>
    %250 = arith.xori %246, %249 : vector<4x64xi1>
    %251 = arith.andi %250, %244 : vector<4x64xi1>
    %252 = vector.broadcast %240 : i32 to vector<4x64xi32>
    %253 = arith.addi %242, %252 : vector<4x64xi32>
    %254 = arith.select %251, %253, %242 : vector<4x64xi1>, vector<4x64xi32>
    %c0_i32_125 = arith.constant 0 : i32
    %255 = vector.broadcast %c0_i32_125 : i32 to vector<4x64xi32>
    %256 = arith.cmpi eq, %254, %255 : vector<4x64xi32>
    %cst_126 = arith.constant 0.000000e+00 : f32
    %257 = vector.broadcast %cst_126 : f32 to vector<4x64xf32>
    %258 = arith.select %256, %257, %236 : vector<4x64xi1>, vector<4x64xf32>
    %c1_i32_127 = arith.constant 1 : i32
    %259 = vector.broadcast %c1_i32_127 : i32 to vector<4x64xi32>
    %260 = arith.cmpi eq, %254, %259 : vector<4x64xi32>
    %cst_128 = arith.constant 0.000000e+00 : f32
    %261 = vector.broadcast %cst_128 : f32 to vector<4x64xf32>
    %262 = arith.select %260, %261, %237 : vector<4x64xi1>, vector<4x64xf32>
    %263 = tpu.concatenate %258, %235, %262 in 1 : vector<4x64xf32>, vector<4x64xf32>, vector<4x64xf32> -> vector<4x192xf32>
    %264 = arith.truncf %263 : vector<4x192xf32> to vector<4x192xbf16>
    %c0_129 = arith.constant 0 : index
    %c0_130 = arith.constant 0 : index
    %265 = vector.load %arg20[%c0_129, %c0_130] : memref<192x128xbf16, #tpu.memory_space<vmem>>, vector<192x128xbf16>
    %cst_131 = arith.constant dense<0.000000e+00> : vector<4x128xf32>
    %266 = tpu.matmul %264, %265, %cst_131 {dimension_numbers = #tpu.dot_dimension_numbers<[1], [0], [0], [1], [0, 0, 1, 1], [], []>} : vector<4x192xbf16>, vector<192x128xbf16>, vector<4x128xf32> -> vector<4x128xf32>
    %c0_132 = arith.constant 0 : index
    %c0_133 = arith.constant 0 : index
    %267 = vector.load %arg21[%c0_132, %c0_133] : memref<1x128xf32, #tpu.memory_space<vmem>>, vector<1x128xf32>
    %268 = vector.broadcast %267 : vector<1x128xf32> to vector<4x128xf32>
    %269 = arith.addf %266, %268 : vector<4x128xf32>
    %cst_134 = arith.constant 0.000000e+00 : f32
    %270 = vector.broadcast %cst_134 : f32 to vector<4x128xf32>
    %271 = arith.maximumf %269, %270 : vector<4x128xf32>
    %c1_i32_135 = arith.constant 1 : i32
    %272 = tpu.dynamic_rotate %271 by %c1_i32_135 dim 0 : vector<4x128xf32>, i32 -> vector<4x128xf32>
    %c3_i32_136 = arith.constant 3 : i32
    %273 = tpu.dynamic_rotate %271 by %c3_i32_136 dim 0 : vector<4x128xf32>, i32 -> vector<4x128xf32>
    %274 = tpu.iota {dimensions = array<i32: 0>} : vector<4x128xi32>
    %c2_i32_137 = arith.constant 2 : i32
    %c0_i32_138 = arith.constant 0 : i32
    %275 = arith.cmpi eq, %c2_i32_137, %c0_i32_138 : i32
    %c1_i32_139 = arith.constant 1 : i32
    %276 = arith.select %275, %c1_i32_139, %c2_i32_137 : i32
    %277 = vector.broadcast %276 : i32 to vector<4x128xi32>
    %278 = arith.remsi %274, %277 : vector<4x128xi32>
    %c0_i32_140 = arith.constant 0 : i32
    %279 = vector.broadcast %c0_i32_140 : i32 to vector<4x128xi32>
    %280 = arith.cmpi ne, %278, %279 : vector<4x128xi32>
    %c0_i32_141 = arith.constant 0 : i32
    %281 = vector.broadcast %c0_i32_141 : i32 to vector<4x128xi32>
    %282 = arith.cmpi slt, %278, %281 : vector<4x128xi32>
    %c0_i32_142 = arith.constant 0 : i32
    %283 = arith.cmpi slt, %276, %c0_i32_142 : i32
    %284 = vector.broadcast %283 : i1 to vector<4x128xi1>
    %285 = vector.broadcast %284 : vector<4x128xi1> to vector<4x128xi1>
    %286 = arith.xori %282, %285 : vector<4x128xi1>
    %287 = arith.andi %286, %280 : vector<4x128xi1>
    %288 = vector.broadcast %276 : i32 to vector<4x128xi32>
    %289 = arith.addi %278, %288 : vector<4x128xi32>
    %290 = arith.select %287, %289, %278 : vector<4x128xi1>, vector<4x128xi32>
    %c0_i32_143 = arith.constant 0 : i32
    %291 = vector.broadcast %c0_i32_143 : i32 to vector<4x128xi32>
    %292 = arith.cmpi eq, %290, %291 : vector<4x128xi32>
    %cst_144 = arith.constant 0.000000e+00 : f32
    %293 = vector.broadcast %cst_144 : f32 to vector<4x128xf32>
    %294 = arith.select %292, %293, %272 : vector<4x128xi1>, vector<4x128xf32>
    %c1_i32_145 = arith.constant 1 : i32
    %295 = vector.broadcast %c1_i32_145 : i32 to vector<4x128xi32>
    %296 = arith.cmpi eq, %290, %295 : vector<4x128xi32>
    %cst_146 = arith.constant 0.000000e+00 : f32
    %297 = vector.broadcast %cst_146 : f32 to vector<4x128xf32>
    %298 = arith.select %296, %297, %273 : vector<4x128xi1>, vector<4x128xf32>
    %299 = tpu.concatenate %294, %271, %298 in 1 : vector<4x128xf32>, vector<4x128xf32>, vector<4x128xf32> -> vector<4x384xf32>
    %300 = arith.truncf %299 : vector<4x384xf32> to vector<4x384xbf16>
    %c0_147 = arith.constant 0 : index
    %c0_148 = arith.constant 0 : index
    %301 = vector.load %arg22[%c0_147, %c0_148] : memref<384x128xbf16, #tpu.memory_space<vmem>>, vector<384x128xbf16>
    %cst_149 = arith.constant dense<0.000000e+00> : vector<4x128xf32>
    %302 = tpu.matmul %300, %301, %cst_149 {dimension_numbers = #tpu.dot_dimension_numbers<[1], [0], [0], [1], [0, 0, 1, 1], [], []>} : vector<4x384xbf16>, vector<384x128xbf16>, vector<4x128xf32> -> vector<4x128xf32>
    %c0_150 = arith.constant 0 : index
    %c0_151 = arith.constant 0 : index
    %303 = vector.load %arg23[%c0_150, %c0_151] : memref<1x128xf32, #tpu.memory_space<vmem>>, vector<1x128xf32>
    %304 = vector.broadcast %303 : vector<1x128xf32> to vector<4x128xf32>
    %305 = arith.addf %302, %304 : vector<4x128xf32>
    %cst_152 = arith.constant 0.000000e+00 : f32
    %306 = vector.broadcast %cst_152 : f32 to vector<4x128xf32>
    %307 = arith.maximumf %305, %306 : vector<4x128xf32>
    %c0_153 = arith.constant 0 : index
    %c0_154 = arith.constant 0 : index
    %308 = vector.load %arg24[%c0_153, %c0_154] : memref<2x4xbf16, #tpu.memory_space<vmem>>, vector<2x4xbf16>
    %309 = arith.truncf %307 : vector<4x128xf32> to vector<4x128xbf16>
    %cst_155 = arith.constant dense<0.000000e+00> : vector<2x128xf32>
    %310 = tpu.matmul %308, %309, %cst_155 {dimension_numbers = #tpu.dot_dimension_numbers<[1], [0], [0], [1], [0, 0, 1, 1], [], []>} : vector<2x4xbf16>, vector<4x128xbf16>, vector<2x128xf32> -> vector<2x128xf32>
    %311 = arith.truncf %310 : vector<2x128xf32> to vector<2x128xbf16>
    %c0_156 = arith.constant 0 : index
    %c0_157 = arith.constant 0 : index
    %312 = vector.load %arg25[%c0_156, %c0_157] : memref<128x64xbf16, #tpu.memory_space<vmem>>, vector<128x64xbf16>
    %cst_158 = arith.constant dense<0.000000e+00> : vector<2x64xf32>
    %313 = tpu.matmul %311, %312, %cst_158 {dimension_numbers = #tpu.dot_dimension_numbers<[1], [0], [0], [1], [0, 0, 1, 1], [], []>} : vector<2x128xbf16>, vector<128x64xbf16>, vector<2x64xf32> -> vector<2x64xf32>
    %c0_159 = arith.constant 0 : index
    %c0_160 = arith.constant 0 : index
    %314 = vector.load %arg26[%c0_159, %c0_160] : memref<64x64xf32, #tpu.memory_space<vmem>>, vector<64x64xf32>
    %cst_161 = arith.constant dense<0.000000e+00> : vector<2x64xf32>
    %315 = tpu.matmul %313, %314, %cst_161 {dimension_numbers = #tpu.dot_dimension_numbers<[1], [0], [0], [1], [0, 0, 1, 1], [], []>} : vector<2x64xf32>, vector<64x64xf32>, vector<2x64xf32> -> vector<2x64xf32>
    %c0_162 = arith.constant 0 : index
    %c0_163 = arith.constant 0 : index
    %316 = vector.load %arg27[%c0_162, %c0_163] : memref<64x16xf32, #tpu.memory_space<vmem>>, vector<64x16xf32>
    %cst_164 = arith.constant dense<0.000000e+00> : vector<2x16xf32>
    %317 = tpu.matmul %315, %316, %cst_164 {dimension_numbers = #tpu.dot_dimension_numbers<[1], [0], [0], [1], [0, 0, 1, 1], [], []>} : vector<2x64xf32>, vector<64x16xf32>, vector<2x16xf32> -> vector<2x16xf32>
    %c0_165 = arith.constant 0 : index
    %c0_166 = arith.constant 0 : index
    %318 = vector.load %arg28[%c0_165, %c0_166] : memref<1x16xf32, #tpu.memory_space<vmem>>, vector<1x16xf32>
    %319 = vector.broadcast %318 : vector<1x16xf32> to vector<2x16xf32>
    %320 = arith.addf %317, %319 : vector<2x16xf32>
    %cst_167 = arith.constant 0.000000e+00 : f32
    %321 = vector.broadcast %cst_167 : f32 to vector<2x16xf32>
    %322 = arith.cmpf oge, %320, %321 : vector<2x16xf32>
    %c0_168 = arith.constant 0 : index
    %c0_169 = arith.constant 0 : index
    %323 = vector.load %arg29[%c0_168, %c0_169] : memref<1x16xf32, #tpu.memory_space<vmem>>, vector<1x16xf32>
    %324 = vector.broadcast %323 : vector<1x16xf32> to vector<2x16xf32>
    %325 = arith.mulf %324, %320 : vector<2x16xf32>
    %326 = arith.select %322, %320, %325 : vector<2x16xi1>, vector<2x16xf32>
    %c0_170 = arith.constant 0 : index
    %c0_171 = arith.constant 0 : index
    %327 = vector.load %arg30[%c0_170, %c0_171] : memref<1x16xf32, #tpu.memory_space<vmem>>, vector<1x16xf32>
    %328 = vector.broadcast %327 : vector<1x16xf32> to vector<2x16xf32>
    %329 = arith.mulf %326, %328 : vector<2x16xf32>
    %c0_172 = arith.constant 0 : index
    %c0_173 = arith.constant 0 : index
    %330 = vector.load %arg31[%c0_172, %c0_173] : memref<1x16xf32, #tpu.memory_space<vmem>>, vector<1x16xf32>
    %331 = vector.broadcast %330 : vector<1x16xf32> to vector<2x16xf32>
    %332 = arith.addf %329, %331 : vector<2x16xf32>
    %c0_174 = arith.constant 0 : index
    %c0_175 = arith.constant 0 : index
    %333 = vector.load %arg32[%c0_174, %c0_175] : memref<16x128xf32, #tpu.memory_space<vmem>>, vector<16x128xf32>
    %cst_176 = arith.constant dense<0.000000e+00> : vector<2x128xf32>
    %334 = tpu.matmul %332, %333, %cst_176 {dimension_numbers = #tpu.dot_dimension_numbers<[1], [0], [0], [1], [0, 0, 1, 1], [], []>} : vector<2x16xf32>, vector<16x128xf32>, vector<2x128xf32> -> vector<2x128xf32>
    %c0_177 = arith.constant 0 : index
    %c0_178 = arith.constant 0 : index
    %335 = vector.load %arg33[%c0_177, %c0_178] : memref<1x128xf32, #tpu.memory_space<vmem>>, vector<1x128xf32>
    %336 = vector.broadcast %335 : vector<1x128xf32> to vector<2x128xf32>
    %337 = arith.addf %334, %336 : vector<2x128xf32>
    %c0_179 = arith.constant 0 : index
    %c0_180 = arith.constant 0 : index
    %c0_181 = arith.constant 0 : index
    %338 = vector.load %arg34[%c0_179, %c0_180, %c0_181] : memref<1x2x128xf32, #tpu.memory_space<vmem>>, vector<1x2x128xf32>
    %339 = vector.shape_cast %338 : vector<1x2x128xf32> to vector<2x128xf32>
    %340 = vector.shape_cast %337 : vector<2x128xf32> to vector<1x2x128xf32>
    tpu.vector_store %arg34[%c0_179, %c0_180, %c0_181], %340 {strides = array<i32>} : memref<1x2x128xf32, #tpu.memory_space<vmem>>, vector<1x2x128xf32>,
    return
  }
  func.func @transform_0(%arg0: i32) -> (i32, i32, i32) {
    %c0_i32 = arith.constant 0 : i32
    %c0_i32_0 = arith.constant 0 : i32
    %c0_i32_1 = arith.constant 0 : i32
    return %arg0, %c0_i32, %c0_i32_0 : i32, i32, i32
  }
  func.func @transform_1(%arg0: i32) -> (i32, i32) {
    %c0_i32 = arith.constant 0 : i32
    %c0_i32_0 = arith.constant 0 : i32
    %c0_i32_1 = arith.constant 0 : i32
    return %c0_i32, %c0_i32_0 : i32, i32
  }
  func.func @transform_2(%arg0: i32) -> (i32, i32) {
    %c0_i32 = arith.constant 0 : i32
    %c0_i32_0 = arith.constant 0 : i32
    %c0_i32_1 = arith.constant 0 : i32
    return %c0_i32, %c0_i32_0 : i32, i32
  }
  func.func @transform_3(%arg0: i32) -> (i32, i32) {
    %c0_i32 = arith.constant 0 : i32
    %c0_i32_0 = arith.constant 0 : i32
    %c0_i32_1 = arith.constant 0 : i32
    return %c0_i32, %c0_i32_0 : i32, i32
  }
  func.func @transform_4(%arg0: i32) -> (i32, i32) {
    %c0_i32 = arith.constant 0 : i32
    %c0_i32_0 = arith.constant 0 : i32
    %c0_i32_1 = arith.constant 0 : i32
    return %c0_i32, %c0_i32_0 : i32, i32
  }
  func.func @transform_5(%arg0: i32) -> (i32, i32) {
    %c0_i32 = arith.constant 0 : i32
    %c0_i32_0 = arith.constant 0 : i32
    %c0_i32_1 = arith.constant 0 : i32
    return %c0_i32, %c0_i32_0 : i32, i32
  }
  func.func @transform_6(%arg0: i32) -> (i32, i32) {
    %c0_i32 = arith.constant 0 : i32
    %c0_i32_0 = arith.constant 0 : i32
    %c0_i32_1 = arith.constant 0 : i32
    return %c0_i32, %c0_i32_0 : i32, i32
  }
  func.func @transform_7(%arg0: i32) -> (i32, i32) {
    %c0_i32 = arith.constant 0 : i32
    %c0_i32_0 = arith.constant 0 : i32
    %c0_i32_1 = arith.constant 0 : i32
    return %c0_i32, %c0_i32_0 : i32, i32
  }
  func.func @transform_8(%arg0: i32) -> (i32, i32) {
    %c0_i32 = arith.constant 0 : i32
    %c0_i32_0 = arith.constant 0 : i32
    %c0_i32_1 = arith.constant 0 : i32
    return %c0_i32, %c0_i32_0 : i32, i32
  }
  func.func @transform_9(%arg0: i32) -> (i32, i32) {
    %c0_i32 = arith.constant 0 : i32
    %c0_i32_0 = arith.constant 0 : i32
    %c0_i32_1 = arith.constant 0 : i32
    return %c0_i32, %c0_i32_0 : i32, i32
  }
  func.func @transform_10(%arg0: i32) -> (i32, i32) {
    %c0_i32 = arith.constant 0 : i32
    %c0_i32_0 = arith.constant 0 : i32
    %c0_i32_1 = arith.constant 0 : i32
    return %c0_i32, %c0_i32_0 : i32, i32
  }
  func.func @transform_11(%arg0: i32) -> (i32, i32) {
    %c0_i32 = arith.constant 0 : i32
    %c0_i32_0 = arith.constant 0 : i32
    %c0_i32_1 = arith.constant 0 : i32
    return %c0_i32, %c0_i32_0 : i32, i32
  }
  func.func @transform_12(%arg0: i32) -> (i32, i32) {
    %c0_i32 = arith.constant 0 : i32
    %c0_i32_0 = arith.constant 0 : i32
    %c0_i32_1 = arith.constant 0 : i32
    return %c0_i32, %c0_i32_0 : i32, i32
  }
  func.func @transform_13(%arg0: i32) -> (i32, i32) {
    %c0_i32 = arith.constant 0 : i32
    %c0_i32_0 = arith.constant 0 : i32
    %c0_i32_1 = arith.constant 0 : i32
    return %c0_i32, %c0_i32_0 : i32, i32
  }
  func.func @transform_14(%arg0: i32) -> (i32, i32) {
    %c0_i32 = arith.constant 0 : i32
    %c0_i32_0 = arith.constant 0 : i32
    %c0_i32_1 = arith.constant 0 : i32
    return %c0_i32, %c0_i32_0 : i32, i32
  }
  func.func @transform_15(%arg0: i32) -> (i32, i32) {
    %c0_i32 = arith.constant 0 : i32
    %c0_i32_0 = arith.constant 0 : i32
    %c0_i32_1 = arith.constant 0 : i32
    return %c0_i32, %c0_i32_0 : i32, i32
  }
  func.func @transform_16(%arg0: i32) -> (i32, i32) {
    %c0_i32 = arith.constant 0 : i32
    %c0_i32_0 = arith.constant 0 : i32
    %c0_i32_1 = arith.constant 0 : i32
    return %c0_i32, %c0_i32_0 : i32, i32
  }
  func.func @transform_17(%arg0: i32) -> (i32, i32) {
    %c0_i32 = arith.constant 0 : i32
    %c0_i32_0 = arith.constant 0 : i32
    %c0_i32_1 = arith.constant 0 : i32
    return %c0_i32, %c0_i32_0 : i32, i32
  }
  func.func @transform_18(%arg0: i32) -> (i32, i32) {
    %c0_i32 = arith.constant 0 : i32
    %c0_i32_0 = arith.constant 0 : i32
    %c0_i32_1 = arith.constant 0 : i32
    return %c0_i32, %c0_i32_0 : i32, i32
  }
  func.func @transform_19(%arg0: i32) -> (i32, i32) {
    %c0_i32 = arith.constant 0 : i32
    %c0_i32_0 = arith.constant 0 : i32
    %c0_i32_1 = arith.constant 0 : i32
    return %c0_i32, %c0_i32_0 : i32, i32
  }
  func.func @transform_20(%arg0: i32) -> (i32, i32) {
    %c0_i32 = arith.constant 0 : i32
    %c0_i32_0 = arith.constant 0 : i32
    %c0_i32_1 = arith.constant 0 : i32
    return %c0_i32, %c0_i32_0 : i32, i32
  }
  func.func @transform_21(%arg0: i32) -> (i32, i32) {
    %c0_i32 = arith.constant 0 : i32
    %c0_i32_0 = arith.constant 0 : i32
    %c0_i32_1 = arith.constant 0 : i32
    return %c0_i32, %c0_i32_0 : i32, i32
  }
  func.func @transform_22(%arg0: i32) -> (i32, i32) {
    %c0_i32 = arith.constant 0 : i32
    %c0_i32_0 = arith.constant 0 : i32
    %c0_i32_1 = arith.constant 0 : i32
    return %c0_i32, %c0_i32_0 : i32, i32
  }
  func.func @transform_23(%arg0: i32) -> (i32, i32) {
    %c0_i32 = arith.constant 0 : i32
    %c0_i32_0 = arith.constant 0 : i32
    %c0_i32_1 = arith.constant 0 : i32
    return %c0_i32, %c0_i32_0 : i32, i32
  }
  func.func @transform_24(%arg0: i32) -> (i32, i32) {
    %c0_i32 = arith.constant 0 : i32
    %c0_i32_0 = arith.constant 0 : i32
    %c0_i32_1 = arith.constant 0 : i32
    return %c0_i32, %c0_i32_0 : i32, i32
  }
  func.func @transform_25(%arg0: i32) -> (i32, i32) {
    %c0_i32 = arith.constant 0 : i32
    %c0_i32_0 = arith.constant 0 : i32
    %c0_i32_1 = arith.constant 0 : i32
    return %c0_i32, %c0_i32_0 : i32, i32
  }
  func.func @transform_26(%arg0: i32) -> (i32, i32) {
    %c0_i32 = arith.constant 0 : i32
    %c0_i32_0 = arith.constant 0 : i32
    %c0_i32_1 = arith.constant 0 : i32
    return %c0_i32, %c0_i32_0 : i32, i32
  }
  func.func @transform_27(%arg0: i32) -> (i32, i32) {
    %c0_i32 = arith.constant 0 : i32
    %c0_i32_0 = arith.constant 0 : i32
    %c0_i32_1 = arith.constant 0 : i32
    return %c0_i32, %c0_i32_0 : i32, i32
  }
  func.func @transform_28(%arg0: i32) -> (i32, i32) {
    %c0_i32 = arith.constant 0 : i32
    %c0_i32_0 = arith.constant 0 : i32
    %c0_i32_1 = arith.constant 0 : i32
    return %c0_i32, %c0_i32_0 : i32, i32
  }
  func.func @transform_29(%arg0: i32) -> (i32, i32) {
    %c0_i32 = arith.constant 0 : i32
    %c0_i32_0 = arith.constant 0 : i32
    %c0_i32_1 = arith.constant 0 : i32
    return %c0_i32, %c0_i32_0 : i32, i32
  }
  func.func @transform_30(%arg0: i32) -> (i32, i32) {
    %c0_i32 = arith.constant 0 : i32
    %c0_i32_0 = arith.constant 0 : i32
    %c0_i32_1 = arith.constant 0 : i32
    return %c0_i32, %c0_i32_0 : i32, i32
  }
  func.func @transform_31(%arg0: i32) -> (i32, i32) {
    %c0_i32 = arith.constant 0 : i32
    %c0_i32_0 = arith.constant 0 : i32
    %c0_i32_1 = arith.constant 0 : i32
    return %c0_i32, %c0_i32_0 : i32, i32
  }
  func.func @transform_32(%arg0: i32) -> (i32, i32) {
    %c0_i32 = arith.constant 0 : i32
    %c0_i32_0 = arith.constant 0 : i32
    %c0_i32_1 = arith.constant 0 : i32
    return %c0_i32, %c0_i32_0 : i32, i32
  }
  func.func @transform_33(%arg0: i32) -> (i32, i32, i32) {
    %c0_i32 = arith.constant 0 : i32
    %c0_i32_0 = arith.constant 0 : i32
    %c0_i32_1 = arith.constant 0 : i32
    return %arg0, %c0_i32, %c0_i32_0 : i32, i32, i32
  }
}

</mosaic_0001>

<bundles_post_ra>
// kernel: forward.1
= control target key start
LH: loop header
LB: loop body
LE: loop exit
PB: predicated region body
PF: predicated region fallthrough
CT: control target
= control target key end

     0   :  { %s5852_s6 = smov 1   ;;  %s5853_s10 = smov 2   ;;  %s6813_s0 = inlined_call_operand.smem [shape: u32[34], index: -1, kind: input, shape index: {}] }
   0x1   :  { %s5915_s5 = sld [smem:[%s6813_s0]]   ;;  %s5854_s14 = smov 3  }
   0x2   :  { %s5920_s9 = sld [smem:[%s6813_s0 + %s5852_s6]]   ;;  %s5855_s18 = smov 4  }
   0x3   :  { %s5925_s13 = sld [smem:[%s6813_s0 + %s5853_s10]]   ;;  %s5856_s22 = smov 5  }
   0x4   :  { %s5930_s17 = sld [smem:[%s6813_s0 + %s5854_s14]]   ;;  %s5857_s26 = smov 6  }
   0x5   :  { %s5935_s21 = sld [smem:[%s6813_s0 + %s5855_s18]]   ;;  %s5858_s30 = smov 7  }
   0x6   :  { %s5940_s25 = sld [smem:[%s6813_s0 + %s5856_s22]]   ;;  %s5859_s4 = smov 8  }
   0x7   :  { %6838 = sst [smem:[#allocation31_spill]] %s5915_s5  ;;  %s5860_s10 = smov 9  }
   0x8   :  { %s5945_s29 = sld [smem:[%s6813_s0 + %s5857_s26]]   ;;  %s5861_s15 = smov 10  }
   0x9   :  { %s5950_s3 = sld [smem:[%s6813_s0 + %s5858_s30]]   ;;  %s5862_s20 = smov 11  }
   0xa   :  { %s5955_s8 = sld [smem:[%s6813_s0 + %s5859_s4]]   ;;  %s5863_s26 = smov 12  }
   0xb   :  { %6839 = sst [smem:[#allocation32_spill]] %s5935_s21  ;;  %s5864_s1 = smov 13  }
   0xc   :  { %s5960_s14 = sld [smem:[%s6813_s0 + %s5860_s10]]   ;;  %s5865_s7 = smov 14  }
   0xd   :  { %s5965_s19 = sld [smem:[%s6813_s0 + %s5861_s15]]   ;;  %s5866_s15 = smov 15  }
   0xe   :  { %6840 = sst [smem:[#allocation33_spill]] %s5945_s29  ;;  %s5867_s22 = smov 16  }
   0xf   :  { %6841 = sst [smem:[#allocation34_spill]] %s5950_s3  ;;  %s5868_s28 = smov 17  }
  0x10   :  { %6842 = sst [smem:[#allocation35_spill]] %s5955_s8 }
  0x11   :  { %s5970_s24 = sld [smem:[%s6813_s0 + %s5862_s20]]  }
  0x12   :  { %6843 = sst [smem:[#allocation36_spill]] %s5960_s14 }
  0x13   :  { %6844 = sst [smem:[#allocation37_spill]] %s5965_s19 }
  0x14   :  { %s5975_s30 = sld [smem:[%s6813_s0 + %s5863_s26]]  }
  0x15   :  { %s5980_s6 = sld [smem:[%s6813_s0 + %s5864_s1]]  }
  0x16   :  { %s5985_s12 = sld [smem:[%s6813_s0 + %s5865_s7]]   ;;  %s5869_s7 = smov 18  }
  0x17   :  { %6845 = sst [smem:[#allocation38_spill]] %s5970_s24 }
  0x18   :  { %s5990_s20 = sld [smem:[%s6813_s0 + %s5866_s15]]   ;;  %s5870_s15 = smov 19  }
  0x19   :  { %s5995_s27 = sld [smem:[%s6813_s0 + %s5867_s22]]   ;;  %s5871_s22 = smov 20  }
  0x1a   :  { %s6000_s4 = sld [smem:[%s6813_s0 + %s5868_s28]]   ;;  %s5872_s28 = smov 21  }
  0x1b   :  { %6846 = sst [smem:[#allocation39_spill]] %s5980_s6 }
  0x1c   :  { %6847 = sst [smem:[#allocation40_spill]] %s5985_s12 }
  0x1d   :  { %s6005_s12 = sld [smem:[%s6813_s0 + %s5869_s7]]   ;;  %s5873_s7 = smov 22  }
  0x1e   :  { %6848 = sst [smem:[#allocation41_spill]] %s5990_s20 }
  0x1f   :  { %6849 = sst [smem:[#allocation42_spill]] %s5995_s27 }
  0x20   :  { %6850 = sst [smem:[#allocation43_spill]] %s6000_s4 }
  0x21   :  { %s6010_s20 = sld [smem:[%s6813_s0 + %s5870_s15]]   ;;  %s5874_s15 = smov 23  }
  0x22   :  { %s6015_s27 = sld [smem:[%s6813_s0 + %s5871_s22]]   ;;  %s5875_s22 = smov 24  }
  0x23   :  { %s6020_s6 = sld [smem:[%s6813_s0 + %s5872_s28]]   ;;  %s5876_s28 = smov 25  }
  0x24   :  { %s6025_s19 = sld [smem:[%s6813_s0 + %s5873_s7]]   ;;  %s5877_s7 = smov 26  }
  0x25   :  { %s6030_s8 = sld [smem:[%s6813_s0 + %s5874_s15]]   ;;  %s5878_s15 = smov 27  }
  0x27   :  { %6851 = sst [smem:[#allocation44_spill]] %s6010_s20 }
  0x28   :  { %6852 = sst [smem:[#allocation45_spill]] %s6015_s27 }
  0x29   :  { %6853 = sst [smem:[#allocation46_spill]] %s6020_s6 }
  0x2a   :  { %6854 = sst [smem:[#allocation47_spill]] %s6025_s19 }
  0x2b   :  { %6855 = sst [smem:[#allocation48_spill]] %s6030_s8 }
  0x2c   :  { %s6035_s27 = sld [smem:[%s6813_s0 + %s5875_s22]]   ;;  %s5879_s22 = smov 28  }
  0x2d   :  { %s6040_s6 = sld [smem:[%s6813_s0 + %s5876_s28]]   ;;  %s5880_s28 = smov 29  }
  0x2e   :  { %s6045_s19 = sld [smem:[%s6813_s0 + %s5877_s7]]   ;;  %s5881_s7 = smov 30  }
  0x2f   :  { %s6050_s8 = sld [smem:[%s6813_s0 + %s5878_s15]]   ;;  %s5882_s15 = smov 31  }
  0x30   :  { %s6055_s14 = sld [smem:[%s6813_s0 + %s5879_s22]]   ;;  %s5883_s22 = smov 32  }
  0x31   :  { %s6060_s3 = sld [smem:[%s6813_s0 + %s5880_s28]]   ;;  %s5884_s28 = smov 33  }
  0x32   :  { %s6065_s29 = sld [smem:[%s6813_s0 + %s5881_s7]]  }
  0x33   :  { %6856 = sst [smem:[#allocation49_spill]] %s6040_s6 }
  0x34   :  { %s6070_s21 = sld [smem:[%s6813_s0 + %s5882_s15]]  }
  0x35   :  { %6857 = sst [smem:[#allocation50_spill]] %s6050_s8 }
  0x36   :  { %6858 = sst [smem:[#allocation51_spill]] %s6055_s14 }
  0x37   :  { %6859 = sst [smem:[#allocation52_spill]] %s6060_s3 }
  0x38   :  { %s6075_s14 = sld [smem:[%s6813_s0 + %s5883_s22]]  }
  0x39   :  { %s6080_s3 = sld [smem:[%s6813_s0 + %s5884_s28]]  }
  0x3a   :  { %72 = vsyncpa [#allocation3], 0 }
  0x3b   :  { %73 = vsyncpa [#allocation6], 0 }
  0x3c   :  { %74 = vsyncpa [#allocation9], 0 }
  0x3d   :  { %75 = vsyncpa [#allocation12], 0 }
  0x3e   :  { %76 = vsyncpa [#allocation15], 0 }
  0x3f   :  { %77 = vsyncpa [#allocation18], 0 }
  0x40   :  { %78 = vsyncpa [#allocation21], 0 }
  0x41   :  { %79 = vsyncpa [#allocation4], 0 }
  0x42   :  { %81 = vsyncpa [#allocation4 + $0x1], 0  ;;  %s6082_s7 = smov 0   ;;  %s6084_s10 = smov 0  }
  0x43   :  { %s6086_s11 = smov 0   ;;  %s6088_s15 = smov 0  }
  0x44 LB: > { %6860 = sst [smem:[#allocation53_spill]] %s5838_s7  ;;  %s6103_s0 = sadd.s32 4294967295, %s5850_s15   ;;  %s5850_s15 = sphi %s6088_s15, %s6939_s15   ;;  %s5846_s11 = sphi %s6086_s11, %s6941_s11   ;;  %s5842_s10 = sphi %s6084_s10, %s6943_s10   ;;  %s5838_s7 = sphi %s6082_s7, %s6942_s7  }
  0x45   : > { %6861 = sst [smem:[#allocation54_spill]] %s5846_s11  ;;  %s4344_s16 = sadd.s32 4294967294, %s5850_s15  }
  0x46   : > { %s6107_s18 = sadd.s32 1, %s5850_s15   ;;  %s792_s22 = sadd.s32 1, %s5846_s11 }
  0x47   : > { %6862 = sst [smem:[#allocation55_spill]] %s6107_s18  ;;  %s789_s23 = ssub.s32 %s5850_s15, %s6107_s18 }
  0x48   : > { %p802_p0 = scmp.ne.s32.totalorder %s5846_s11, %s5842_s10  ;;  %p790_p1 = scmp.eq.s32.totalorder %s789_s23, 0 }
  0x49   : > { %p803_p2 = scmp.eq.s32.totalorder %s6103_s0, 1  ;;  %p808_p3 = scmp.ne.s32.totalorder %s5842_s10, %s5838_s7 }
  0x4a   : > { %p809_p4 = scmp.eq.s32.totalorder %s4344_s16, 1  ;;  %p4345_p7 = scmp.ge.s32.totalorder %s5850_s15, 1 }
  0x4b   : > { %s6118_s26 = scalar_select %p790_p1, %s5846_s11, %s792_s22  }
  0x4c   : > { %p6120_p5 = por %p803_p2, %p802_p0  ;;  %p6124_p6 = por %p809_p4, %p808_p3 }
  0x4d   : > { %6863 = sst [smem:[#allocation56_spill]] %s6118_s26  ;;  %p816_p8 = scmp.lt.s32.totalorder %s5850_s15, 3 }
  0x4e   : > { %s6864_s28 = scalar_select %p6120_p5, 1, 0 }
  0x4f   : > { %s6865_s1 = scalar_select %p6124_p6, 1, 0 }
  0x50   : > { %p6825_p9 = scmp.eq.s32.totalorder %s6103_s0, 0  ;;  %p6131_p10 = pnand %p4345_p7, %p816_p8 }
  0x51   : > { %6866 = sst [smem:[#allocation57_spill]] %s6865_s1  ;;  %s5885_s23 = smov [#allocation5]  }
  0x52   : > { %s6867_s2 = scalar_select %p6131_p10, 1, 0 }
  0x53   : > { %s869_s16 = sshll.u32 %s5885_s23, 4  ;;  %p5106_p11 = pneg %p6131_p10  ;;  %s870_s16 = int_to_ptr.vmem [resolvable:$true] %s869_s16 }
  0x54   : > { %s5886_s22 = smov [#allocation8]   ;;  %s5887_s18 = smov [#allocation11]  }
  0x55   : > { %s905_s26 = sshll.u32 %s5886_s22, 4  ;;  %p6139_p12 = pnand %p6825_p9, %p5106_p11  ;;  %s906_s26 = int_to_ptr.vmem [resolvable:$true] %s905_s26 }
  0x56   : > { %s928_s1 = sshll.u32 %s5887_s18, 4  ;;  %s5461_s23 = scalar_lea.vmem %s870_s16, 64  ;;  %s929_s1 = int_to_ptr.vmem [resolvable:$true] %s928_s1 }
  0x57   : > { %p6145_p13 = pneg %p6139_p12  ;;  %p5462_p0 = scmp.ne.s32.totalorder %s870_s16, %s5461_s23 }
  0x58   : > { %p5469_p3 = scmp.lt.s32.totalorder %s870_s16, %s870_s16  ;;  %p5470_p4 = scmp.lt.s32.totalorder %s5461_s23, %s5461_s23 }
  0x59   : > { %p5464_p1 = pnand %p5462_p0, %p6145_p13 }
  0x5a   : > { %p5471_p7 = por %p5470_p4, %p5469_p3 }
  0x5b   : > { %p5465_p2 = pneg %p5464_p1 }
  0x5d   : > { %p5472_p8 = pnand %p5471_p7, %p5465_p2 }
  0x5f   : > { %5475 = shalt.err (!%p5472_p8)
}
  0x60   : > { %s6870_s24 = sld [smem:[#allocation38_spill]]  ;;  %s5487_s18 = scalar_lea.vmem %s906_s26, 32 }
  0x61   : > { %p5488_p11 = scmp.ne.s32.totalorder %s906_s26, %s5487_s18  ;;  %p5495_p5 = scmp.lt.s32.totalorder %s906_s26, %s906_s26 }
  0x62   : > { %p5496_p10 = scmp.lt.s32.totalorder %s5487_s18, %s5487_s18 }
  0x63   : > { %p5490_p9 = pnand %p5488_p11, %p6145_p13 }
  0x64   : > { %p5497_p0 = por %p5496_p10, %p5495_p5 }
  0x65   : > { %p5491_p6 = pneg %p5490_p9 }
  0x66   : > { %5112 = dma.hbm_to_vmem [thread:$0]  (!%p6139_p12), %s6870_s24, 64, %s870_s16, [#allocation6]  }
  0x67   : > { %p5498_p1 = pnand %p5497_p0, %p5491_p6 }
  0x69   : > { %5501 = shalt.err (!%p5498_p1)
}
  0x6a   : > { %s6871_s4 = sld [smem:[#allocation43_spill]]  ;;  %s5513_s22 = scalar_lea.vmem %s929_s1, 1536 }
  0x6b   : > { %p5514_p2 = scmp.ne.s32.totalorder %s929_s1, %s5513_s22  ;;  %p5521_p7 = scmp.lt.s32.totalorder %s929_s1, %s929_s1 }
  0x6c   : > { %p5522_p8 = scmp.lt.s32.totalorder %s5513_s22, %s5513_s22 }
  0x6d   : > { %p5516_p3 = pnand %p5514_p2, %p6145_p13 }
  0x6e   : > { %p5523_p11 = por %p5522_p8, %p5521_p7 }
  0x6f   : > { %p5517_p4 = pneg %p5516_p3 }
  0x70   : > { %5118 = dma.hbm_to_vmem [thread:$0]  (!%p6139_p12), %s6871_s4, 32, %s906_s26, [#allocation9]  }
  0x71   : > { %p5524_p9 = pnand %p5523_p11, %p5517_p4 }
  0x73   : > { %5527 = shalt.err (!%p5524_p9)
}
  0x74   : > { %s6828_s16 = smov 64   ;;  %s6872_s20 = sld [smem:[#allocation44_spill]] }
  0x75   : > { %s6830_s23 = smov 4   ;;  %s5890_s26 = smov [#allocation14]  }
  0x76   : > { %s966_s18 = sshll.u32 %s5890_s26, 4  ;;  %s967_s18 = int_to_ptr.vmem [resolvable:$true] %s966_s18 }
  0x77   : > { %s5539_s4 = scalar_lea.vmem %s967_s18, 1024  ;;  %p5547_p0 = scmp.lt.s32.totalorder %s967_s18, %s967_s18 }
  0x78   : > { %p5540_p5 = scmp.ne.s32.totalorder %s967_s18, %s5539_s4  ;;  %p5548_p1 = scmp.lt.s32.totalorder %s5539_s4, %s5539_s4 }
  0x7a   : > { %5124 = dma.hbm_to_vmem [thread:$0]  (!%p6139_p12), %s6872_s20, 1536, %s929_s1, [#allocation12], %s6828_s16, %s6828_s16, %s6830_s23  }
  0x7b   : > { %p5542_p6 = pnand %p5540_p5, %p6145_p13  ;;  %p5549_p2 = por %p5548_p1, %p5547_p0 }
  0x7d   : > { %p5543_p10 = pneg %p5542_p6 }
  0x7f   : > { %p5550_p3 = pnand %p5549_p2, %p5543_p10 }
  0x81   : > { %5553 = shalt.err (!%p5550_p3)
}
  0x82   : > { %s6832_s22 = smov 128   ;;  %s6873_s6 = sld [smem:[#allocation49_spill]] }
  0x83   : > { %s6834_s24 = smov 8   ;;  %s5893_s1 = smov [#allocation17]  }
  0x84   : > { %s993_s26 = sshll.u32 %s5893_s1, 4  ;;  %s5894_s16 = smov [#allocation2]   ;;  %s994_s26 = int_to_ptr.vmem [resolvable:$true] %s993_s26 }
  0x85   : > { %s840_s23 = sshll.u32 %s5894_s16, 4  ;;  %s5565_s4 = scalar_lea.vmem %s994_s26, 16  ;;  %s841_s23 = int_to_ptr.vmem [resolvable:$true] %s840_s23 }
  0x86   : > { %p5566_p4 = scmp.ne.s32.totalorder %s994_s26, %s5565_s4  ;;  %s5572_s20 = scalar_lea.vmem %s994_s26, 32 }
  0x87   : > { %p5573_p11 = scmp.lt.s32.totalorder %s994_s26, %s994_s26  ;;  %p5574_p9 = scmp.lt.s32.totalorder %s5572_s20, %s5565_s4 }
  0x88   : > { %5130 = dma.hbm_to_vmem [thread:$0]  (!%p6139_p12), %s6873_s6, 1024, %s967_s18, [#allocation15], %s6832_s22, %s6832_s22, %s6834_s24  }
  0x89   : > { %p5568_p7 = pnand %p5566_p4, %p6145_p13  ;;  %p5575_p5 = por %p5574_p9, %p5573_p11 }
  0x8b   : > { %p5569_p8 = pneg %p5568_p7 }
  0x8d   : > { %p5576_p6 = pnand %p5575_p5, %p5569_p8 }
  0x8f   : > { %5579 = shalt.err (!%p5576_p6)
}
  0x90   : > { %s6874_s8 = sld [smem:[#allocation50_spill]]  ;;  %s5591_s18 = scalar_lea.vmem %s841_s23, 128 }
  0x91   : > { %p5592_p10 = scmp.ne.s32.totalorder %s841_s23, %s5591_s18  ;;  %p5599_p2 = scmp.lt.s32.totalorder %s841_s23, %s841_s23 }
  0x92   : > { %p5600_p3 = scmp.lt.s32.totalorder %s5591_s18, %s5591_s18 }
  0x93   : > { %p5594_p0 = pnand %p5592_p10, %p6145_p13 }
  0x94   : > { %p5601_p4 = por %p5600_p3, %p5599_p2 }
  0x95   : > { %p5595_p1 = pneg %p5594_p0 }
  0x96   : > { %5136 = dma.hbm_to_vmem [thread:$0]  (!%p6139_p12), %s6874_s8, 16, %s994_s26, [#allocation18]  }
  0x97   : > { %p5602_p7 = pnand %p5601_p4, %p5595_p1 }
  0x99   : > { %5605 = shalt.err (!%p5602_p7)
}
  0x9a   : > { %s6875_s20 = smov 4   ;;  %s6876_s16 = smov 64  }
  0x9b   : > { %5109 = dma.hbm_to_vmem [thread:$0]  (!%p6139_p12), %s5940_s25, 128, %s841_s23, [#allocation3], %s6876_s16, %s6876_s16, %s6875_s20  }
  0x9c   : > { %s5895_s1 = smov [#allocation7]   ;;  %s5896_s4 = smov [#allocation10]  }
  0x9d   : > { %s879_s26 = sshll.u32 %s5895_s1, 4  ;;  %s915_s22 = sshll.u32 %s5896_s4, 4  ;;  %s880_s26 = int_to_ptr.vmem [resolvable:$true] %s879_s26  ;;  %s916_s22 = int_to_ptr.vmem [resolvable:$true] %s915_s22 }
  0x9e   : > { %s5617_s24 = scalar_lea.vmem %s880_s26, 1024  ;;  %p5625_p5 = scmp.lt.s32.totalorder %s880_s26, %s880_s26 }
  0x9f   : > { %p5618_p8 = scmp.ne.s32.totalorder %s880_s26, %s5617_s24  ;;  %p5626_p6 = scmp.lt.s32.totalorder %s5617_s24, %s5617_s24 }
  0xa1   : > { %p5620_p11 = pnand %p5618_p8, %p6145_p13  ;;  %p5627_p10 = por %p5626_p6, %p5625_p5 }
  0xa3   : > { %p5621_p9 = pneg %p5620_p11 }
  0xa5   : > { %p5628_p0 = pnand %p5627_p10, %p5621_p9 }
  0xa7   : > { %5631 = shalt.err (!%p5628_p0)
}
  0xa8   : > { %5115 = dma.hbm_to_vmem [thread:$0]  (!%p6139_p12), %s5975_s30, 1024, %s880_s26, [#allocation6], %s6876_s16, %s6876_s16, %s6875_s20  }
  0xa9   : > { %s5643_s23 = scalar_lea.vmem %s916_s22, 1024  ;;  %p5651_p4 = scmp.lt.s32.totalorder %s916_s22, %s916_s22 }
  0xaa   : > { %p5644_p1 = scmp.ne.s32.totalorder %s916_s22, %s5643_s23  ;;  %p5652_p7 = scmp.lt.s32.totalorder %s5643_s23, %s5643_s23 }
  0xac   : > { %p5646_p2 = pnand %p5644_p1, %p6145_p13  ;;  %p5653_p8 = por %p5652_p7, %p5651_p4 }
  0xae   : > { %p5647_p3 = pneg %p5646_p2 }
  0xb0   : > { %p5654_p11 = pnand %p5653_p8, %p5647_p3 }
  0xb2   : > { %5657 = shalt.err (!%p5654_p11)
}
  0xb3   : > { %5121 = dma.hbm_to_vmem [thread:$0]  (!%p6139_p12), %s6005_s12, 1024, %s916_s22, [#allocation9], %s6876_s16, %s6876_s16, %s6875_s20  }
  0xb4   : > { %s5897_s24 = smov [#allocation13]   ;;  %s5898_s1 = smov [#allocation16]  }
  0xb5   : > { %s953_s18 = sshll.u32 %s5897_s24, 4  ;;  %s979_s26 = sshll.u32 %s5898_s1, 4  ;;  %s954_s18 = int_to_ptr.vmem [resolvable:$true] %s953_s18  ;;  %s980_s26 = int_to_ptr.vmem [resolvable:$true] %s979_s26 }
  0xb6   : > { %s5669_s4 = scalar_lea.vmem %s954_s18, 1024  ;;  %p5677_p10 = scmp.lt.s32.totalorder %s954_s18, %s954_s18 }
  0xb7   : > { %p5670_p9 = scmp.ne.s32.totalorder %s954_s18, %s5669_s4  ;;  %p5678_p0 = scmp.lt.s32.totalorder %s5669_s4, %s5669_s4 }
  0xb9   : > { %p5672_p5 = pnand %p5670_p9, %p6145_p13  ;;  %p5679_p1 = por %p5678_p0, %p5677_p10 }
  0xbb   : > { %p5673_p6 = pneg %p5672_p5 }
  0xbd   : > { %p5680_p2 = pnand %p5679_p1, %p5673_p6 }
  0xbf   : > { %5683 = shalt.err (!%p5680_p2)
}
  0xc0   : > { %5127 = dma.hbm_to_vmem [thread:$0]  (!%p6139_p12), %s6035_s27, 1024, %s954_s18, [#allocation12], %s6876_s16, %s6876_s16, %s6875_s20  }
  0xc1   : > { %s5695_s22 = scalar_lea.vmem %s980_s26, 1024  ;;  %p5703_p8 = scmp.lt.s32.totalorder %s980_s26, %s980_s26 }
  0xc2   : > { %p5696_p3 = scmp.ne.s32.totalorder %s980_s26, %s5695_s22  ;;  %p5704_p11 = scmp.lt.s32.totalorder %s5695_s22, %s5695_s22 }
  0xc4   : > { %p5698_p4 = pnand %p5696_p3, %p6145_p13  ;;  %p5705_p9 = por %p5704_p11, %p5703_p8 }
  0xc6   : > { %p5699_p7 = pneg %p5698_p4 }
  0xc8   : > { %p5706_p5 = pnand %p5705_p9, %p5699_p7 }
  0xca   : > { %5709 = shalt.err (!%p5706_p5)
}
  0xcb   : > { %s6877_s23 = smov 8   ;;  %s6878_s24 = smov 128  }
  0xcc   : > { %5133 = dma.hbm_to_vmem [thread:$0]  (!%p6139_p12), %s6045_s19, 1024, %s980_s26, [#allocation15], %s6878_s24, %s6878_s24, %s6877_s23  }
  0xcd   : > { %s5899_s1 = smov [#allocation19]   ;;  %s5900_s16 = smov [#allocation20]  }
  0xce   : > { %s1012_s20 = sshll.u32 %s5899_s1, 4  ;;  %s1026_s18 = sshll.u32 %s5900_s16, 4  ;;  %s1013_s20 = int_to_ptr.vmem [resolvable:$true] %s1012_s20  ;;  %s1027_s18 = int_to_ptr.vmem [resolvable:$true] %s1026_s18 }
  0xcf   : > { %s5721_s4 = scalar_lea.vmem %s1013_s20, 256  ;;  %p5729_p1 = scmp.lt.s32.totalorder %s1013_s20, %s1013_s20 }
  0xd0   : > { %p5722_p6 = scmp.ne.s32.totalorder %s1013_s20, %s5721_s4  ;;  %p5730_p2 = scmp.lt.s32.totalorder %s5721_s4, %s5721_s4 }
  0xd2   : > { %p5724_p10 = pnand %p5722_p6, %p6145_p13  ;;  %p5731_p3 = por %p5730_p2, %p5729_p1 }
  0xd4   : > { %p5725_p0 = pneg %p5724_p10 }
  0xd6   : > { %p5732_p4 = pnand %p5731_p3, %p5725_p0 }
  0xd8   : > { %5735 = shalt.err (!%p5732_p4)
}
  0xd9   : > { %5139 = dma.hbm_to_vmem [thread:$0]  (!%p6139_p12), %s6070_s21, 256, %s1013_s20, [#allocation18], %s6878_s24, %s6878_s24, %s6877_s23  }
  0xda   : > { %s5747_s26 = scalar_lea.vmem %s1027_s18, 16  ;;  %s5754_s22 = scalar_lea.vmem %s1027_s18, 32 }
  0xdb   : > { %p5748_p7 = scmp.ne.s32.totalorder %s1027_s18, %s5747_s26  ;;  %p5755_p9 = scmp.lt.s32.totalorder %s1027_s18, %s1027_s18 }
  0xdc   : > { %p5756_p5 = scmp.lt.s32.totalorder %s5754_s22, %s5747_s26 }
  0xdd   : > { %p5750_p8 = pnand %p5748_p7, %p6145_p13 }
  0xde   : > { %p5757_p6 = por %p5756_p5, %p5755_p9 }
  0xdf   : > { %p5751_p11 = pneg %p5750_p8 }
  0xe1   : > { %p5758_p10 = pnand %p5757_p6, %p5751_p11 }
  0xe3   : > { %5761 = shalt.err (!%p5758_p10)
}
  0xe4   : > { %5142 = dma.hbm_to_vmem [thread:$0]  (!%p6139_p12), %s6075_s14, 16, %s1027_s18, [#allocation21]  }
  0xe5   : > { %p6879_p0 = scmp.ne.s32.totalorder %s6867_s2, 0 }
  0xe6   : > { %p6880_p1 = scmp.eq.s32.totalorder (!%p6879_p0), %s6103_s0, 0 }
  0xe7   : > { %1047 = sbr.rel (%p6879_p0) target bundleno = 4632 (0x1218), region = 152 }
  0xec   : > { %5805 = dma.done.wait (%p6880_p1), [#allocation3], 128   ;;  %p6881_p2 = pmov %p6880_p1 }
  0xed   : > { %p6882_p13 = pmov %p6880_p1 }
  0xee   : > { %5807 = vsyncadd (%p6881_p2), [#allocation3], 4294967168 }
  0xef   : > { %5809 = dma.done.wait (%p6882_p13), [#allocation6], 1088   ;;  %p6883_p3 = pmov %p6880_p1 }
  0xf0   : > { %p6884_p4 = pmov %p6880_p1 }
  0xf1   : > { %5811 = vsyncadd (%p6883_p3), [#allocation6], 4294966208 }
  0xf2   : > { %5813 = dma.done.wait (%p6884_p4), [#allocation9], 1056   ;;  %p6885_p12 = pmov %p6880_p1 }
  0xf3   : > { %p6886_p7 = pmov %p6880_p1 }
  0xf4   : > { %5815 = vsyncadd (%p6885_p12), [#allocation9], 4294966240 }
  0xf5   : > { %5817 = dma.done.wait (%p6886_p7), [#allocation12], 2560   ;;  %p6887_p8 = pmov %p6880_p1 }
  0xf6   : > { %p6888_p11 = pmov %p6880_p1 }
  0xf7   : > { %5819 = vsyncadd (%p6887_p8), [#allocation12], 4294964736 }
  0xf8   : > { %5821 = dma.done.wait (%p6888_p11), [#allocation15], 2048   ;;  %p6889_p9 = pmov %p6880_p1 }
  0xf9   : > { %p6890_p5 = pmov %p6880_p1 }
  0xfa   : > { %5823 = vsyncadd (%p6889_p9), [#allocation15], 4294965248 }
  0xfb   : > { %5825 = dma.done.wait (%p6890_p5), [#allocation18], 272   ;;  %p6891_p6 = pmov %p6880_p1 }
  0xfc   : > { %p6892_p10 = pmov %p6880_p1 }
  0xfd   : > { %5827 = vsyncadd (%p6891_p6), [#allocation18], 4294967024 }
  0xfe   : > { %5829 = dma.done.wait (%p6892_p10), [#allocation21], 16   ;;  %p6893_p0 = pmov %p6880_p1 }
  0xff   : > { %s6894_s5 = sld [smem:[#allocation31_spill]]  ;;  %p1175_p1 = scmp.lt.s32.totalorder %s6103_s0, 1  ;;  %v1189_v0 = vlaneseq  ;;  %v5901_v1 = vmov 0   ;;  %v5273_v17 = vld [vmem:[%s5920_s9 + $0x38] sm:$0xff]   ;;  %v5274_v22 = vld [vmem:[%s5920_s9 + $0x30] sm:$0xff]   ;;  %vm1288_vm3 = vcmask 523264  }
 0x100   : > { %5831 = vsyncadd (%p6893_p0), [#allocation21], 4294967280  ;;  %1406 = vmatprep.subr.bf16.mxu0 %v5901_v1  ;;  %s5902_s23 = smov 64   ;;  %v5275_v33 = vld [vmem:[%s5920_s9 + $0x28] sm:$0xff]   ;;  %v5276_v39 = vld [vmem:[%s5920_s9 + $0x20] sm:$0xff]   ;;  %vm5903_vm8 = vmmov 1  }
 0x101   : > { %s1176_s7 = scalar_select %p1175_p1, %s6103_s0, 1  ;;  %v6266_v2 = vshrl.u32 %v1189_v0, 7  ;;  %1407 = vmatpush1.bf16.msra.mxu0 %v5273_v17  ;;  %v5277_v42 = vld [vmem:[%s5920_s9 + $0x18] sm:$0xff]   ;;  %v5287_v46 = vld [vmem:[%s5930_s17 + $0x70] sm:$0xff]   ;;  %v5289_v49 = vld [vmem:[%s5930_s17 + $0x68] sm:$0xff]  }
 0x102   : > { %1408 = vmatprep.subr.bf16.mxu0 %v5901_v1  ;;  %v5285_v43 = vld [vmem:[%s5930_s17 + $0x78] sm:$0xff]   ;;  %v5288_v48 = vld [vmem:[%s5930_s17 + $0x30] sm:$0xff]   ;;  %v5290_v53 = vld [vmem:[%s5930_s17 + $0x28] sm:$0xff]   ;;  %s6903_s24 = sld [smem:[#allocation32_spill]]  ;;  %p6935_p13 = scmp.ne.s32.totalorder %s6864_s28, 0 }
 0x103   : > { %s4627_s11 = sshll.u32 %s1176_s7, 5  ;;  %v6269_v3 = vadd.s32 8, %v6266_v2  ;;  %v1207_v4 = vadd.s32 24, %v6266_v2  ;;  %vm1200_vm0 = vcmp.lt.s32.totalorder %v6266_v2, 7  ;;  %vm1191_vm1 = vcmp.lt.s32.totalorder %v6266_v2, 1  ;;  %v5286_v44 = vld [vmem:[%s5930_s17 + $0x38] sm:$0xff]   ;;  %4628 = vmatprep.subr.bf16.mxu1 %v5285_v43 }
 0x104   : > { %v1206_v37 = vadd.s32 16, %v6266_v2  ;;  %v1212_v40 = vand.u32 15, %v6266_v2  ;;  %4629 = vmatpush3.bf16.msra.mxu1 %v5286_v44  ;;  %v5278_v50 = vld [vmem:[%s5920_s9 + $0x10] sm:$0xff]   ;;  %v5279_v54 = vld [vmem:[%s5920_s9 + $0x8] sm:$0xff]   ;;  %v5280_v55 = vld [vmem:[%s5920_s9] sm:$0xff]   ;;  %s6904_s1 = sld [smem:[#allocation33_spill]] }
 0x105   : > { %s1179_s2 = scalar_lea.vmem %s6894_s5, %s4627_s11  ;;  %v1219_v8 = vand.u32 15, %v6269_v3  ;;  %v1233_v21 = vand.u32 15, %v1207_v4  ;;  %1409 = vmatpush1.bf16.msra.mxu0 %v5274_v22  ;;  %4630 = vmatprep.subr.bf16.mxu1 %v5287_v46  ;;  %v5281_v56 = vld [vmem:[%s5920_s9 + $0x58] sm:$0xff]   ;;  %v5282_v57 = vld [vmem:[%s5920_s9 + $0x50] sm:$0xff]   ;;  %v5283_v58 = vld [vmem:[%s5920_s9 + $0x48] sm:$0xff]   ;;  %s6905_s20 = sld [smem:[#allocation34_spill]] }
 0x106   : > { %v1181_v5 = vld [vmem:[%s1179_s2] sm:$0xff]  ;;  %v1182_v6 = vld [vmem:[%s1179_s2 + $0x8] sm:$0xff]  ;;  %v1183_v7 = vld [vmem:[%s1179_s2 + $0x10] sm:$0xff]  ;;  %1410 = vmatprep.subr.bf16.mxu0 %v5901_v1  ;;  %v1226_v41 = vand.u32 15, %v1206_v37  ;;  %vm6327_vm5 = vcmp.eq.s32.totalorder %v1212_v40, 0  ;;  %s6906_s16 = sld [smem:[#allocation36_spill]] }
 0x107   : > { %v1186_v9 = vrot.slane %v1182_v6, 7  ;;  %v1197_v10 = vrot.slane %v1182_v6, 1  ;;  %v5258_v11 = vpack.i.bf16 %v1182_v6, %v1181_v5  ;;  %v1185_v12 = vrot.slane %v1181_v5, 7  ;;  %v1184_v13 = vld [vmem:[%s1179_s2 + $0x18] sm:$0xff]  ;;  %v5284_v59 = vld [vmem:[%s5920_s9 + $0x40] sm:$0xff]   ;;  %v5297_v17 = vld [vmem:[%s5930_s17 + $0x48] sm:$0xff]  }
 0x108   : > { %v1196_v14 = vrot.slane %v1181_v5, 1  ;;  %v1188_v15 = vrot.slane %v1184_v13, 7  ;;  %v1199_v16 = vrot.slane %v1184_v13, 1  ;;  %v5263_v18 = vpack.i.bf16 %v1184_v13, %v1183_v7  ;;  %4631 = vmatpush3.bf16.msra.mxu1 %v5288_v48  ;;  %v5293_v13 = vld [vmem:[%s5930_s17 + $0x58] sm:$0xff]   ;;  %v4375_v22 = vld [vmem:[%s5925_s13] ss:$0 sm:$0xff]  ;;  %vm4415_vm7 = vmneg %vm6327_vm5 }
 0x109   : > { %5259 = vrot.lane.b32.xlu0 %v5258_v11, %s5902_s23  ;;  %v1187_v19 = vrot.slane %v1183_v7, 7  ;;  %v6280_v20 = vsel %vm1191_vm1, %v1185_v12, %v1186_v9  ;;  %v1198_v23 = vrot.slane %v1183_v7, 1  ;;  %vm6292_vm2 = vcmp.eq.s32.totalorder %v1219_v8, 15  ;;  %1411 = vmatpush1.bf16.msra.mxu0 %v5275_v33  ;;  %v5291_v11 = vld [vmem:[%s5930_s17 + $0x60] sm:$0xff]   ;;  %vm4416_vm9 = vmpackc.low %vm5903_vm8, %vm4415_vm7  ;;  %s6915_s18 = sld [smem:[#allocation35_spill]]  ;;  %s5906_s5 = smov [#allocation22]  }
 0x10a   : > { %v6285_v24 = vsel %vm1191_vm1, %v1188_v15, %v1185_v12  ;;  %v1204_v25 = vsel %vm1200_vm0, %v1199_v16, %v1196_v14  ;;  %v1203_v26 = vsel %vm1200_vm0, %v1196_v14, %v1197_v10  ;;  %vm6312_vm4 = vcmp.eq.s32.totalorder %v1233_v21, 15  ;;  %1412 = vmatprep.subr.bf16.mxu0 %v5901_v1  ;;  %4632 = vmatprep.subr.bf16.mxu1 %v5289_v49  ;;  %v5292_v12 = vld [vmem:[%s5930_s17 + $0x20] sm:$0xff]   ;;  %v5294_v14 = vld [vmem:[%s5930_s17 + $0x18] sm:$0xff]   ;;  %vm4423_vm11 = vmneg %vm6292_vm2  ;;  %s6916_s4 = sld [smem:[#allocation37_spill]]  ;;  %s5766_s6 = sshll.u32 %s5906_s5, 4  ;;  %s5767_s6 = int_to_ptr.vmem [resolvable:$false] %s5766_s6 }
 0x10b   : > { %v6298_v28 = vsel %vm1191_vm1, %v1187_v19, %v1188_v15  ;;  %v6302_v29 = vsel %vm1191_vm1, %v1186_v9, %v1187_v19  ;;  %v1202_v30 = vsel %vm1200_vm0, %v1197_v10, %v1198_v23  ;;  %v1201_v31 = vsel %vm1200_vm0, %v1198_v23, %v1199_v16  ;;  %v5295_v15 = vld [vmem:[%s5930_s17 + $0x50] sm:$0xff]   ;;  %v5299_v19 = vld [vmem:[%s5930_s17 + $0x40] sm:$0xff]   ;;  %v5301_v21 = vld [vmem:[%s5930_s17 + $0xb8] sm:$0xff]   ;;  %s6917_s26 = sld [smem:[#allocation39_spill]]  ;;  %s5768_s8 = scalar_lea.vmem %s5767_s6, 64 }
 0x10c   : > { %v1269_v32 = vsel %vm6292_vm2, 0.0, %v1202_v30  ;;  %v1271_v36 = vsel %vm6312_vm4, 0.0, %v1204_v25  ;;  %vm6333_vm6 = vcmp.eq.s32.totalorder %v1226_v41, 0  ;;  %v1260_v51 = vsel %vm6327_vm5, 0.0, %v6285_v24  ;;  %4633 = vmatpush3.bf16.msra.mxu1 %v5290_v53  ;;  %v5296_v16 = vld [vmem:[%s5930_s17 + $0x10] sm:$0xff]   ;;  %vm4424_vm13 = vmpackc.low %vm4423_vm11, %vm5903_vm8  ;;  %s6918_s22 = sld [smem:[#allocation41_spill]] }
 0x10d   : > { %5264 = vrot.lane.b32.xlu0 %v5263_v18, %s5902_s23  ;;  %v1294_v34 = vpack.c.bf16 %v1269_v32, %v1203_v26  ;;  %v1296_v38 = vpack.c.bf16 %v1271_v36, %v1201_v31  ;;  %1413 = vmatpush1.bf16.msra.mxu0 %v5276_v39  ;;  %v1262_v52 = vsel %vm6333_vm6, 0.0, %v6302_v29  ;;  %v5298_v18 = vld [vmem:[%s5930_s17 + $0x8] sm:$0xff]   ;;  %vm4419_vm10 = vmneg %vm6333_vm6  ;;  %vm5905_vm2 = vmmov 0   ;;  %s6923_s7 = sld [smem:[#allocation40_spill]] }
 0x10e   : > { %1414 = vmatprep.subr.bf16.mxu0 %v5901_v1  ;;  %4634 = vmatprep.subr.bf16.mxu1 %v5291_v11  ;;  %vm4420_vm12 = vmpackc.low %vm5903_vm8, %vm4419_vm10  ;;  %s6924_s11 = sld [smem:[#allocation42_spill]] }
 0x10f   : > { %4388 = vmatprep.mubr.msk.bf16.mxu0 %vm1288_vm3, %v1294_v34  ;;  %vm4427_vm14 = vmneg %vm6312_vm4  ;;  %vm1799_vm4 = vcmask 261120   ;;  %s6925_s2 = sld [smem:[#allocation46_spill]] }
 0x110   : > { %4635 = vmatpush3.bf16.msra.mxu1 %v5292_v12  ;;  %vm4428_vm15 = vmpackc.low %vm4427_vm14, %vm5903_vm8 }
 0x111   : > { %1415 = vmatpush1.bf16.msra.mxu0 %v5277_v42  ;;  %4636 = vmatprep.subr.bf16.mxu1 %v5293_v13 }
 0x112   : > { %1416 = vmatprep.subr.bf16.mxu0 %v5901_v1 }
 0x114   : > { %4637 = vmatpush3.bf16.msra.mxu1 %v5294_v14 }
 0x115   : > { %1417 = vmatpush1.bf16.msra.mxu0 %v5278_v50  ;;  %4638 = vmatprep.subr.bf16.mxu1 %v5295_v15  ;;  %v5302_v50 = vld [vmem:[%s5930_s17 + $0xb0] sm:$0xff]  }
 0x116   : > { %1418 = vmatprep.subr.bf16.mxu0 %v5901_v1 }
 0x118   : > { %4639 = vmatpush3.bf16.msra.mxu1 %v5296_v16 }
 0x119   : > { %1419 = vmatpush1.bf16.msra.mxu0 %v5279_v54  ;;  %4640 = vmatprep.subr.bf16.mxu1 %v5297_v17  ;;  %v5303_v54 = vld [vmem:[%s5930_s17 + $0xa8] sm:$0xff]  }
 0x11a   : > { %1420 = vmatprep.subr.bf16.mxu0 %v5901_v1 }
 0x11c   : > { %4641 = vmatpush3.bf16.msra.mxu1 %v5298_v18  ;;  %v4390_v18 = vld [vmem:[%s6903_s24] ss:$0 sm:$0xff]  ;;  %s6931_s24 = sld [smem:[#allocation47_spill]] }
 0x11d   : > { %1421 = vmatpush1.bf16.msra.mxu0 %v5280_v55  ;;  %4642 = vmatprep.subr.bf16.mxu1 %v5299_v19 }
 0x11e   : > { %1430 = vmatprep.subr.bf16.mxu0 %v5901_v1 }
 0x121   : > { %1431 = vmatpush2.bf16.msra.mxu0 %v5281_v56 }
 0x122   : > { %1432 = vmatprep.subr.bf16.mxu0 %v5901_v1 }
 0x125   : > { %1433 = vmatpush2.bf16.msra.mxu0 %v5282_v57 }
 0x126   : > { %1434 = vmatprep.subr.bf16.mxu0 %v5901_v1 }
 0x129   : > { %1435 = vmatpush2.bf16.msra.mxu0 %v5283_v58 }
 0x12a   : > { %1436 = vmatprep.subr.bf16.mxu0 %v5901_v1 }
 0x12d   : > { %1437 = vmatpush2.bf16.msra.mxu0 %v5284_v59  ;;  %v5304_v59 = vld [vmem:[%s5930_s17 + $0xa0] sm:$0xff]  }
 0x17b   : > { %v5260_v60 = vpop.permute.xlu0 %5259 }
 0x17c   : > { %v5262_v61 = vunpack.i.h.bf16 %v5260_v60  ;;  %v5261_v62 = vunpack.i.l.bf16 %v5260_v60 }
 0x17e   : > { %v1289_v63 = vsel %vm1288_vm3, %v1260_v51, %v5261_v62  ;;  %v1290_v0 = vsel %vm1288_vm3, %v6280_v20, %v5262_v61  ;;  %v5300_v20 = vld [vmem:[%s5930_s17] sm:$0xff]   ;;  %v5305_v61 = vld [vmem:[%s5930_s17 + $0x98] sm:$0xff]   ;;  %v5306_v62 = vld [vmem:[%s5930_s17 + $0x90] sm:$0xff]  }
 0x17f   : > { %v1293_v4 = vpack.c.bf16 %v1290_v0, %v1289_v63  ;;  %v5265_v5 = vpop.permute.xlu0 %5264  ;;  %4643 = vmatpush3.bf16.msra.mxu1 %v5300_v20  ;;  %v5307_v63 = vld [vmem:[%s5930_s17 + $0x88] sm:$0xff]   ;;  %v5308_v0 = vld [vmem:[%s5930_s17 + $0x80] sm:$0xff]  }
 0x180   : > { %v5267_v6 = vunpack.i.h.bf16 %v5265_v5  ;;  %v5266_v7 = vunpack.i.l.bf16 %v5265_v5  ;;  %4825 = vmatprep.subr.bf16.mxu1 %v5301_v21 }
 0x181   : > { %1439 = vmatmul.mubr.bf16.vlgmr.msra.gmra.mxu0 %v1293_v4 }
 0x182   : > { %4389 = vmatprep.mubr.msk.bf16.mxu0 %vm1288_vm3, %v1296_v38  ;;  %v1291_v8 = vsel %vm1288_vm3, %v1262_v52, %v5266_v7  ;;  %v1292_v9 = vsel %vm1288_vm3, %v6298_v28, %v5267_v6 }
 0x183   : > { %v1295_v10 = vpack.c.bf16 %v1292_v9, %v1291_v8  ;;  %v5904_v8 = vmov 0.0  }
 0x184   : > { %4845 = vmatprep.subr.bf16.mxu0 %v5904_v8 }
 0x189   : > { %1447 = vmatmul.mubr.bf16.gmra.mxu0 %v1295_v10 }
 0x18a   : > { %4849 = vmatprep.mubr.msk.bf16.mxu0 %vm5905_vm2, %v5904_v8 }
 0x241   : > { %v1440_v23 = vpop.f32.mrf.mxu0 }
 0x242   : > { %v1441_v25 = vadd.f32 %v4375_v22, %v1440_v23 }
 0x243   : > { %v1442_v24 = vpop.f32.mrf.mxu0 }
 0x244   : > { %v6379_v30 = vmax.f32 %v1441_v25, 0.0 }
 0x245   : > { %v1443_v26 = vpop.f32.mrf.mxu0 }
 0x246   : > { %v1444_v28 = vadd.f32 %v4375_v22, %v1443_v26  ;;  %v1459_v42 = vrot.slane %v6379_v30, 7  ;;  %v1467_v56 = vrot.slane %v6379_v30, 1 }
 0x247   : > { %v1445_v29 = vpop.f32.mrf.mxu0 }
 0x248   : > { %v1456_v31 = vmax.f32 %v1444_v28, 0.0 }
 0x249   : > { %v1448_v32 = vpop.f32.mrf.mxu0 }
 0x24a   : > { %v1484_v33 = vpack.c.bf16 %v1456_v31, %v6379_v30  ;;  %v1449_v38 = vadd.f32 %v4375_v22, %v1448_v32  ;;  %v1460_v40 = vrot.slane %v1456_v31, 7  ;;  %v1468_v53 = vrot.slane %v1456_v31, 1 }
 0x24b   : > { %v1450_v34 = vpop.f32.mrf.mxu0 }
 0x24c   : > { %1720 = vmatprep.mubr.bf16.mxu1 %v1484_v33  ;;  %v1457_v44 = vmax.f32 %v1449_v38, 0.0  ;;  %v1465_v46 = vsel %vm1191_vm1, %v1459_v42, %v1460_v40  ;;  %v1473_v27 = vsel %vm1200_vm0, %v1467_v56, %v1468_v53 }
 0x24d   : > { %v1451_v36 = vpop.f32.mrf.mxu0 }
 0x24e   : > { %v1452_v37 = vadd.f32 %v4375_v22, %v1451_v36  ;;  %v1469_v52 = vrot.slane %v1457_v44, 1  ;;  %v1461_v45 = vrot.slane %v1457_v44, 7 }
 0x24f   : > { %v1453_v39 = vpop.f32.mrf.mxu0 }
 0x250   : > { %v1458_v41 = vmax.f32 %v1452_v37, 0.0  ;;  %v1472_v57 = vsel %vm1200_vm0, %v1468_v53, %v1469_v52  ;;  %v1464_v58 = vsel %vm1191_vm1, %v1460_v40, %v1461_v45 }
 0x251   : > { %v4425_v60 = vpack.c.bf16 %v1472_v57, %v1473_v27  ;;  %v5319_v57 = vld [vmem:[%s6905_s20 + $0x30] sm:$0xff]   ;;  %v5322_v27 = vld [vmem:[%s6905_s20 + $0x18] sm:$0xff]  }
 0x252   : > { %v1462_v43 = vrot.slane %v1458_v41, 7  ;;  %v1487_v51 = vpack.c.bf16 %v1458_v41, %v1457_v44  ;;  %v1470_v4 = vrot.slane %v1458_v41, 1  ;;  %v5309_v41 = vld [vmem:[#allocation2] sm:$0xff]   ;;  %v5312_v44 = vld [vmem:[%s6904_s1 + $0x28] sm:$0xff]  }
 0x254   : > { %v1466_v48 = vsel %vm1191_vm1, %v1462_v43, %v1459_v42  ;;  %v1463_v55 = vsel %vm1191_vm1, %v1461_v45, %v1462_v43  ;;  %v1471_v5 = vsel %vm1200_vm0, %v1469_v52, %v1470_v4  ;;  %v1474_v6 = vsel %vm1200_vm0, %v1470_v4, %v1467_v56  ;;  %v5310_v42 = vld [vmem:[%s6904_s1 + $0x38] sm:$0xff]   ;;  %v5311_v43 = vld [vmem:[%s6904_s1 + $0x30] sm:$0xff]   ;;  %v5329_v4 = vld [vmem:[%s6905_s20 + $0x40] sm:$0xff]  }
 0x255   : > { %v4417_v49 = vpack.c.bf16 %v1465_v46, %v1466_v48  ;;  %v4421_v47 = vpack.c.bf16 %v1463_v55, %v1464_v58  ;;  %v4429_v7 = vpack.c.bf16 %v1474_v6, %v1471_v5  ;;  %v5313_v46 = vld [vmem:[%s6904_s1 + $0x20] sm:$0xff]   ;;  %v5314_v48 = vld [vmem:[%s6904_s1 + $0x18] sm:$0xff]   ;;  %v5320_v58 = vld [vmem:[%s6905_s20 + $0x28] sm:$0xff]  }
 0x256   : > { %v5318_v56 = vld [vmem:[%s6905_s20 + $0x38] sm:$0xff]  }
 0x257   : > { %4418 = vmatmul.mubr.msk.bf16.vlgmr.msra.gmra.mxu1 %vm4416_vm9, %v4417_v49  ;;  %v5315_v49 = vld [vmem:[%s6904_s1 + $0x10] sm:$0xff]   ;;  %v5330_v5 = vld [vmem:[%s6906_s16 + $0x78] sm:$0xff]  }
 0x258   : > { %4826 = vmatpush3.bf16.msra.mxu1 %v5301_v21  ;;  %1728 = vmatprep.mubr.bf16.mxu1 %v1487_v51  ;;  %v5317_v51 = vld [vmem:[%s6904_s1] sm:$0xff]   ;;  %v5331_v6 = vld [vmem:[%s6906_s16 + $0x38] sm:$0xff]  }
 0x259   : > { %4827 = vmatprep.subr.bf16.mxu1 %v5302_v50 }
 0x25c   : > { %4828 = vmatpush3.bf16.msra.mxu1 %v5302_v50  ;;  %v5316_v50 = vld [vmem:[%s6904_s1 + $0x8] sm:$0xff]  }
 0x25d   : > { %4829 = vmatprep.subr.bf16.mxu1 %v5303_v54 }
 0x25f   : > { %4422 = vmatmul.mubr.msk.bf16.gmra.mxu1 %vm4420_vm12, %v4421_v47  ;;  %v5321_v47 = vld [vmem:[%s6905_s20 + $0x20] sm:$0xff]  }
 0x260   : > { %4830 = vmatpush3.bf16.msra.mxu1 %v5303_v54  ;;  %4841 = vmatprep.mubr.msk.bf16.mxu1 %vm4424_vm13, %v4425_v60  ;;  %v5324_v60 = vld [vmem:[%s6905_s20 + $0x8] sm:$0xff]  }
 0x261   : > { %4831 = vmatprep.subr.bf16.mxu1 %v5304_v59 }
 0x264   : > { %4832 = vmatpush3.bf16.msra.mxu1 %v5304_v59  ;;  %v5323_v59 = vld [vmem:[%s6905_s20 + $0x10] sm:$0xff]  }
 0x265   : > { %4833 = vmatprep.subr.bf16.mxu1 %v5305_v61 }
 0x268   : > { %4834 = vmatpush3.bf16.msra.mxu1 %v5305_v61  ;;  %v5325_v61 = vld [vmem:[%s6905_s20] sm:$0xff]  }
 0x269   : > { %4835 = vmatprep.subr.bf16.mxu1 %v5306_v62 }
 0x26c   : > { %4836 = vmatpush3.bf16.msra.mxu1 %v5306_v62  ;;  %v5326_v62 = vld [vmem:[%s6905_s20 + $0x58] sm:$0xff]  }
 0x26d   : > { %4837 = vmatprep.subr.bf16.mxu1 %v5307_v63 }
 0x270   : > { %4838 = vmatpush3.bf16.msra.mxu1 %v5307_v63  ;;  %v5327_v63 = vld [vmem:[%s6905_s20 + $0x50] sm:$0xff]  }
 0x271   : > { %4839 = vmatprep.subr.bf16.mxu1 %v5308_v0 }
 0x274   : > { %4840 = vmatpush3.bf16.msra.mxu1 %v5308_v0  ;;  %v5328_v0 = vld [vmem:[%s6905_s20 + $0x48] sm:$0xff]  }
 0x275   : > { %2108 = vmatprep.subr.bf16.mxu1 %v5901_v1 }
 0x277   : > { %4842 = vmatmul.mubr.msk.bf16.vlgmr.msra.gmra.mxu1 %vm4428_vm15, %v4429_v7  ;;  %v1969_v7 = vand.u32 7, %v6269_v3  ;;  %v5336_v3 = vld [vmem:[%s6906_s16 + $0x68] sm:$0xff]  }
 0x278   : > { %2109 = vmatpush1.bf16.msra.mxu1 %v5318_v56  ;;  %v5349_v56 = vld [vmem:[%s6906_s16 + $0x8] sm:$0xff]  }
 0x279   : > { %2110 = vmatprep.subr.bf16.mxu1 %v5901_v1  ;;  %vm6477_vm6 = vcmp.eq.s32.totalorder %v1969_v7, 7  ;;  %vm6505_vm8 = vcmp.eq.s32.totalorder %v1969_v7, 0 }
 0x27a   : > { %vm4480_vm9 = vmneg %vm6505_vm8 }
 0x27b   : > { %vm4485_vm11 = vmneg %vm6477_vm6 }
 0x27c   : > { %2111 = vmatpush1.bf16.msra.mxu1 %v5319_v57  ;;  %v5350_v57 = vld [vmem:[%s6906_s16 + $0x88] sm:$0xff]  }
 0x27d   : > { %2112 = vmatprep.subr.bf16.mxu1 %v5901_v1 }
 0x280   : > { %2113 = vmatpush1.bf16.msra.mxu1 %v5320_v58  ;;  %v5351_v58 = vld [vmem:[%s6906_s16 + $0x40] sm:$0xff]  }
 0x281   : > { %2114 = vmatprep.subr.bf16.mxu1 %v5901_v1 }
 0x284   : > { %2115 = vmatpush1.bf16.msra.mxu1 %v5321_v47  ;;  %v5352_v47 = vld [vmem:[%s6906_s16] sm:$0xff]  }
 0x285   : > { %2116 = vmatprep.subr.bf16.mxu1 %v5901_v1 }
 0x288   : > { %2117 = vmatpush1.bf16.msra.mxu1 %v5322_v27  ;;  %v5353_v27 = vld [vmem:[%s6906_s16 + $0x80] sm:$0xff]  }
 0x289   : > { %2118 = vmatprep.subr.bf16.mxu1 %v5901_v1 }
 0x28c   : > { %2119 = vmatpush1.bf16.msra.mxu1 %v5323_v59  ;;  %v4441_v59 = vld [vmem:[%s6915_s18] ss:$0 sm:$0xff]  ;;  %s6932_s18 = sld [smem:[#allocation48_spill]] }
 0x28d   : > { %2120 = vmatprep.subr.bf16.mxu1 %v5901_v1 }
 0x290   : > { %2121 = vmatpush1.bf16.msra.mxu1 %v5324_v60 }
 0x291   : > { %2122 = vmatprep.subr.bf16.mxu1 %v5901_v1 }
 0x294   : > { %2123 = vmatpush1.bf16.msra.mxu1 %v5325_v61 }
 0x295   : > { %2132 = vmatprep.subr.bf16.mxu1 %v5901_v1 }
 0x298   : > { %2133 = vmatpush2.bf16.msra.mxu1 %v5326_v62 }
 0x299   : > { %2134 = vmatprep.subr.bf16.mxu1 %v5901_v1 }
 0x29c   : > { %2135 = vmatpush2.bf16.msra.mxu1 %v5327_v63 }
 0x29d   : > { %2136 = vmatprep.subr.bf16.mxu1 %v5901_v1 }
 0x2a0   : > { %2137 = vmatpush2.bf16.msra.mxu1 %v5328_v0 }
 0x2a1   : > { %2138 = vmatprep.subr.bf16.mxu1 %v5901_v1 }
 0x2a4   : > { %2139 = vmatpush2.bf16.msra.mxu1 %v5329_v4 }
 0x2a5   : > { %4873 = vmatprep.subr.bf16.mxu1 %v5904_v8 }
 0x317   : > { %v4644_v35 = vpop.f32.mrf.mxu1 }
 0x319   : > { %v4645_v9 = vpop.f32.mrf.mxu1 }
 0x31a   : > { %v4646_v20 = vadd.f32 %v4645_v9, %v4644_v35  ;;  %v1962_v9 = vand.u32 7, %v6266_v2 }
 0x31b   : > { %v4647_v10 = vpop.f32.mrf.mxu1 }
 0x31c   : > { %v1723_v28 = vadd.f32 %v4646_v20, %v4390_v18  ;;  %vm6473_vm5 = vcmp.eq.s32.totalorder %v1962_v9, 7  ;;  %vm6501_vm7 = vcmp.eq.s32.totalorder %v1962_v9, 0 }
 0x31d   : > { %v4648_v11 = vpop.f32.mrf.mxu1  ;;  %vm4481_vm10 = vmneg %vm6501_vm7 }
 0x31e   : > { %v4649_v21 = vadd.f32 %v4648_v11, %v4647_v10  ;;  %v5333_v10 = vld [vmem:[%s6906_s16 + $0x70] sm:$0xff]   ;;  %vm4486_vm12 = vmneg %vm6473_vm5 }
 0x31f   : > { %v4650_v12 = vpop.f32.mrf.mxu1  ;;  %vm4482_vm13 = vmpackc.low %vm4480_vm9, %vm4481_vm10  ;;  %vm3061_vm9 = vcmask 64512   ;;  %vm3214_vm10 = vcmask 1047556  }
 0x320   : > { %v1726_v30 = vadd.f32 %v4649_v21, %v4390_v18  ;;  %vm4487_vm14 = vmpackc.low %vm4485_vm11, %vm4486_vm12 }
 0x321   : > { %v4651_v13 = vpop.f32.mrf.mxu1 }
 0x322   : > { %v4652_v16 = vadd.f32 %v4651_v13, %v4650_v12  ;;  %v5334_v12 = vld [vmem:[%s6906_s16 + $0x30] sm:$0xff]  }
 0x323   : > { %v4653_v14 = vpop.f32.mrf.mxu1 }
 0x324   : > { %v1731_v22 = vadd.f32 %v4652_v16, %v4390_v18 }
 0x325   : > { %v4654_v15 = vpop.f32.mrf.mxu1 }
 0x326   : > { %v4655_v17 = vadd.f32 %v4654_v15, %v4653_v14 }
 0x328   : > { %v1734_v25 = vadd.f32 %v4655_v17, %v4390_v18 }
 0x337   : > { %v4843_v19 = vpop.f32.mrf.mxu1 }
 0x338   : > { %v1780_v24 = vadd.f32 %v4843_v19, %v1731_v22  ;;  %v5337_v22 = vld [vmem:[%s6906_s16 + $0x28] sm:$0xff]  }
 0x339   : > { %v1771_v23 = vpop.f32.mrf.mxu1 }
 0x33a   : > { %v1788_v32 = vmax.f32 %v1780_v24, 0.0  ;;  %v1772_v33 = vadd.f32 %v1771_v23, %v1723_v28 }
 0x33b   : > { %v4844_v26 = vpop.f32.mrf.mxu1 }
 0x33c   : > { %v1783_v29 = vadd.f32 %v4844_v26, %v1734_v25  ;;  %v1786_v39 = vmax.f32 %v1772_v33, 0.0  ;;  %v5342_v33 = vld [vmem:[%s6906_s16 + $0x58] sm:$0xff]  }
 0x33d   : > { %v1774_v31 = vpop.f32.mrf.mxu1 }
 0x33e   : > { %v1789_v34 = vmax.f32 %v1783_v29, 0.0  ;;  %v1775_v36 = vadd.f32 %v1774_v31, %v1726_v30  ;;  %v5339_v30 = vld [vmem:[%s6906_s16 + $0x60] sm:$0xff]  }
 0x340   : > { %v1793_v37 = vpack.c.bf16 %v1789_v34, %v1788_v32  ;;  %v1787_v38 = vmax.f32 %v1775_v36, 0.0  ;;  %v5340_v32 = vld [vmem:[%s6906_s16 + $0x20] sm:$0xff]   ;;  %v5343_v34 = vld [vmem:[%s6906_s16 + $0x18] sm:$0xff]  }
 0x342   : > { %4846 = vmatpush3.bf16.msra.mxu0 %v1793_v37  ;;  %v1792_v40 = vpack.c.bf16 %v1787_v38, %v1786_v39  ;;  %v2449_v37 = vld [vmem:[#allocation5] sm:$0xf] }
 0x343   : > { %4847 = vmatprep.subr.bf16.mxu0 %v5904_v8 }
 0x346   : > { %4848 = vmatpush3.bf16.msra.mxu0 %v1792_v40 }
 0x347   : > { %4853 = vmatprep.subr.bf16.mxu0 %v5904_v8 }
 0x349   : > { %4850 = vmatmul.mubr.msk.bf16.vlgmr.msra.gmra.mxu0 %vm1799_vm4, %v5309_v41 }
 0x34a   : > { %4854 = vmatpush3.bf16.msra.mxu0 %v5310_v42  ;;  %4869 = vmatprep.mubr.msk.bf16.mxu0 %vm5905_vm2, %v5904_v8 }
 0x34b   : > { %4855 = vmatprep.subr.bf16.mxu0 %v5904_v8 }
 0x34e   : > { %4856 = vmatpush3.bf16.msra.mxu0 %v5311_v43 }
 0x34f   : > { %4857 = vmatprep.subr.bf16.mxu0 %v5904_v8 }
 0x352   : > { %4858 = vmatpush3.bf16.msra.mxu0 %v5312_v44 }
 0x353   : > { %4859 = vmatprep.subr.bf16.mxu0 %v5904_v8 }
 0x356   : > { %4860 = vmatpush3.bf16.msra.mxu0 %v5313_v46  ;;  %v5332_v46 = vld [vmem:[%s6906_s16 + $0xb8] sm:$0xff]  }
 0x357   : > { %4861 = vmatprep.subr.bf16.mxu0 %v5904_v8 }
 0x35a   : > { %4862 = vmatpush3.bf16.msra.mxu0 %v5314_v48 }
 0x35b   : > { %4863 = vmatprep.subr.bf16.mxu0 %v5904_v8 }
 0x35e   : > { %4864 = vmatpush3.bf16.msra.mxu0 %v5315_v49  ;;  %v5335_v49 = vld [vmem:[%s6906_s16 + $0xb0] sm:$0xff]  }
 0x35f   : > { %4865 = vmatprep.subr.bf16.mxu0 %v5904_v8 }
 0x362   : > { %4866 = vmatpush3.bf16.msra.mxu0 %v5316_v50  ;;  %v5338_v50 = vld [vmem:[%s6906_s16 + $0xa8] sm:$0xff]  }
 0x363   : > { %4867 = vmatprep.subr.bf16.mxu0 %v5904_v8 }
 0x366   : > { %4868 = vmatpush3.bf16.msra.mxu0 %v5317_v51  ;;  %v5341_v51 = vld [vmem:[%s6906_s16 + $0xa0] sm:$0xff]  }
 0x367   : > { %4678 = vmatprep.subr.bf16.mxu0 %v5330_v5 }
 0x409   : > { %v1837_v52 = vpop.f32.mrf.mxu0 }
 0x40b   : > { %v4851_v45 = vpop.f32.mrf.mxu0 }
 0x40c   : > { %v5345_v45 = vld [vmem:[%s6906_s16 + $0x50] sm:$0xff]  }
 0x40d   : > { %v1840_v53 = vpop.f32.mrf.mxu0 }
 0x40e   : > { %v1844_v54 = vpack.c.bf16 %v1840_v53, %v1837_v52  ;;  %v5344_v52 = vld [vmem:[%s6906_s16 + $0x98] sm:$0xff]   ;;  %v5346_v53 = vld [vmem:[%s6906_s16 + $0x10] sm:$0xff]  }
 0x40f   : > { %v4852_v55 = vpop.f32.mrf.mxu0 }
 0x410   : > { %4870 = vmatmul.mubr.bf16.vlgmr.msra.gmra.mxu0 %v1844_v54  ;;  %v5347_v54 = vld [vmem:[%s6906_s16 + $0x90] sm:$0xff]   ;;  %v5348_v55 = vld [vmem:[%s6906_s16 + $0x48] sm:$0xff]  }
 0x411   : > { %4679 = vmatpush3.bf16.msra.mxu0 %v5331_v6 }
 0x412   : > { %4680 = vmatprep.subr.bf16.mxu0 %v5333_v10 }
 0x415   : > { %4681 = vmatpush3.bf16.msra.mxu0 %v5334_v12 }
 0x416   : > { %4682 = vmatprep.subr.bf16.mxu0 %v5336_v3 }
 0x419   : > { %4683 = vmatpush3.bf16.msra.mxu0 %v5337_v22 }
 0x41a   : > { %4684 = vmatprep.subr.bf16.mxu0 %v5339_v30 }
 0x41d   : > { %4685 = vmatpush3.bf16.msra.mxu0 %v5340_v32 }
 0x41e   : > { %4686 = vmatprep.subr.bf16.mxu0 %v5342_v33 }
 0x421   : > { %4687 = vmatpush3.bf16.msra.mxu0 %v5343_v34 }
 0x422   : > { %4688 = vmatprep.subr.bf16.mxu0 %v5345_v45  ;;  %v5362_v45 = vld [vmem:[%s6917_s26 + $0x38] sm:$0xff]  }
 0x425   : > { %4689 = vmatpush3.bf16.msra.mxu0 %v5346_v53  ;;  %v5363_v53 = vld [vmem:[%s6917_s26 + $0x30] sm:$0xff]  }
 0x426   : > { %4690 = vmatprep.subr.bf16.mxu0 %v5348_v55  ;;  %v5365_v55 = vld [vmem:[%s6917_s26 + $0x20] sm:$0xff]  }
 0x429   : > { %4691 = vmatpush3.bf16.msra.mxu0 %v5349_v56  ;;  %v5366_v56 = vld [vmem:[%s6917_s26 + $0x18] sm:$0xff]  }
 0x42a   : > { %4692 = vmatprep.subr.bf16.mxu0 %v5351_v58  ;;  %v5368_v58 = vld [vmem:[%s6917_s26 + $0x8] sm:$0xff]  }
 0x42d   : > { %4693 = vmatpush3.bf16.msra.mxu0 %v5352_v47  ;;  %v5369_v47 = vld [vmem:[%s6917_s26] sm:$0xff]  }
 0x42e   : > { %4893 = vmatprep.subr.bf16.mxu0 %v5904_v8 }
 0x4d0   : > { %v1943_v35 = vpop.f32.mrf.mxu0 }
 0x4d1   : > { %v1950_v13 = vrot.slane %v1943_v35, 7  ;;  %v1954_v17 = vrot.slane %v1943_v35, 1 }
 0x4d2   : > { %v4871_v11 = vpop.f32.mrf.mxu0 }
 0x4d4   : > { %v1946_v14 = vpop.f32.mrf.mxu0 }
 0x4d5   : > { %v1951_v18 = vrot.slane %v1946_v14, 7  ;;  %v1955_v19 = vrot.slane %v1946_v14, 1  ;;  %v5268_v20 = vpack.i.bf16 %v1946_v14, %v1943_v35 }
 0x4d6   : > { %v4872_v21 = vpop.f32.mrf.mxu0 }
 0x4d7   : > { %v1952_v23 = vsel %vm1191_vm1, %v1950_v13, %v1951_v18  ;;  %v1953_v24 = vsel %vm1191_vm1, %v1951_v18, %v1950_v13  ;;  %v1956_v25 = vsel %vm1200_vm0, %v1954_v17, %v1955_v19  ;;  %v1957_v26 = vsel %vm1200_vm0, %v1955_v19, %v1954_v17  ;;  %5269 = vrot.lane.b32.xlu1 %v5268_v20, %s5902_s23  ;;  %v4455_v19 = vld [vmem:[%s6916_s4] ss:$0 sm:$0xff]  ;;  %s6933_s4 = sld [smem:[#allocation51_spill]] }
 0x4d8   : > { %v1988_v28 = vsel %vm6473_vm5, 0.0, %v1956_v25  ;;  %v1989_v29 = vsel %vm6477_vm6, 0.0, %v1957_v26  ;;  %v1984_v41 = vsel %vm6501_vm7, 0.0, %v1953_v24  ;;  %v1985_v42 = vsel %vm6505_vm8, 0.0, %v1952_v23 }
 0x4d9   : > { %v2001_v31 = vpack.c.bf16 %v1989_v29, %v1988_v28  ;;  %vm3065_vm8 = vcmask 1043456  }
 0x4db   : > { %4454 = vmatprep.mubr.msk.bf16.mxu1 %vm1288_vm3, %v2001_v31 }
 0x549   : > { %v5270_v38 = vpop.permute.xlu1 %5269 }
 0x54a   : > { %v5272_v39 = vunpack.i.h.bf16 %v5270_v38  ;;  %v5271_v40 = vunpack.i.l.bf16 %v5270_v38  ;;  %v5354_v38 = vld [vmem:[#allocation7 + $0x38] sm:$0xff]  }
 0x54c   : > { %v1998_v43 = vsel %vm1288_vm3, %v1984_v41, %v5271_v40  ;;  %v1999_v44 = vsel %vm1288_vm3, %v1985_v42, %v5272_v39  ;;  %v5355_v39 = vld [vmem:[#allocation7 + $0x30] sm:$0xff]   ;;  %v5356_v40 = vld [vmem:[#allocation7 + $0x28] sm:$0xff]   ;;  %v5357_v41 = vld [vmem:[#allocation7 + $0x20] sm:$0xff]  }
 0x54d   : > { %v2000_v48 = vpack.c.bf16 %v1999_v44, %v1998_v43  ;;  %v5358_v42 = vld [vmem:[#allocation7 + $0x18] sm:$0xff]   ;;  %v5359_v43 = vld [vmem:[#allocation7 + $0x10] sm:$0xff]   ;;  %v5360_v44 = vld [vmem:[#allocation7 + $0x8] sm:$0xff]  }
 0x54f   : > { %2141 = vmatmul.mubr.bf16.vlgmr.msra.gmra.mxu1 %v2000_v48 }
 0x550   : > { %4874 = vmatpush3.bf16.msra.mxu1 %v5332_v46  ;;  %4889 = vmatprep.mubr.msk.bf16.mxu1 %vm5905_vm2, %v5904_v8  ;;  %v5361_v46 = vld [vmem:[#allocation7] sm:$0xff]  }
 0x551   : > { %4875 = vmatprep.subr.bf16.mxu1 %v5904_v8 }
 0x554   : > { %4876 = vmatpush3.bf16.msra.mxu1 %v5335_v49 }
 0x555   : > { %4877 = vmatprep.subr.bf16.mxu1 %v5904_v8 }
 0x558   : > { %4878 = vmatpush3.bf16.msra.mxu1 %v5338_v50 }
 0x559   : > { %4879 = vmatprep.subr.bf16.mxu1 %v5904_v8 }
 0x55c   : > { %4880 = vmatpush3.bf16.msra.mxu1 %v5341_v51 }
 0x55d   : > { %4881 = vmatprep.subr.bf16.mxu1 %v5904_v8 }
 0x560   : > { %4882 = vmatpush3.bf16.msra.mxu1 %v5344_v52 }
 0x561   : > { %4883 = vmatprep.subr.bf16.mxu1 %v5904_v8 }
 0x564   : > { %4884 = vmatpush3.bf16.msra.mxu1 %v5347_v54  ;;  %v5364_v54 = vld [vmem:[%s6917_s26 + $0x28] sm:$0xff]  }
 0x565   : > { %4885 = vmatprep.subr.bf16.mxu1 %v5904_v8 }
 0x568   : > { %4886 = vmatpush3.bf16.msra.mxu1 %v5350_v57  ;;  %v5367_v57 = vld [vmem:[%s6917_s26 + $0x10] sm:$0xff]  }
 0x569   : > { %4887 = vmatprep.subr.bf16.mxu1 %v5904_v8 }
 0x56c   : > { %4888 = vmatpush3.bf16.msra.mxu1 %v5353_v27  ;;  %v5370_v27 = vld [vmem:[%s6917_s26 + $0x58] sm:$0xff]  }
 0x56d   : > { %2731 = vmatprep.subr.bf16.mxu1 %v5901_v1 }
 0x60f   : > { %v2142_v60 = vpop.f32.mrf.mxu1 }
 0x610   : > { %v2143_v61 = vadd.f32 %v4441_v59, %v2142_v60  ;;  %v5372_v60 = vld [vmem:[%s6917_s26 + $0x48] sm:$0xff]  }
 0x611   : > { %v2144_v62 = vpop.f32.mrf.mxu1 }
 0x612   : > { %v2149_v63 = vmax.f32 %v2143_v61, 0.0  ;;  %v5373_v61 = vld [vmem:[%s6917_s26 + $0x40] sm:$0xff]   ;;  %v5374_v62 = vld [vmem:[%s6918_s22 + $0x78] sm:$0xff]  }
 0x613   : > { %v2145_v0 = vpop.f32.mrf.mxu1 }
 0x614   : > { %v2146_v4 = vadd.f32 %v4441_v59, %v2145_v0  ;;  %v2151_v7 = vrot.slane %v2149_v63, 7  ;;  %v2155_v35 = vrot.slane %v2149_v63, 1  ;;  %v5371_v59 = vld [vmem:[%s6917_s26 + $0x50] sm:$0xff]  }
 0x615   : > { %v2147_v5 = vpop.f32.mrf.mxu1  ;;  %v5377_v0 = vld [vmem:[%s6918_s22 + $0x70] sm:$0xff]  }
 0x616   : > { %v2150_v6 = vmax.f32 %v2146_v4, 0.0  ;;  %v5378_v4 = vld [vmem:[%s6918_s22 + $0x30] sm:$0xff]   ;;  %v2606_v5 = vand.u32 3, %v6266_v2 }
 0x618   : > { %v2152_v9 = vrot.slane %v2150_v6, 7  ;;  %v2156_v10 = vrot.slane %v2150_v6, 1  ;;  %v2164_v11 = vpack.c.bf16 %v2150_v6, %v2149_v63  ;;  %v5375_v63 = vld [vmem:[%s6918_s22 + $0x38] sm:$0xff]   ;;  %v5380_v6 = vld [vmem:[%s6918_s22 + $0x68] sm:$0xff]   ;;  %vm6616_vm15 = vcmp.eq.s32.totalorder %v2606_v5, 0 }
 0x619   : > { %vm4538_vm4 = vmneg %vm6616_vm15 }
 0x61a   : > { %v2153_v12 = vsel %vm1191_vm1, %v2151_v7, %v2152_v9  ;;  %v2154_v13 = vsel %vm1191_vm1, %v2152_v9, %v2151_v7  ;;  %v2157_v14 = vsel %vm1200_vm0, %v2155_v35, %v2156_v10  ;;  %v2158_v16 = vsel %vm1200_vm0, %v2156_v10, %v2155_v35  ;;  %2397 = vmatprep.mubr.bf16.mxu0 %v2164_v11  ;;  %v5381_v7 = vld [vmem:[%s6918_s22 + $0x28] sm:$0xff]   ;;  %v5383_v10 = vld [vmem:[%s6918_s22 + $0x60] sm:$0xff]   ;;  %vm4540_vm6 = vmpackc.low %vm4538_vm4, %vm4538_vm4 }
 0x61b   : > { %v4483_v15 = vpack.c.bf16 %v2153_v12, %v2154_v13  ;;  %v4488_v3 = vpack.c.bf16 %v2158_v16, %v2157_v14  ;;  %vm2451_vm0 = vcmask 130048   ;;  %vm6602_vm1 = vcmp.eq.s32.totalorder %v2606_v5, 3  ;;  %v5384_v13 = vld [vmem:[%s6918_s22 + $0x20] sm:$0xff]   ;;  %v5400_v9 = vld [vmem:[#allocation10 + $0x28] sm:$0xff]  }
 0x61c   : > { %vm4543_vm5 = vmneg %vm6602_vm1  ;;  %vm3694_vm4 = vcmask 1041408  }
 0x61d   : > { %4484 = vmatmul.mubr.msk.bf16.vlgmr.msra.gmra.mxu0 %vm4482_vm13, %v4483_v15  ;;  %4890 = vmatmul.mubr.msk.bf16.vlgmr.msra.gmra.mxu1 %vm4487_vm14, %v4488_v3  ;;  %v5386_v3 = vld [vmem:[%s6918_s22 + $0x58] sm:$0xff]   ;;  %vm4545_vm7 = vmpackc.low %vm4543_vm5, %vm4543_vm5  ;;  %vm3690_vm5 = vcmask 31744  }
 0x61e   : > { %4895 = vmatprep.mubr.msk.bf16.mxu0 %vm5905_vm2, %v5904_v8  ;;  %2732 = vmatpush1.bf16.msra.mxu1 %v5362_v45 }
 0x61f   : > { %2733 = vmatprep.subr.bf16.mxu1 %v5901_v1 }
 0x622   : > { %2734 = vmatpush1.bf16.msra.mxu1 %v5363_v53 }
 0x623   : > { %2735 = vmatprep.subr.bf16.mxu1 %v5901_v1 }
 0x626   : > { %2736 = vmatpush1.bf16.msra.mxu1 %v5364_v54 }
 0x627   : > { %2737 = vmatprep.subr.bf16.mxu1 %v5901_v1 }
 0x62a   : > { %2738 = vmatpush1.bf16.msra.mxu1 %v5365_v55 }
 0x62b   : > { %2739 = vmatprep.subr.bf16.mxu1 %v5901_v1 }
 0x62e   : > { %2740 = vmatpush1.bf16.msra.mxu1 %v5366_v56  ;;  %v4513_v56 = vld [vmem:[%s6924_s11] ss:$0 sm:$0xff]  ;;  %s1172_s11 = sand.u32 1, %s5842_s10  }
 0x62f   : > { %2741 = vmatprep.subr.bf16.mxu1 %v5901_v1 }
 0x632   : > { %2742 = vmatpush1.bf16.msra.mxu1 %v5367_v57 }
 0x633   : > { %2743 = vmatprep.subr.bf16.mxu1 %v5901_v1 }
 0x636   : > { %2744 = vmatpush1.bf16.msra.mxu1 %v5368_v58 }
 0x637   : > { %2745 = vmatprep.subr.bf16.mxu1 %v5901_v1 }
 0x63a   : > { %2746 = vmatpush1.bf16.msra.mxu1 %v5369_v47 }
 0x63b   : > { %2755 = vmatprep.subr.bf16.mxu1 %v5901_v1 }
 0x63e   : > { %2756 = vmatpush2.bf16.msra.mxu1 %v5370_v27 }
 0x63f   : > { %2757 = vmatprep.subr.bf16.mxu1 %v5901_v1 }
 0x642   : > { %2758 = vmatpush2.bf16.msra.mxu1 %v5371_v59 }
 0x643   : > { %2759 = vmatprep.subr.bf16.mxu1 %v5901_v1 }
 0x646   : > { %2760 = vmatpush2.bf16.msra.mxu1 %v5372_v60 }
 0x647   : > { %2761 = vmatprep.subr.bf16.mxu1 %v5901_v1 }
 0x64a   : > { %2762 = vmatpush2.bf16.msra.mxu1 %v5373_v61 }
 0x64b   : > { %4919 = vmatprep.subr.bf16.mxu1 %v5904_v8 }
 0x6dd   : > { %v4694_v17 = vpop.f32.mrf.mxu0  ;;  %v2440_v18 = vpop.f32.mrf.mxu1 }
 0x6df   : > { %v4695_v20 = vpop.f32.mrf.mxu0  ;;  %v4891_v21 = vpop.f32.mrf.mxu1 }
 0x6e0   : > { %v4696_v22 = vadd.f32 %v4695_v20, %v4694_v17  ;;  %v5390_v20 = vld [vmem:[%s6918_s22 + $0x10] sm:$0xff]  }
 0x6e1   : > { %v4697_v23 = vpop.f32.mrf.mxu0  ;;  %v2443_v24 = vpop.f32.mrf.mxu1 }
 0x6e2   : > { %v2400_v25 = vadd.f32 %v4696_v22, %v4455_v19  ;;  %v5409_v22 = vld [vmem:[#allocation11 + $0x20] sm:$0xff]  }
 0x6e3   : > { %v4698_v26 = vpop.f32.mrf.mxu0  ;;  %v4892_v28 = vpop.f32.mrf.mxu1 }
 0x6e4   : > { %v4699_v29 = vadd.f32 %v4698_v26, %v4697_v23  ;;  %v2441_v30 = vadd.f32 %v2440_v18, %v2400_v25  ;;  %v5387_v18 = vld [vmem:[%s6918_s22 + $0x18] sm:$0xff]  }
 0x6e5   : > { %v5376_v26 = vld [vmem:[%s6918_s22 + $0xb8] sm:$0xff]  }
 0x6e6   : > { %v2403_v31 = vadd.f32 %v4699_v29, %v4455_v19  ;;  %v2447_v33 = vmax.f32 %v2441_v30, 0.0  ;;  %v5389_v19 = vld [vmem:[%s6918_s22 + $0x50] sm:$0xff]   ;;  %v5382_v30 = vld [vmem:[%s6918_s22 + $0xa8] sm:$0xff]  }
 0x6e7   : > { %v5379_v29 = vld [vmem:[%s6918_s22 + $0xb0] sm:$0xff]  }
 0x6e8   : > { %v2444_v32 = vadd.f32 %v2443_v24, %v2403_v31  ;;  %v5385_v31 = vld [vmem:[%s6918_s22 + $0xa0] sm:$0xff]  }
 0x6ea   : > { %v2448_v34 = vmax.f32 %v2444_v32, 0.0  ;;  %v5388_v32 = vld [vmem:[%s6918_s22 + $0x98] sm:$0xff]  }
 0x6ec   : > { %v2450_v36 = vpack.c.bf16 %v2448_v34, %v2447_v33  ;;  %v5391_v33 = vld [vmem:[%s6918_s22 + $0x90] sm:$0xff]   ;;  %v5392_v34 = vld [vmem:[%s6918_s22 + $0x48] sm:$0xff]  }
 0x6ee   : > { %4894 = vmatpush3.bf16.msra.mxu0 %v2450_v36  ;;  %v5393_v36 = vld [vmem:[%s6918_s22 + $0x8] sm:$0xff]  }
 0x6ef   : > { %4899 = vmatprep.subr.bf16.mxu0 %v5904_v8 }
 0x6f1   : > { %4896 = vmatmul.mubr.msk.bf16.vlgmr.msra.gmra.mxu0 %vm2451_vm0, %v2449_v37  ;;  %v5394_v37 = vld [vmem:[%s6918_s22 + $0x88] sm:$0xff]  }
 0x6f2   : > { %4900 = vmatpush3.bf16.msra.mxu0 %v5354_v38  ;;  %4915 = vmatprep.mubr.msk.bf16.mxu0 %vm5905_vm2, %v5904_v8  ;;  %v5395_v38 = vld [vmem:[%s6918_s22 + $0x40] sm:$0xff]  }
 0x6f3   : > { %4901 = vmatprep.subr.bf16.mxu0 %v5904_v8 }
 0x6f6   : > { %4902 = vmatpush3.bf16.msra.mxu0 %v5355_v39  ;;  %v5396_v39 = vld [vmem:[%s6918_s22] sm:$0xff]  }
 0x6f7   : > { %4903 = vmatprep.subr.bf16.mxu0 %v5904_v8 }
 0x6fa   : > { %4904 = vmatpush3.bf16.msra.mxu0 %v5356_v40  ;;  %v5397_v40 = vld [vmem:[%s6918_s22 + $0x80] sm:$0xff]  }
 0x6fb   : > { %4905 = vmatprep.subr.bf16.mxu0 %v5904_v8 }
 0x6fe   : > { %4906 = vmatpush3.bf16.msra.mxu0 %v5357_v41  ;;  %v4499_v41 = vld [vmem:[%s6923_s7] ss:$0 sm:$0xff]  ;;  %s6934_s7 = sld [smem:[#allocation52_spill]] }
 0x6ff   : > { %4907 = vmatprep.subr.bf16.mxu0 %v5904_v8 }
 0x702   : > { %4908 = vmatpush3.bf16.msra.mxu0 %v5358_v42 }
 0x703   : > { %4909 = vmatprep.subr.bf16.mxu0 %v5904_v8 }
 0x706   : > { %4910 = vmatpush3.bf16.msra.mxu0 %v5359_v43 }
 0x707   : > { %4911 = vmatprep.subr.bf16.mxu0 %v5904_v8 }
 0x70a   : > { %4912 = vmatpush3.bf16.msra.mxu0 %v5360_v44 }
 0x70b   : > { %4913 = vmatprep.subr.bf16.mxu0 %v5904_v8 }
 0x70e   : > { %4914 = vmatpush3.bf16.msra.mxu0 %v5361_v46 }
 0x70f   : > { %4720 = vmatprep.subr.bf16.mxu0 %v5374_v62 }
 0x7b1   : > { %v2489_v48 = vpop.f32.mrf.mxu0 }
 0x7b2   : > { %v2495_v49 = vpack.c.bf16 %v2489_v48, %v2489_v48 }
 0x7b3   : > { %v4897_v50 = vpop.f32.mrf.mxu0 }
 0x7b4   : > { %4916 = vmatmul.mubr.bf16.vlgmr.msra.gmra.mxu0 %v2495_v49 }
 0x7b5   : > { %v2492_v51 = vpop.f32.mrf.mxu0  ;;  %4721 = vmatpush3.bf16.msra.mxu0 %v5375_v63 }
 0x7b6   : > { %4722 = vmatprep.subr.bf16.mxu0 %v5377_v0 }
 0x7b7   : > { %v4898_v52 = vpop.f32.mrf.mxu0 }
 0x7b9   : > { %4723 = vmatpush3.bf16.msra.mxu0 %v5378_v4 }
 0x7ba   : > { %4724 = vmatprep.subr.bf16.mxu0 %v5380_v6  ;;  %v3059_v6 = vld [vmem:[#allocation8] sm:$0x3] }
 0x7bd   : > { %4725 = vmatpush3.bf16.msra.mxu0 %v5381_v7  ;;  %v5398_v7 = vld [vmem:[#allocation10 + $0x38] sm:$0xff]  }
 0x7be   : > { %4726 = vmatprep.subr.bf16.mxu0 %v5383_v10  ;;  %v5401_v10 = vld [vmem:[#allocation10 + $0x20] sm:$0xff]  }
 0x7c1   : > { %4727 = vmatpush3.bf16.msra.mxu0 %v5384_v13  ;;  %v5404_v13 = vld [vmem:[#allocation10 + $0x8] sm:$0xff]  }
 0x7c2   : > { %4728 = vmatprep.subr.bf16.mxu0 %v5386_v3 }
 0x7c5   : > { %4729 = vmatpush3.bf16.msra.mxu0 %v5387_v18 }
 0x7c6   : > { %4730 = vmatprep.subr.bf16.mxu0 %v5389_v19  ;;  %v5406_v19 = vld [vmem:[#allocation11 + $0x38] sm:$0xff]  }
 0x7c9   : > { %4731 = vmatpush3.bf16.msra.mxu0 %v5390_v20  ;;  %v5407_v20 = vld [vmem:[#allocation11 + $0x30] sm:$0xff]  }
 0x7ca   : > { %4732 = vmatprep.subr.bf16.mxu0 %v5392_v34  ;;  %v5420_v34 = vld [vmem:[%s6925_s2 + $0x70] sm:$0xff]  }
 0x7cd   : > { %4733 = vmatpush3.bf16.msra.mxu0 %v5393_v36  ;;  %v5421_v36 = vld [vmem:[%s6925_s2 + $0x30] sm:$0xff]  }
 0x7ce   : > { %4734 = vmatprep.subr.bf16.mxu0 %v5395_v38  ;;  %v5423_v38 = vld [vmem:[%s6925_s2 + $0x28] sm:$0xff]  }
 0x7d1   : > { %4735 = vmatpush3.bf16.msra.mxu0 %v5396_v39  ;;  %v5424_v39 = vld [vmem:[%s6925_s2 + $0x60] sm:$0xff]  }
 0x7d2   : > { %4939 = vmatprep.subr.bf16.mxu0 %v5904_v8 }
 0x874   : > { %v2594_v35 = vpop.f32.mrf.mxu0 }
 0x875   : > { %v2601_v11 = vrot.slane %v2594_v35, 1  ;;  %2619 = vrot.lane.b32.xlu1 %v2594_v35, %s5902_s23  ;;  %v2600_v21 = vrot.slane %v2594_v35, 7  ;;  %v5399_v35 = vld [vmem:[#allocation10 + $0x30] sm:$0xff]  }
 0x876   : > { %v4917_v12 = vpop.f32.mrf.mxu0 }
 0x877   : > { %v2617_v14 = vsel %vm6602_vm1, 0.0, %v2601_v11  ;;  %v2615_v24 = vsel %vm6616_vm15, 0.0, %v2600_v21  ;;  %v5402_v11 = vld [vmem:[#allocation10 + $0x18] sm:$0xff]   ;;  %v5403_v12 = vld [vmem:[#allocation10 + $0x10] sm:$0xff]   ;;  %v5408_v21 = vld [vmem:[#allocation11 + $0x28] sm:$0xff]  }
 0x878   : > { %v2624_v16 = vpack.c.bf16 %v2617_v14, %v2617_v14  ;;  %v2597_v15 = vpop.f32.mrf.mxu0  ;;  %v5405_v14 = vld [vmem:[#allocation10] sm:$0xff]  }
 0x87a   : > { %v4918_v17 = vpop.f32.mrf.mxu0  ;;  %4512 = vmatprep.mubr.msk.bf16.mxu1 %vm1288_vm3, %v2624_v16 }
 0x8e7   : > { %v2620_v23 = vpop.permute.xlu1 %2619 }
 0x8e8   : > { %v2622_v25 = vsel %vm1288_vm3, %v2615_v24, %v2620_v23  ;;  %v5410_v23 = vld [vmem:[#allocation11 + $0x18] sm:$0xff]   ;;  %v5411_v24 = vld [vmem:[#allocation11 + $0x10] sm:$0xff]  }
 0x8e9   : > { %v2623_v28 = vpack.c.bf16 %v2622_v25, %v2622_v25  ;;  %v5412_v25 = vld [vmem:[#allocation11 + $0x8] sm:$0xff]  }
 0x8eb   : > { %2764 = vmatmul.mubr.bf16.vlgmr.msra.gmra.mxu1 %v2623_v28  ;;  %v5414_v28 = vld [vmem:[#allocation11 + $0x58] sm:$0xff]  }
 0x8ec   : > { %4920 = vmatpush3.bf16.msra.mxu1 %v5376_v26  ;;  %4935 = vmatprep.mubr.msk.bf16.mxu1 %vm5905_vm2, %v5904_v8  ;;  %v5413_v26 = vld [vmem:[#allocation11] sm:$0xff]  }
 0x8ed   : > { %4921 = vmatprep.subr.bf16.mxu1 %v5904_v8 }
 0x8f0   : > { %4922 = vmatpush3.bf16.msra.mxu1 %v5379_v29  ;;  %v5415_v29 = vld [vmem:[#allocation11 + $0x50] sm:$0xff]  }
 0x8f1   : > { %4923 = vmatprep.subr.bf16.mxu1 %v5904_v8 }
 0x8f4   : > { %4924 = vmatpush3.bf16.msra.mxu1 %v5382_v30  ;;  %v5416_v30 = vld [vmem:[#allocation11 + $0x48] sm:$0xff]  }
 0x8f5   : > { %4925 = vmatprep.subr.bf16.mxu1 %v5904_v8 }
 0x8f8   : > { %4926 = vmatpush3.bf16.msra.mxu1 %v5385_v31  ;;  %v5417_v31 = vld [vmem:[#allocation11 + $0x40] sm:$0xff]  }
 0x8f9   : > { %4927 = vmatprep.subr.bf16.mxu1 %v5904_v8 }
 0x8fc   : > { %4928 = vmatpush3.bf16.msra.mxu1 %v5388_v32  ;;  %v5418_v32 = vld [vmem:[%s6925_s2 + $0x78] sm:$0xff]  }
 0x8fd   : > { %4929 = vmatprep.subr.bf16.mxu1 %v5904_v8 }
 0x900   : > { %4930 = vmatpush3.bf16.msra.mxu1 %v5391_v33  ;;  %v5419_v33 = vld [vmem:[%s6925_s2 + $0x38] sm:$0xff]  }
 0x901   : > { %4931 = vmatprep.subr.bf16.mxu1 %v5904_v8 }
 0x904   : > { %4932 = vmatpush3.bf16.msra.mxu1 %v5394_v37  ;;  %v5422_v37 = vld [vmem:[%s6925_s2 + $0x68] sm:$0xff]  }
 0x905   : > { %4933 = vmatprep.subr.bf16.mxu1 %v5904_v8 }
 0x908   : > { %4934 = vmatpush3.bf16.msra.mxu1 %v5397_v40 }
 0x909   : > { %3353 = vmatprep.subr.bf16.mxu1 %v5901_v1 }
 0x9ab   : > { %v2765_v42 = vpop.f32.mrf.mxu1 }
 0x9ac   : > { %v2766_v43 = vadd.f32 %v4499_v41, %v2765_v42  ;;  %v3223_v42 = vand.u32 1, %v6266_v2 }
 0x9ad   : > { %v2767_v44 = vpop.f32.mrf.mxu1 }
 0x9ae   : > { %v2771_v46 = vmax.f32 %v2766_v43, 0.0  ;;  %v5425_v43 = vld [vmem:[%s6925_s2 + $0x20] sm:$0xff]   ;;  %vm6689_vm11 = vcmp.eq.s32.totalorder %v3223_v42, 1  ;;  %vm6697_vm12 = vcmp.eq.s32.totalorder %v3223_v42, 0 }
 0x9af   : > { %v2768_v48 = vpop.f32.mrf.mxu1  ;;  %vm4596_vm13 = vmneg %vm6697_vm12 }
 0x9b0   : > { %v2772_v49 = vrot.slane %v2771_v46, 7  ;;  %v2773_v50 = vrot.slane %v2771_v46, 1  ;;  %v2777_v51 = vpack.c.bf16 %v2771_v46, %v2771_v46  ;;  %v5426_v46 = vld [vmem:[%s6925_s2 + $0x58] sm:$0xff]   ;;  %vm4598_vm14 = vmpackc.low %vm4596_vm13, %vm4596_vm13 }
 0x9b1   : > { %v2769_v52 = vpop.f32.mrf.mxu1  ;;  %vm4601_vm1 = vmneg %vm6689_vm11 }
 0x9b2   : > { %v4541_v45 = vpack.c.bf16 %v2772_v49, %v2772_v49  ;;  %v4546_v53 = vpack.c.bf16 %v2773_v50, %v2773_v50  ;;  %3010 = vmatprep.mubr.bf16.mxu0 %v2777_v51  ;;  %vm4603_vm15 = vmpackc.low %vm4601_vm1, %vm4601_vm1  ;;  %v5448_v52 = vld [vmem:[#allocation13 + $0x8] sm:$0xff]  }
 0x9b4   : > { %4542 = vmatmul.mubr.msk.bf16.vlgmr.msra.gmra.mxu0 %vm4540_vm6, %v4541_v45  ;;  %4936 = vmatmul.mubr.msk.bf16.vlgmr.msra.gmra.mxu1 %vm4545_vm7, %v4546_v53  ;;  %v5427_v45 = vld [vmem:[%s6925_s2 + $0x18] sm:$0xff]  }
 0x9b5   : > { %4941 = vmatprep.mubr.msk.bf16.mxu0 %vm5905_vm2, %v5904_v8  ;;  %3354 = vmatpush1.bf16.msra.mxu1 %v5406_v19  ;;  %v5436_v19 = vld [vmem:[%s6925_s2 + $0xa8] sm:$0xff]  }
 0x9b6   : > { %3355 = vmatprep.subr.bf16.mxu1 %v5901_v1 }
 0x9b9   : > { %3356 = vmatpush1.bf16.msra.mxu1 %v5407_v20  ;;  %v5437_v20 = vld [vmem:[%s6925_s2 + $0xa0] sm:$0xff]  }
 0x9ba   : > { %3357 = vmatprep.subr.bf16.mxu1 %v5901_v1 }
 0x9bd   : > { %3358 = vmatpush1.bf16.msra.mxu1 %v5408_v21  ;;  %v5438_v21 = vld [vmem:[%s6925_s2 + $0x98] sm:$0xff]  }
 0x9be   : > { %3359 = vmatprep.subr.bf16.mxu1 %v5901_v1 }
 0x9c1   : > { %3360 = vmatpush1.bf16.msra.mxu1 %v5409_v22  ;;  %v5439_v22 = vld [vmem:[%s6925_s2 + $0x90] sm:$0xff]  }
 0x9c2   : > { %3361 = vmatprep.subr.bf16.mxu1 %v5901_v1 }
 0x9c5   : > { %3362 = vmatpush1.bf16.msra.mxu1 %v5410_v23  ;;  %v5440_v23 = vld [vmem:[%s6925_s2 + $0x88] sm:$0xff]  }
 0x9c6   : > { %3363 = vmatprep.subr.bf16.mxu1 %v5901_v1 }
 0x9c9   : > { %3364 = vmatpush1.bf16.msra.mxu1 %v5411_v24  ;;  %v5441_v24 = vld [vmem:[%s6925_s2 + $0x80] sm:$0xff]  }
 0x9ca   : > { %3365 = vmatprep.subr.bf16.mxu1 %v5901_v1 }
 0x9cd   : > { %3366 = vmatpush1.bf16.msra.mxu1 %v5412_v25 }
 0x9ce   : > { %3367 = vmatprep.subr.bf16.mxu1 %v5901_v1 }
 0x9d1   : > { %3368 = vmatpush1.bf16.msra.mxu1 %v5413_v26 }
 0x9d2   : > { %3377 = vmatprep.subr.bf16.mxu1 %v5901_v1 }
 0x9d5   : > { %3378 = vmatpush2.bf16.msra.mxu1 %v5414_v28 }
 0x9d6   : > { %3379 = vmatprep.subr.bf16.mxu1 %v5901_v1 }
 0x9d9   : > { %3380 = vmatpush2.bf16.msra.mxu1 %v5415_v29 }
 0x9da   : > { %3381 = vmatprep.subr.bf16.mxu1 %v5901_v1 }
 0x9dd   : > { %3382 = vmatpush2.bf16.msra.mxu1 %v5416_v30 }
 0x9de   : > { %3383 = vmatprep.subr.bf16.mxu1 %v5901_v1 }
 0x9e1   : > { %3384 = vmatpush2.bf16.msra.mxu1 %v5417_v31 }
 0x9e2   : > { %4985 = vmatprep.subr.bf16.mxu1 %v5904_v8 }
 0xa74   : > { %v4736_v54 = vpop.f32.mrf.mxu0  ;;  %v3052_v55 = vpop.f32.mrf.mxu1 }
 0xa76   : > { %v4737_v57 = vpop.f32.mrf.mxu0  ;;  %v4937_v58 = vpop.f32.mrf.mxu1 }
 0xa77   : > { %v4738_v47 = vadd.f32 %v4737_v57, %v4736_v54 }
 0xa78   : > { %v4739_v27 = vpop.f32.mrf.mxu0  ;;  %v3055_v59 = vpop.f32.mrf.mxu1 }
 0xa79   : > { %v3013_v60 = vadd.f32 %v4738_v47, %v4513_v56  ;;  %v5428_v59 = vld [vmem:[%s6925_s2 + $0x50] sm:$0xff]   ;;  %v3846_v56 = vld [vmem:[#allocation14 + $0x18] sm:$0xff] }
 0xa7a   : > { %v4740_v61 = vpop.f32.mrf.mxu0  ;;  %v4938_v62 = vpop.f32.mrf.mxu1 }
 0xa7b   : > { %v3053_v63 = vadd.f32 %v3052_v55, %v3013_v60  ;;  %v5429_v60 = vld [vmem:[%s6925_s2 + $0x10] sm:$0xff]   ;;  %v5430_v61 = vld [vmem:[%s6925_s2 + $0x48] sm:$0xff]  }
 0xa7c   : > { %v5431_v62 = vld [vmem:[%s6925_s2 + $0x8] sm:$0xff]  }
 0xa7d   : > { %v3058_v0 = vmax.f32 %v3053_v63, 0.0  ;;  %v5432_v63 = vld [vmem:[%s6925_s2 + $0x40] sm:$0xff]  }
 0xa7f   : > { %v3060_v4 = vpack.c.bf16 %v3058_v0, %v3058_v0  ;;  %v5433_v0 = vld [vmem:[%s6925_s2] sm:$0xff]  }
 0xa81   : > { %v3067_v5 = vsel %vm3065_vm8, %v3060_v4, 0 }
 0xa82   : > { %4940 = vmatpush3.bf16.msra.mxu0 %v3067_v5 }
 0xa83   : > { %4945 = vmatprep.subr.bf16.mxu0 %v5904_v8 }
 0xa85   : > { %4942 = vmatmul.mubr.msk.bf16.vlgmr.msra.gmra.mxu0 %vm3061_vm9, %v3059_v6 }
 0xa86   : > { %4946 = vmatpush3.bf16.msra.mxu0 %v5398_v7  ;;  %4961 = vmatprep.mubr.msk.bf16.mxu0 %vm5905_vm2, %v5904_v8 }
 0xa87   : > { %4947 = vmatprep.subr.bf16.mxu0 %v5904_v8 }
 0xa8a   : > { %4948 = vmatpush3.bf16.msra.mxu0 %v5399_v35 }
 0xa8b   : > { %4949 = vmatprep.subr.bf16.mxu0 %v5904_v8 }
 0xa8e   : > { %4950 = vmatpush3.bf16.msra.mxu0 %v5400_v9 }
 0xa8f   : > { %4951 = vmatprep.subr.bf16.mxu0 %v5904_v8 }
 0xa92   : > { %4952 = vmatpush3.bf16.msra.mxu0 %v5401_v10 }
 0xa93   : > { %4953 = vmatprep.subr.bf16.mxu0 %v5904_v8 }
 0xa96   : > { %4954 = vmatpush3.bf16.msra.mxu0 %v5402_v11 }
 0xa97   : > { %4955 = vmatprep.subr.bf16.mxu0 %v5904_v8 }
 0xa9a   : > { %4956 = vmatpush3.bf16.msra.mxu0 %v5403_v12 }
 0xa9b   : > { %4957 = vmatprep.subr.bf16.mxu0 %v5904_v8 }
 0xa9e   : > { %4958 = vmatpush3.bf16.msra.mxu0 %v5404_v13 }
 0xa9f   : > { %4959 = vmatprep.subr.bf16.mxu0 %v5904_v8 }
 0xaa2   : > { %4960 = vmatpush3.bf16.msra.mxu0 %v5405_v14 }
 0xaa3   : > { %4762 = vmatprep.subr.bf16.mxu0 %v5418_v32 }
 0xb45   : > { %v3103_v16 = vpop.f32.mrf.mxu0 }
 0xb46   : > { %v3109_v15 = vpack.c.bf16 %v3103_v16, %v3103_v16 }
 0xb47   : > { %v4943_v3 = vpop.f32.mrf.mxu0 }
 0xb48   : > { %4962 = vmatmul.mubr.bf16.vlgmr.msra.gmra.mxu0 %v3109_v15  ;;  %v5434_v3 = vld [vmem:[%s6925_s2 + $0xb8] sm:$0xff]  }
 0xb49   : > { %v3106_v17 = vpop.f32.mrf.mxu0  ;;  %4763 = vmatpush3.bf16.msra.mxu0 %v5419_v33  ;;  %v4571_v33 = vld [vmem:[%s6931_s24] ss:$0 sm:$0xff]  ;;  %s4624_s24 = sshll.u32 %s6103_s0, 5 }
 0xb4a   : > { %4764 = vmatprep.subr.bf16.mxu0 %v5420_v34 }
 0xb4b   : > { %v4944_v18 = vpop.f32.mrf.mxu0 }
 0xb4c   : > { %v5435_v18 = vld [vmem:[%s6925_s2 + $0xb0] sm:$0xff]  }
 0xb4d   : > { %4765 = vmatpush3.bf16.msra.mxu0 %v5421_v36 }
 0xb4e   : > { %4766 = vmatprep.subr.bf16.mxu0 %v5422_v37 }
 0xb51   : > { %4767 = vmatpush3.bf16.msra.mxu0 %v5423_v38 }
 0xb52   : > { %4768 = vmatprep.subr.bf16.mxu0 %v5424_v39 }
 0xb55   : > { %4769 = vmatpush3.bf16.msra.mxu0 %v5425_v43  ;;  %v3688_v43 = vld [vmem:[%s6932_s18] sm:$0x1] }
 0xb56   : > { %4770 = vmatprep.subr.bf16.mxu0 %v5426_v46  ;;  %v5443_v46 = vld [vmem:[#allocation13 + $0x30] sm:$0xff]  }
 0xb59   : > { %4771 = vmatpush3.bf16.msra.mxu0 %v5427_v45  ;;  %v5449_v45 = vld [vmem:[#allocation13] sm:$0xff]  }
 0xb5a   : > { %4772 = vmatprep.subr.bf16.mxu0 %v5428_v59 }
 0xb5d   : > { %4773 = vmatpush3.bf16.msra.mxu0 %v5429_v60 }
 0xb5e   : > { %4774 = vmatprep.subr.bf16.mxu0 %v5430_v61  ;;  %v3844_v61 = vld [vmem:[#allocation14 + $0x8] sm:$0xff] }
 0xb61   : > { %4775 = vmatpush3.bf16.msra.mxu0 %v5431_v62  ;;  %v3843_v62 = vld [vmem:[#allocation14] sm:$0xff] }
 0xb62   : > { %4776 = vmatprep.subr.bf16.mxu0 %v5432_v63  ;;  %v3931_v63 = vld [vmem:[#allocation16 + $0x38] sm:$0xff] }
 0xb65   : > { %4777 = vmatpush3.bf16.msra.mxu0 %v5433_v0  ;;  %v3930_v0 = vld [vmem:[#allocation16 + $0x30] sm:$0xff] }
 0xb66   : > { %4965 = vmatprep.subr.bf16.mxu0 %v5904_v8 }
 0xc08   : > { %v3208_v40 = vpop.f32.mrf.mxu0 }
 0xc09   : > { %v3215_v1 = vrot.slane %v3208_v40, 4  ;;  %3241 = vrot.lane.b32.xlu0 %v3208_v40, %s5902_s23  ;;  %s6930_s23 = sld [smem:[#allocation45_spill]] }
 0xc0a   : > { %v4963_v41 = vpop.f32.mrf.mxu0 }
 0xc0b   : > { %v3216_v44 = vsel %vm3214_vm10, %v3215_v1, %v3208_v40 }
 0xc0c   : > { %v3217_v48 = vrot.slane %v3216_v44, 4  ;;  %v3211_v49 = vpop.f32.mrf.mxu0  ;;  %v5442_v44 = vld [vmem:[#allocation13 + $0x38] sm:$0xff]  }
 0xc0d   : > { %v5445_v49 = vld [vmem:[#allocation13 + $0x20] sm:$0xff]  }
 0xc0e   : > { %v3218_v50 = vsel %vm3214_vm10, %v3217_v48, %v3208_v40  ;;  %v4964_v51 = vpop.f32.mrf.mxu0  ;;  %v5444_v48 = vld [vmem:[#allocation13 + $0x28] sm:$0xff]  }
 0xc0f   : > { %v3237_v2 = vrot.slane %v3218_v50, 1  ;;  %v3233_v55 = vrot.slane %v3218_v50, 3  ;;  %v4557_v4 = vld [vmem:[%s6930_s23] ss:$0 sm:$0xff]  ;;  %v5446_v50 = vld [vmem:[#allocation13 + $0x18] sm:$0xff]   ;;  %s4372_s23 = sshll.u32 %s1172_s11, 1 }
 0xc10   : > { %v5447_v51 = vld [vmem:[#allocation13 + $0x10] sm:$0xff]   ;;  %s1174_s18 = scalar_lea.vmem [#allocation22], %s4372_s23 }
 0xc11   : > { %v3239_v53 = vsel %vm6689_vm11, 0.0, %v3237_v2  ;;  %v3235_v58 = vsel %vm6697_vm12, 0.0, %v3233_v55  ;;  %v3850_v2 = vld [vmem:[#allocation14 + $0x38] sm:$0xff]  ;;  %v3847_v55 = vld [vmem:[#allocation14 + $0x20] sm:$0xff]  ;;  %s4135_s1 = sshll.u32 %s1174_s18, 4  ;;  %s4136_s1 = int_to_ptr.vmem [resolvable:$true] %s4135_s1 }
 0xc12   : > { %v3246_v54 = vpack.c.bf16 %v3239_v53, %v3239_v53  ;;  %v3849_v53 = vld [vmem:[#allocation14 + $0x30] sm:$0xff]  ;;  %s5762_s2 = scalar_lea.vmem %s4136_s1, 32  ;;  %p5769_p12 = scmp.lt.s32.totalorder %s4136_s1, %s5767_s6 }
 0xc13   : > { %p5763_p2 = scmp.ne.s32.totalorder %s4136_s1, %s5762_s2  ;;  %p5770_p7 = scmp.lt.s32.totalorder %s5768_s8, %s5762_s2 }
 0xc14   : > { %4570 = vmatprep.mubr.msk.bf16.mxu1 %vm1288_vm3, %v3246_v54  ;;  %v3848_v54 = vld [vmem:[#allocation14 + $0x28] sm:$0xff] }
 0xc15   : > { %p5764_p3 = pnand %p5763_p2, %p6935_p13  ;;  %p5771_p8 = por %p5770_p7, %p5769_p12 }
 0xc17   : > { %p5765_p4 = pneg %p5764_p3 }
 0xc19   : > { %p5772_p11 = pnand %p5771_p8, %p5765_p4 }
 0xc7b   : > { %v3242_v57 = vpop.permute.xlu0 %3241 }
 0xc7c   : > { %v3244_v47 = vsel %vm1288_vm3, %v3235_v58, %v3242_v57  ;;  %v3845_v57 = vld [vmem:[#allocation14 + $0x10] sm:$0xff] }
 0xc7d   : > { %v3245_v27 = vpack.c.bf16 %v3244_v47, %v3244_v47 }
 0xc7f   : > { %3386 = vmatmul.mubr.bf16.vlgmr.msra.gmra.mxu1 %v3245_v27 }
 0xc80   : > { %4987 = vmatprep.mubr.msk.bf16.mxu1 %vm5905_vm2, %v5904_v8 }
 0xd3f   : > { %v3387_v5 = vpop.f32.mrf.mxu1 }
 0xd40   : > { %v3388_v6 = vadd.f32 %v4557_v4, %v3387_v5  ;;  %v3929_v4 = vld [vmem:[#allocation16 + $0x28] sm:$0xff]  ;;  %v3928_v5 = vld [vmem:[#allocation16 + $0x20] sm:$0xff] }
 0xd41   : > { %v3389_v7 = vpop.f32.mrf.mxu1 }
 0xd42   : > { %v3393_v35 = vmax.f32 %v3388_v6, 0.0  ;;  %v3927_v6 = vld [vmem:[#allocation16 + $0x18] sm:$0xff]  ;;  %v3926_v7 = vld [vmem:[#allocation16 + $0x10] sm:$0xff] }
 0xd43   : > { %v3390_v9 = vpop.f32.mrf.mxu1 }
 0xd44   : > { %v3394_v10 = vrot.slane %v3393_v35, 4  ;;  %v3406_v11 = vpack.c.bf16 %v3393_v35, %v3393_v35 }
 0xd45   : > { %v3391_v12 = vpop.f32.mrf.mxu1 }
 0xd46   : > { %v3395_v13 = vsel %vm3214_vm10, %v3394_v10, %v3393_v35  ;;  %3639 = vmatprep.mubr.bf16.mxu0 %v3406_v11 }
 0xd47   : > { %v3396_v14 = vrot.slane %v3395_v13, 4  ;;  %v3924_v13 = vld [vmem:[#allocation16] sm:$0xff] }
 0xd49   : > { %v3397_v16 = vsel %vm3214_vm10, %v3396_v14, %v3393_v35  ;;  %v3925_v35 = vld [vmem:[#allocation16 + $0x8] sm:$0xff] }
 0xd4a   : > { %v3399_v15 = vrot.slane %v3397_v16, 3  ;;  %v3402_v25 = vrot.slane %v3397_v16, 1 }
 0xd4c   : > { %v4599_v17 = vpack.c.bf16 %v3399_v15, %v3399_v15  ;;  %v4604_v26 = vpack.c.bf16 %v3402_v25, %v3402_v25  ;;  %v4039_v15 = vld [vmem:[#allocation19 + $0x8] sm:$0xff]  ;;  %v4620_v25 = vld [vmem:[%s6065_s29] ss:$0 sm:$0xff] }
 0xd4e   : > { %4600 = vmatmul.mubr.msk.bf16.vlgmr.msra.gmra.mxu0 %vm4598_vm14, %v4599_v17  ;;  %v4616_v17 = vld [vmem:[#allocation17] ss:$0 sm:$0xff] }
 0xd4f   : > { %4966 = vmatpush3.bf16.msra.mxu0 %v5434_v3  ;;  %4981 = vmatprep.mubr.msk.bf16.mxu0 %vm5905_vm2, %v5904_v8  ;;  %v4038_v3 = vld [vmem:[#allocation19] sm:$0xff] }
 0xd50   : > { %4967 = vmatprep.subr.bf16.mxu0 %v5904_v8 }
 0xd53   : > { %4968 = vmatpush3.bf16.msra.mxu0 %v5435_v18 }
 0xd54   : > { %4969 = vmatprep.subr.bf16.mxu0 %v5904_v8 }
 0xd57   : > { %4970 = vmatpush3.bf16.msra.mxu0 %v5436_v19  ;;  %v4618_v19 = vld [vmem:[%s6933_s4] ss:$0 sm:$0xff]  ;;  %s6782_s4 = scalar_lea.hbm %s6080_s3, %s4624_s24 }
 0xd58   : > { %4971 = vmatprep.subr.bf16.mxu0 %v5904_v8 }
 0xd5b   : > { %4972 = vmatpush3.bf16.msra.mxu0 %v5437_v20 }
 0xd5c   : > { %4973 = vmatprep.subr.bf16.mxu0 %v5904_v8 }
 0xd5f   : > { %4974 = vmatpush3.bf16.msra.mxu0 %v5438_v21 }
 0xd60   : > { %4975 = vmatprep.subr.bf16.mxu0 %v5904_v8 }
 0xd63   : > { %4976 = vmatpush3.bf16.msra.mxu0 %v5439_v22 }
 0xd64   : > { %4977 = vmatprep.subr.bf16.mxu0 %v5904_v8 }
 0xd67   : > { %4978 = vmatpush3.bf16.msra.mxu0 %v5440_v23  ;;  %v4619_v23 = vld [vmem:[%s6934_s7] ss:$0 sm:$0xff]  ;;  %s4122_s7 = scalar_lea.sflag [#allocation4], %s1172_s11 }
 0xd68   : > { %4979 = vmatprep.subr.bf16.mxu0 %v5904_v8 }
 0xd6b   : > { %4980 = vmatpush3.bf16.msra.mxu0 %v5441_v24 }
 0xd6c   : > { %5011 = vmatprep.subr.mxu0 %v5904_v8 }
 0xd6e   : > { %4982 = vmatmul.mubr.msk.bf16.vlgmr.msra.gmra.mxu0 %vm4603_vm15, %v4604_v26 }
 0xd6f   : > { %5027 = vmatprep.mubr.msk.f32.mxu0 %vm5905_vm2, %v5904_v8  ;;  %5012 = vmatpush3.msra.mxu0 %v3850_v2 }
 0xd70   : > { %5013 = vmatprep.subr.mxu0 %v5904_v8 }
 0xd71   : > { %5014 = vmatpush3.msra.mxu0 %v3849_v53 }
 0xd72   : > { %5015 = vmatprep.subr.mxu0 %v5904_v8 }
 0xd73   : > { %5016 = vmatpush3.msra.mxu0 %v3848_v54 }
 0xd74   : > { %5017 = vmatprep.subr.mxu0 %v5904_v8 }
 0xd75   : > { %5018 = vmatpush3.msra.mxu0 %v3847_v55 }
 0xd76   : > { %5019 = vmatprep.subr.mxu0 %v5904_v8 }
 0xd77   : > { %5020 = vmatpush3.msra.mxu0 %v3846_v56 }
 0xd78   : > { %5021 = vmatprep.subr.mxu0 %v5904_v8 }
 0xd79   : > { %5022 = vmatpush3.msra.mxu0 %v3845_v57 }
 0xd7a   : > { %5023 = vmatprep.subr.mxu0 %v5904_v8 }
 0xd7b   : > { %5024 = vmatpush3.msra.mxu0 %v3844_v61 }
 0xd7c   : > { %5025 = vmatprep.subr.mxu0 %v5904_v8 }
 0xd7d   : > { %5026 = vmatpush3.msra.mxu0 %v3843_v62 }
 0xd7e   : > { %5049 = vmatprep.subr.mxu0 %v5904_v8 }
 0xe0e   : > { %v4778_v28 = vpop.f32.mrf.mxu0 }
 0xe10   : > { %v4779_v29 = vpop.f32.mrf.mxu0 }
 0xe11   : > { %v4780_v32 = vadd.f32 %v4779_v29, %v4778_v28 }
 0xe12   : > { %v4781_v30 = vpop.f32.mrf.mxu0 }
 0xe13   : > { %v3642_v34 = vadd.f32 %v4780_v32, %v4571_v33 }
 0xe14   : > { %v4782_v31 = vpop.f32.mrf.mxu0 }
 0xe2e   : > { %v3681_v36 = vpop.f32.mrf.mxu0 }
 0xe2f   : > { %v3682_v37 = vadd.f32 %v3681_v36, %v3642_v34 }
 0xe30   : > { %v4983_v38 = vpop.f32.mrf.mxu0 }
 0xe31   : > { %v3687_v39 = vmax.f32 %v3682_v37, 0.0 }
 0xe32   : > { %v3684_v40 = vpop.f32.mrf.mxu0 }
 0xe33   : > { %v3689_v1 = vpack.c.bf16 %v3687_v39, %v3687_v39 }
 0xe34   : > { %v4984_v41 = vpop.f32.mrf.mxu0 }
 0xe35   : > { %v3696_v42 = vsel %vm3694_vm4, %v3689_v1, 0 }
 0xe36   : > { %4986 = vmatpush3.bf16.msra.mxu1 %v3696_v42 }
 0xe37   : > { %4991 = vmatprep.subr.bf16.mxu1 %v5904_v8 }
 0xe39   : > { %4988 = vmatmul.mubr.msk.bf16.vlgmr.msra.gmra.mxu1 %vm3690_vm5, %v3688_v43 }
 0xe3a   : > { %4992 = vmatpush3.bf16.msra.mxu1 %v5442_v44  ;;  %5007 = vmatprep.mubr.msk.bf16.mxu1 %vm5905_vm2, %v5904_v8 }
 0xe3b   : > { %4993 = vmatprep.subr.bf16.mxu1 %v5904_v8 }
 0xe3e   : > { %4994 = vmatpush3.bf16.msra.mxu1 %v5443_v46 }
 0xe3f   : > { %4995 = vmatprep.subr.bf16.mxu1 %v5904_v8 }
 0xe42   : > { %4996 = vmatpush3.bf16.msra.mxu1 %v5444_v48 }
 0xe43   : > { %4997 = vmatprep.subr.bf16.mxu1 %v5904_v8 }
 0xe46   : > { %4998 = vmatpush3.bf16.msra.mxu1 %v5445_v49 }
 0xe47   : > { %4999 = vmatprep.subr.bf16.mxu1 %v5904_v8 }
 0xe4a   : > { %5000 = vmatpush3.bf16.msra.mxu1 %v5446_v50 }
 0xe4b   : > { %5001 = vmatprep.subr.bf16.mxu1 %v5904_v8 }
 0xe4e   : > { %5002 = vmatpush3.bf16.msra.mxu1 %v5447_v51 }
 0xe4f   : > { %5003 = vmatprep.subr.bf16.mxu1 %v5904_v8 }
 0xe52   : > { %5004 = vmatpush3.bf16.msra.mxu1 %v5448_v52 }
 0xe53   : > { %5005 = vmatprep.subr.bf16.mxu1 %v5904_v8 }
 0xe56   : > { %5006 = vmatpush3.bf16.msra.mxu1 %v5449_v45 }
 0xe57   : > { %5030 = vmatprep.subr.mxu1 %v5904_v8 }
 0xef9   : > { %v3732_v58 = vpop.f32.mrf.mxu1 }
 0xefa   : > { %v3738_v47 = vpack.c.bf16 %v3732_v58, %v3732_v58 }
 0xefb   : > { %v4989_v27 = vpop.f32.mrf.mxu1 }
 0xefc   : > { %5008 = vmatmul.mubr.bf16.vlgmr.msra.gmra.mxu1 %v3738_v47 }
 0xefd   : > { %v3735_v59 = vpop.f32.mrf.mxu1  ;;  %5046 = vmatprep.mubr.msk.f32.mxu1 %vm5905_vm2, %v5904_v8  ;;  %5031 = vmatpush3.msra.mxu1 %v3931_v63 }
 0xefe   : > { %5032 = vmatprep.subr.mxu1 %v5904_v8 }
 0xeff   : > { %v4990_v60 = vpop.f32.mrf.mxu1  ;;  %5033 = vmatpush3.msra.mxu1 %v3930_v0 }
 0xf00   : > { %5034 = vmatprep.subr.mxu1 %v5904_v8 }
 0xf01   : > { %5035 = vmatpush3.msra.mxu1 %v3929_v4 }
 0xf02   : > { %5036 = vmatprep.subr.mxu1 %v5904_v8 }
 0xf03   : > { %5037 = vmatpush3.msra.mxu1 %v3928_v5 }
 0xf04   : > { %5038 = vmatprep.subr.mxu1 %v5904_v8 }
 0xf05   : > { %5039 = vmatpush3.msra.mxu1 %v3927_v6 }
 0xf06   : > { %5040 = vmatprep.subr.mxu1 %v5904_v8 }
 0xf07   : > { %5041 = vmatpush3.msra.mxu1 %v3926_v7 }
 0xf08   : > { %5042 = vmatprep.subr.mxu1 %v5904_v8 }
 0xf09   : > { %5043 = vmatpush3.msra.mxu1 %v3925_v35 }
 0xf0a   : > { %5044 = vmatprep.subr.mxu1 %v5904_v8 }
 0xf0b   : > { %5045 = vmatpush3.msra.mxu1 %v3924_v13 }
 0xfbc   : > { %v3837_v9 = vpop.f32.mrf.mxu1 }
 0xfbd   : > { %5028 = vmatmul.mubr.msk.f32.vlgmr.msra.gmra.mxu0 %vm1288_vm3, %v3837_v9 }
 0xfbe   : > { %v5009_v10 = vpop.f32.mrf.mxu1  ;;  %5053 = vmatprep.mubr.msk.f32.mxu0 %vm5905_vm2, %v5904_v8  ;;  %5050 = vmatpush3.msra.mxu0 %v4039_v15 }
 0xfbf   : > { %5051 = vmatprep.subr.mxu0 %v5904_v8  ;;  %v4621_v8 = vld [vmem:[#allocation20] ss:$0 sm:$0xff] }
 0xfc0   : > { %v3840_v11 = vpop.f32.mrf.mxu1  ;;  %5052 = vmatpush3.msra.mxu0 %v4038_v3 }
 0xfc2   : > { %v5010_v12 = vpop.f32.mrf.mxu1 }
0x107d   : > { %v3920_v14 = vpop.f32.mrf.mxu0 }
0x107e   : > { %5047 = vmatmul.mubr.msk.f32.vlgmr.msra.gmra.mxu1 %vm1288_vm3, %v3920_v14 }
0x107f   : > { %v5029_v16 = vpop.f32.mrf.mxu0 }
0x113e   : > { %v4008_v18 = vpop.f32.mrf.mxu1 }
0x113f   : > { %v4009_v20 = vadd.f32 %v4616_v17, %v4008_v18 }
0x1140   : > { %v5048_v21 = vpop.f32.mrf.mxu1 }
0x1141   : > { %vm4012_vm2 = vcmp.ge.f32.partialorder %v4009_v20, 0.0  ;;  %v4020_v22 = vmul.f32 %v4618_v19, %v4009_v20 }
0x1143   : > { %v4021_v24 = vsel %vm4012_vm2, %v4009_v20, %v4020_v22 }
0x1144   : > { %v4029_v26 = vmul.f32 %v4619_v23, %v4021_v24 }
0x1146   : > { %v4037_v28 = vadd.f32 %v4620_v25, %v4029_v26 }
0x1148   : > { %5054 = vmatmul.mubr.msk.f32.vlgmr.msra.gmra.mxu0 %vm2451_vm0, %v4037_v28 }
0x1208   : > { %v4116_v29 = vpop.f32.mrf.mxu0 }
0x1209   : > { %v4117_v30 = vadd.f32 %v4621_v8, %v4116_v29 }
0x120a   : > { %v5055_v31 = vpop.f32.mrf.mxu0 }
0x120b   : > { %4120 = vst [vmem:[%s1174_s18] sm:$0x3] %v4117_v30 }
0x120c   : > { %5775 = shalt.err (!%p5772_p11)
}
0x120d   : > { %s5776_s0 = scalar_lea.hbm %s6782_s4, 32  ;;  %s5780_s11 = scalar_lea.hbm %s6080_s3, 64 }
0x120e   : > { %p5777_p9 = scmp.ne.s32.totalorder %s6782_s4, %s5776_s0  ;;  %p5781_p10 = scmp.lt.s32.totalorder %s6782_s4, %s6080_s3 }
0x120f   : > { %p5782_p0 = scmp.lt.s32.totalorder %s5780_s11, %s5776_s0 }
0x1210   : > { %p5778_p5 = pnand %p5777_p9, %p6935_p13 }
0x1211   : > { %p5783_p1 = por %p5782_p0, %p5781_p10 }
0x1212   : > { %p5779_p6 = pneg %p5778_p5 }
0x1214   : > { %p5784_p2 = pnand %p5783_p1, %p5779_p6 }
0x1216   : > { %5787 = shalt.err (!%p5784_p2)
}
0x1217   : > { %5104 = dma.vmem_to_hbm [thread:$0]  (%p6935_p13), %s4136_s1, 32, %s6782_s4, %s4122_s7  }
0x1218 PF: > { %s6936_s5 = sld [smem:[#allocation53_spill]]  ;;  %p5171_p3 = scmp.ge.s32.totalorder %s5850_s15, 2 }
0x1219   : > { %s6937_s8 = sld [smem:[#allocation57_spill]] }
0x121e   : > { %s4147_s6 = sand.u32 1, %s6936_s5  }
0x121f   : > { %p6938_p4 = scmp.ne.s32.totalorder %s6937_s8, 0  ;;  %s4148_s2 = scalar_lea.sflag [#allocation4], %s4147_s6 }
0x1221   : > { %p5144_p12 = pnand %p5171_p3, %p6938_p4 }
0x1223   : > { %p5145_p7 = pneg %p5144_p12 }
0x1225   : > { %5833 = dma.done.wait (%p5145_p7), %s4148_s2, 32  }
0x1226   : > { %5835 = vsyncadd (%p5145_p7), %s4148_s2, 4294967264  ;;  %s6939_s15 = sld [smem:[#allocation55_spill]]  ;;  %s6942_s7 = smov %s5842_s10 }
0x1227   : > { %s6940_s23 = sld [smem:[#allocation54_spill]] }
0x1228   : > { %s6941_s11 = sld [smem:[#allocation56_spill]] }
0x122c   : > { %p84_p8 = scmp.ge.s32.totalorder %s6939_s15, 4  }
0x122d   : > { %s6943_s10 = smov %s6940_s23 }
0x122e   :  { %86 = sbr.rel (!%p84_p8) target bundleno = 68 (0x44), region = 269 }
0x1233   :  { %4153 = vsyncpa [#allocation3], 1 }
0x1234   :  { %4155 = vsyncpa [#allocation3 + $0x1], 1 }
0x1235   :  { %4156 = vsyncpa [#allocation6], 1 }
0x1236   :  { %4157 = vsyncpa [#allocation9], 1 }
0x1237   :  { %4158 = vsyncpa [#allocation12], 1 }
0x1238   :  { %4159 = vsyncpa [#allocation15], 1 }
0x1239   :  { %4160 = vsyncpa [#allocation18], 1 }
0x123a   :  { %4161 = vsyncpa [#allocation21], 1 }
0x123b   :  { %4162 = vsyncpa [#allocation4], 1 }
0x123c   :  { %4164 = vsyncpa [#allocation4 + $0x1], 1 }

</bundles_post_ra>
